<compile_context>
chip_gen: v5e
topology: v5e:2x2
jax: 0.10.0
libtpu: 0.0.40
codegen_flags: <defaults>
</compile_context>

<pallas_src>
import jax
import jax.numpy as jnp
from typing import NamedTuple
from jax.experimental import pallas as pl
from jax.experimental.pallas import tpu as pltpu

_LANE = 128
_F32 = jnp.float32


def _round_up(v, m):
    return ((v + m - 1) // m) * m


def _vmem_capacity_bytes():
    try:
        return int(pltpu.get_tpu_info().vmem_capacity_bytes)
    except Exception:
        return 64 * 1024 * 1024  # conservative default (v7x per-TC VMEM)


class PreparedAEParams(NamedTuple):
    weights: tuple   # 8 padded [in_p, out_p] arrays in compute dtype (bf16)
    biases: tuple    # 8 padded [1, out_p] fp32 arrays
    ins: tuple       # logical fan-ins
    outs: tuple      # logical fan-outs
    ins_p: tuple     # lane-padded fan-ins
    outs_p: tuple    # lane-padded fan-outs


def prepare_ae_params(params, compute_dtype=jnp.bfloat16):
    """Pad + cast parameters once (hoisted out of the per-step forward path).

    params: list of 8 (W, b) with W: [in, out] (torch W.T) and b: [1, out].
    """
    ins = tuple(int(w.shape[0]) for (w, _) in params)
    outs = tuple(int(w.shape[1]) for (w, _) in params)
    ins_p = tuple(_round_up(d, _LANE) for d in ins)
    outs_p = tuple(_round_up(d, _LANE) for d in outs)
    ws, bs = [], []
    for (w, b), ip, op in zip(params, ins_p, outs_p):
        ws.append(jnp.pad(w.astype(compute_dtype),
                          ((0, ip - w.shape[0]), (0, op - w.shape[1]))))
        bs.append(jnp.pad(b.astype(_F32), ((0, 0), (0, op - b.shape[1]))))
    return PreparedAEParams(tuple(ws), tuple(bs), ins, outs, ins_p, outs_p)


def _ae_kernel(
    x_ref,
    w1_ref, b1_ref,
    w2_ref, b2_ref,
    w3_ref, b3_ref,
    wz_ref, bz_ref,
    w4_ref, b4_ref,
    w5_ref, b5_ref,
    w6_ref, b6_ref,
    wo_ref, bo_ref,
    xbar_ref, h1_ref, h2_ref, h3_ref, z_ref,
):
    cdt = w1_ref.dtype  # MXU operand dtype (bf16); accumulation is fp32

    def linear(v, w_ref, b_ref, relu):
        y = jnp.dot(v, w_ref[...], preferred_element_type=jnp.float32)
        y = y + b_ref[...]            # [1, out] fp32 bias broadcasts over rows
        if relu:
            y = jnp.maximum(y, 0.0)
        return y

    # Store each intermediate to its output ref as soon as it is produced so
    # only the current activation chain stays live (smaller vreg/VMEM pressure).
    h1 = linear(x_ref[...], w1_ref, b1_ref, True)        # enc_1 + ReLU
    h1_ref[...] = h1.astype(h1_ref.dtype)
    h2 = linear(h1.astype(cdt), w2_ref, b2_ref, True)    # enc_2 + ReLU
    h2_ref[...] = h2.astype(h2_ref.dtype)
    h3 = linear(h2.astype(cdt), w3_ref, b3_ref, True)    # enc_3 + ReLU
    h3_ref[...] = h3.astype(h3_ref.dtype)
    z = linear(h3.astype(cdt), wz_ref, bz_ref, False)    # z_layer
    z_ref[...] = z.astype(z_ref.dtype)
    d1 = linear(z.astype(cdt), w4_ref, b4_ref, True)     # dec_1 + ReLU
    d2 = linear(d1.astype(cdt), w5_ref, b5_ref, True)    # dec_2 + ReLU
    d3 = linear(d2.astype(cdt), w6_ref, b6_ref, True)    # dec_3 + ReLU
    x_bar = linear(d3.astype(cdt), wo_ref, bo_ref, False)  # x_bar_layer
    xbar_ref[...] = x_bar.astype(xbar_ref.dtype)


def ae_forward(x, prepped: PreparedAEParams, *, tb=None, out_dtype=jnp.bfloat16):
    """Fused AE forward pass.

    x:       [batch, n_input] float32
    prepped: result of prepare_ae_params(params)
    returns: (x_bar, enc_h1, enc_h2, enc_h3, z) in out_dtype (default bf16;
             fp32 accumulation is used inside the kernel).
    """
    batch, n_input = x.shape
    ins_p, outs_p = prepped.ins_p, prepped.outs_p
    assert prepped.ins[0] == n_input and prepped.outs[-1] == n_input

    cdt = prepped.weights[0].dtype
    cbytes = jnp.dtype(cdt).itemsize
    obytes = jnp.dtype(out_dtype).itemsize

    # Outputs: x_bar, h1, h2, h3, z (padded feature widths, lane-dense).
    out_feats = (outs_p[7], outs_p[0], outs_p[1], outs_p[2], outs_p[3])

    vmem_cap = _vmem_capacity_bytes()
    # Single-buffered resident parameter footprint (biases pad to 8 sublanes).
    param_vmem_1 = sum(ip * op * cbytes + 8 * op * 4
                       for ip, op in zip(ins_p, outs_p))

    def _vmem_est(tb_rows, param_bufs):
        act = 2 * tb_rows * ins_p[0] * cbytes                    # x (dbl-buffered)
        act += 2 * sum(tb_rows * f * obytes for f in out_feats)  # outputs (dbl)
        live = 3 * tb_rows * max(outs_p) * 4                     # live fp32 acts
        return param_bufs * param_vmem_1 + act + live

    if tb is None:
        # Larger batch tiles on 128 MiB-VMEM chips (v5e/v6e), smaller on v7x.
        tb = 1024 if vmem_cap >= 96 * 1024 * 1024 else 256

    batch_128 = _round_up(batch, _LANE)
    TB = min(_round_up(tb, _LANE), batch_128)
    # Keep >= 2 batch tiles when the batch allows it so the "parallel" grid
    # axis can populate both TensorCores on v7x megacore.
    if batch_128 // TB < 2 and batch_128 >= 2 * _LANE:
        TB = _round_up(batch_128 // 2, _LANE)
    # Shrink the tile if the estimated footprint would not fit comfortably.
    budget = int(0.70 * vmem_cap)
    while TB > _LANE and _vmem_est(TB, 1) > budget:
        TB = max(_LANE, _round_up(TB // 2, _LANE))

    batch_p = _round_up(batch, TB)
    grid = (batch_p // TB,)

    # Pad/cast x only when needed (params were pre-padded once, outside here).
    x_c = x.astype(cdt)
    if batch_p != batch or ins_p[0] != n_input:
        x_c = jnp.pad(x_c, ((0, batch_p - batch), (0, ins_p[0] - n_input)))

    flat_args = [x_c]
    for w, b in zip(prepped.weights, prepped.biases):
        flat_args += [w, b]

    out_shape = tuple(jax.ShapeDtypeStruct((batch_p, f), out_dtype)
                      for f in out_feats)
    out_specs = tuple(pl.BlockSpec((TB, f), lambda i: (i, 0)) for f in out_feats)

    flops = 2 * batch_p * sum(ip * op for ip, op in zip(ins_p, outs_p))
    hbm_bytes = (sum(ip * op * cbytes + op * 4 for ip, op in zip(ins_p, outs_p))
                 + batch_p * ins_p[0] * cbytes
                 + sum(batch_p * f * obytes for f in out_feats))
    cost = pl.CostEstimate(flops=flops, transcendentals=0,
                           bytes_accessed=hbm_bytes)

    def _call(single_buffer_weights):
        # Weights/biases never change across grid steps: constant index_map,
        # and (when supported) a single pipeline buffer to halve their VMEM.
        w_kwargs = ({"pipeline_mode": pl.Buffered(1)}
                    if single_buffer_weights else {})
        in_specs = [pl.BlockSpec((TB, ins_p[0]), lambda i: (i, 0))]
        for ip, op in zip(ins_p, outs_p):
            in_specs.append(pl.BlockSpec((ip, op), lambda i: (0, 0), **w_kwargs))
            in_specs.append(pl.BlockSpec((1, op), lambda i: (0, 0), **w_kwargs))

        est = _vmem_est(TB, 1 if single_buffer_weights else 2)
        vmem_limit = min(int(0.78 * vmem_cap),
                         max(32 * 1024 * 1024, 2 * est))
        vmem_limit = max(vmem_limit,
                         min(est + (2 << 20), int(0.90 * vmem_cap)))

        return pl.pallas_call(
            _ae_kernel,
            out_shape=out_shape,
            grid=grid,
            in_specs=in_specs,
            out_specs=out_specs,
            compiler_params=pltpu.CompilerParams(
                dimension_semantics=("parallel",),   # shard batch tiles on v7x
                vmem_limit_bytes=int(vmem_limit)),
            cost_estimate=cost,
        )(*flat_args)

    try:
        outs_padded = _call(True)      # single-buffered resident weights
    except Exception:
        outs_padded = _call(False)     # fallback if pl.Buffered(1) unsupported

    logical = (n_input, prepped.outs[0], prepped.outs[1],
               prepped.outs[2], prepped.outs[3])
    return tuple(o[:batch, :f] for o, f in zip(outs_padded, logical))


def init_ae_params(key, n_enc_1, n_enc_2, n_enc_3, n_dec_1, n_dec_2, n_dec_3,
                   n_input, n_z):
    """Deterministic parameter init (shapes match the PyTorch module).

    Each Linear(in, out) gets W: [in, out] (W.T of torch layout), b: [1, out].
    """
    dims = [
        (n_input, n_enc_1),   # enc_1
        (n_enc_1, n_enc_2),   # enc_2
        (n_enc_2, n_enc_3),   # enc_3
        (n_enc_3, n_z),       # z_layer
        (n_z, n_dec_1),       # dec_1
        (n_dec_1, n_dec_2),   # dec_2
        (n_dec_2, n_dec_3),   # dec_3
        (n_dec_3, n_input),   # x_bar_layer
    ]
    params = []
    for (fan_in, fan_out) in dims:
        key, kw, kb = jax.random.split(key, 3)
        bound = 1.0 / jnp.sqrt(jnp.float32(fan_in))
        w = jax.random.uniform(kw, (fan_in, fan_out), jnp.float32, -bound, bound)
        b = jax.random.uniform(kb, (1, fan_out), jnp.float32, -bound, bound)
        params.append((w, b))
    return params


def ae_forward_ref(x, params, compute_dtype=jnp.bfloat16):
    """Plain-JAX reference with the same bf16-operand / fp32-accumulate math."""
    def lin(v, w, b, relu):
        y = jnp.dot(v.astype(compute_dtype), w.astype(compute_dtype),
                    preferred_element_type=jnp.float32)
        y = y + b.astype(jnp.float32)
        return jnp.maximum(y, 0.0) if relu else y
    h1 = lin(x, *params[0], True)
    h2 = lin(h1, *params[1], True)
    h3 = lin(h2, *params[2], True)
    z = lin(h3, *params[3], False)
    d1 = lin(z, *params[4], True)
    d2 = lin(d1, *params[5], True)
    d3 = lin(d2, *params[6], True)
    x_bar = lin(d3, *params[7], False)
    return x_bar, h1, h2, h3, z


if __name__ == "__main__":
    # Small, forward-consistent shapes.
    batch = 8
    n_input = 32
    n_enc_1, n_enc_2, n_enc_3 = 64, 32, 16
    n_dec_1, n_dec_2, n_dec_3 = 16, 32, 64
    n_z = 8

    key = jax.random.PRNGKey(0)
    key, kx = jax.random.split(key)
    x = jax.random.normal(kx, (batch, n_input), jnp.float32)

    params = init_ae_params(key, n_enc_1, n_enc_2, n_enc_3,
                            n_dec_1, n_dec_2, n_dec_3, n_input, n_z)
    prepped = prepare_ae_params(params)        # pad/cast once, outside forward

    outs = ae_forward(x, prepped)              # bf16 outputs, fp32 accumulation
    outs = jax.block_until_ready(outs)

    refs = ae_forward_ref(x, params)
    names = ("x_bar", "enc_h1", "enc_h2", "enc_h3", "z")
    for name, o, r in zip(names, outs, refs):
        assert o.shape == r.shape, name
        r_q = r.astype(o.dtype).astype(jnp.float32)   # same output rounding
        o_f = o.astype(jnp.float32)
        assert jnp.allclose(o_f, r_q, atol=3e-2, rtol=3e-2), name

    print("KERNEL_OK")
</pallas_src>

<mosaic_0001>
module attributes {stable_mosaic.version = 11 : i64} {
  func.func @_ae_kernel(%arg0: i32, %arg1: memref<128x128xbf16, #tpu.memory_space<vmem>>, %arg2: memref<128x128xbf16, #tpu.memory_space<vmem>>, %arg3: memref<1x128xf32, #tpu.memory_space<vmem>>, %arg4: memref<128x128xbf16, #tpu.memory_space<vmem>>, %arg5: memref<1x128xf32, #tpu.memory_space<vmem>>, %arg6: memref<128x128xbf16, #tpu.memory_space<vmem>>, %arg7: memref<1x128xf32, #tpu.memory_space<vmem>>, %arg8: memref<128x128xbf16, #tpu.memory_space<vmem>>, %arg9: memref<1x128xf32, #tpu.memory_space<vmem>>, %arg10: memref<128x128xbf16, #tpu.memory_space<vmem>>, %arg11: memref<1x128xf32, #tpu.memory_space<vmem>>, %arg12: memref<128x128xbf16, #tpu.memory_space<vmem>>, %arg13: memref<1x128xf32, #tpu.memory_space<vmem>>, %arg14: memref<128x128xbf16, #tpu.memory_space<vmem>>, %arg15: memref<1x128xf32, #tpu.memory_space<vmem>>, %arg16: memref<128x128xbf16, #tpu.memory_space<vmem>>, %arg17: memref<1x128xf32, #tpu.memory_space<vmem>>, %arg18: memref<128x128xbf16, #tpu.memory_space<vmem>>, %arg19: memref<128x128xbf16, #tpu.memory_space<vmem>>, %arg20: memref<128x128xbf16, #tpu.memory_space<vmem>>, %arg21: memref<128x128xbf16, #tpu.memory_space<vmem>>, %arg22: memref<128x128xbf16, #tpu.memory_space<vmem>>) attributes {dimension_semantics = [#tpu.dimension_semantics<parallel>], iteration_bounds = array<i64: 1>, scalar_prefetch = 0 : i64, scratch_operands = 0 : i64, tpu.core_type = #tpu.core_type<tc>, window_params = [{transform_indices = @transform_0, window_bounds = array<i64: 128, 128>}, {pipeline_mode = #tpu.pipeline_mode<synchronous>, transform_indices = @transform_1, window_bounds = array<i64: 128, 128>}, {pipeline_mode = #tpu.pipeline_mode<synchronous>, transform_indices = @transform_2, window_bounds = array<i64: 1, 128>}, {pipeline_mode = #tpu.pipeline_mode<synchronous>, transform_indices = @transform_3, window_bounds = array<i64: 128, 128>}, {pipeline_mode = #tpu.pipeline_mode<synchronous>, transform_indices = @transform_4, window_bounds = array<i64: 1, 128>}, {pipeline_mode = #tpu.pipeline_mode<synchronous>, transform_indices = @transform_5, window_bounds = array<i64: 128, 128>}, {pipeline_mode = #tpu.pipeline_mode<synchronous>, transform_indices = @transform_6, window_bounds = array<i64: 1, 128>}, {pipeline_mode = #tpu.pipeline_mode<synchronous>, transform_indices = @transform_7, window_bounds = array<i64: 128, 128>}, {pipeline_mode = #tpu.pipeline_mode<synchronous>, transform_indices = @transform_8, window_bounds = array<i64: 1, 128>}, {pipeline_mode = #tpu.pipeline_mode<synchronous>, transform_indices = @transform_9, window_bounds = array<i64: 128, 128>}, {pipeline_mode = #tpu.pipeline_mode<synchronous>, transform_indices = @transform_10, window_bounds = array<i64: 1, 128>}, {pipeline_mode = #tpu.pipeline_mode<synchronous>, transform_indices = @transform_11, window_bounds = array<i64: 128, 128>}, {pipeline_mode = #tpu.pipeline_mode<synchronous>, transform_indices = @transform_12, window_bounds = array<i64: 1, 128>}, {pipeline_mode = #tpu.pipeline_mode<synchronous>, transform_indices = @transform_13, window_bounds = array<i64: 128, 128>}, {pipeline_mode = #tpu.pipeline_mode<synchronous>, transform_indices = @transform_14, window_bounds = array<i64: 1, 128>}, {pipeline_mode = #tpu.pipeline_mode<synchronous>, transform_indices = @transform_15, window_bounds = array<i64: 128, 128>}, {pipeline_mode = #tpu.pipeline_mode<synchronous>, transform_indices = @transform_16, window_bounds = array<i64: 1, 128>}, {transform_indices = @transform_17, window_bounds = array<i64: 128, 128>}, {transform_indices = @transform_18, window_bounds = array<i64: 128, 128>}, {transform_indices = @transform_19, window_bounds = array<i64: 128, 128>}, {transform_indices = @transform_20, window_bounds = array<i64: 128, 128>}, {transform_indices = @transform_21, window_bounds = array<i64: 128, 128>}]} {
    %c0 = arith.constant 0 : index
    %c0_0 = arith.constant 0 : index
    %0 = vector.load %arg1[%c0, %c0_0] : memref<128x128xbf16, #tpu.memory_space<vmem>>, vector<128x128xbf16>
    %c0_1 = arith.constant 0 : index
    %c0_2 = arith.constant 0 : index
    %1 = vector.load %arg2[%c0_1, %c0_2] : memref<128x128xbf16, #tpu.memory_space<vmem>>, vector<128x128xbf16>
    %cst = arith.constant dense<0.000000e+00> : vector<128x128xf32>
    %2 = tpu.matmul %0, %1, %cst {dimension_numbers = #tpu.dot_dimension_numbers<[1], [0], [0], [1], [0, 0, 1, 1], [], []>} : vector<128x128xbf16>, vector<128x128xbf16>, vector<128x128xf32> -> vector<128x128xf32>
    %c0_3 = arith.constant 0 : index
    %c0_4 = arith.constant 0 : index
    %3 = vector.load %arg3[%c0_3, %c0_4] : memref<1x128xf32, #tpu.memory_space<vmem>>, vector<1x128xf32>
    %4 = vector.broadcast %3 : vector<1x128xf32> to vector<128x128xf32>
    %5 = arith.addf %2, %4 : vector<128x128xf32>
    %cst_5 = arith.constant 0.000000e+00 : f32
    %6 = vector.broadcast %cst_5 : f32 to vector<128x128xf32>
    %7 = arith.maximumf %5, %6 : vector<128x128xf32>
    %8 = arith.truncf %7 : vector<128x128xf32> to vector<128x128xbf16>
    %c0_6 = arith.constant 0 : index
    %c0_7 = arith.constant 0 : index
    %9 = vector.load %arg19[%c0_6, %c0_7] : memref<128x128xbf16, #tpu.memory_space<vmem>>, vector<128x128xbf16>
    tpu.vector_store %arg19[%c0_6, %c0_7], %8 {strides = array<i32>} : memref<128x128xbf16, #tpu.memory_space<vmem>>, vector<128x128xbf16>,
    %10 = arith.truncf %7 : vector<128x128xf32> to vector<128x128xbf16>
    %c0_8 = arith.constant 0 : index
    %c0_9 = arith.constant 0 : index
    %11 = vector.load %arg4[%c0_8, %c0_9] : memref<128x128xbf16, #tpu.memory_space<vmem>>, vector<128x128xbf16>
    %cst_10 = arith.constant dense<0.000000e+00> : vector<128x128xf32>
    %12 = tpu.matmul %10, %11, %cst_10 {dimension_numbers = #tpu.dot_dimension_numbers<[1], [0], [0], [1], [0, 0, 1, 1], [], []>} : vector<128x128xbf16>, vector<128x128xbf16>, vector<128x128xf32> -> vector<128x128xf32>
    %c0_11 = arith.constant 0 : index
    %c0_12 = arith.constant 0 : index
    %13 = vector.load %arg5[%c0_11, %c0_12] : memref<1x128xf32, #tpu.memory_space<vmem>>, vector<1x128xf32>
    %14 = vector.broadcast %13 : vector<1x128xf32> to vector<128x128xf32>
    %15 = arith.addf %12, %14 : vector<128x128xf32>
    %cst_13 = arith.constant 0.000000e+00 : f32
    %16 = vector.broadcast %cst_13 : f32 to vector<128x128xf32>
    %17 = arith.maximumf %15, %16 : vector<128x128xf32>
    %18 = arith.truncf %17 : vector<128x128xf32> to vector<128x128xbf16>
    %c0_14 = arith.constant 0 : index
    %c0_15 = arith.constant 0 : index
    %19 = vector.load %arg20[%c0_14, %c0_15] : memref<128x128xbf16, #tpu.memory_space<vmem>>, vector<128x128xbf16>
    tpu.vector_store %arg20[%c0_14, %c0_15], %18 {strides = array<i32>} : memref<128x128xbf16, #tpu.memory_space<vmem>>, vector<128x128xbf16>,
    %20 = arith.truncf %17 : vector<128x128xf32> to vector<128x128xbf16>
    %c0_16 = arith.constant 0 : index
    %c0_17 = arith.constant 0 : index
    %21 = vector.load %arg6[%c0_16, %c0_17] : memref<128x128xbf16, #tpu.memory_space<vmem>>, vector<128x128xbf16>
    %cst_18 = arith.constant dense<0.000000e+00> : vector<128x128xf32>
    %22 = tpu.matmul %20, %21, %cst_18 {dimension_numbers = #tpu.dot_dimension_numbers<[1], [0], [0], [1], [0, 0, 1, 1], [], []>} : vector<128x128xbf16>, vector<128x128xbf16>, vector<128x128xf32> -> vector<128x128xf32>
    %c0_19 = arith.constant 0 : index
    %c0_20 = arith.constant 0 : index
    %23 = vector.load %arg7[%c0_19, %c0_20] : memref<1x128xf32, #tpu.memory_space<vmem>>, vector<1x128xf32>
    %24 = vector.broadcast %23 : vector<1x128xf32> to vector<128x128xf32>
    %25 = arith.addf %22, %24 : vector<128x128xf32>
    %cst_21 = arith.constant 0.000000e+00 : f32
    %26 = vector.broadcast %cst_21 : f32 to vector<128x128xf32>
    %27 = arith.maximumf %25, %26 : vector<128x128xf32>
    %28 = arith.truncf %27 : vector<128x128xf32> to vector<128x128xbf16>
    %c0_22 = arith.constant 0 : index
    %c0_23 = arith.constant 0 : index
    %29 = vector.load %arg21[%c0_22, %c0_23] : memref<128x128xbf16, #tpu.memory_space<vmem>>, vector<128x128xbf16>
    tpu.vector_store %arg21[%c0_22, %c0_23], %28 {strides = array<i32>} : memref<128x128xbf16, #tpu.memory_space<vmem>>, vector<128x128xbf16>,
    %30 = arith.truncf %27 : vector<128x128xf32> to vector<128x128xbf16>
    %c0_24 = arith.constant 0 : index
    %c0_25 = arith.constant 0 : index
    %31 = vector.load %arg8[%c0_24, %c0_25] : memref<128x128xbf16, #tpu.memory_space<vmem>>, vector<128x128xbf16>
    %cst_26 = arith.constant dense<0.000000e+00> : vector<128x128xf32>
    %32 = tpu.matmul %30, %31, %cst_26 {dimension_numbers = #tpu.dot_dimension_numbers<[1], [0], [0], [1], [0, 0, 1, 1], [], []>} : vector<128x128xbf16>, vector<128x128xbf16>, vector<128x128xf32> -> vector<128x128xf32>
    %c0_27 = arith.constant 0 : index
    %c0_28 = arith.constant 0 : index
    %33 = vector.load %arg9[%c0_27, %c0_28] : memref<1x128xf32, #tpu.memory_space<vmem>>, vector<1x128xf32>
    %34 = vector.broadcast %33 : vector<1x128xf32> to vector<128x128xf32>
    %35 = arith.addf %32, %34 : vector<128x128xf32>
    %36 = arith.truncf %35 : vector<128x128xf32> to vector<128x128xbf16>
    %c0_29 = arith.constant 0 : index
    %c0_30 = arith.constant 0 : index
    %37 = vector.load %arg22[%c0_29, %c0_30] : memref<128x128xbf16, #tpu.memory_space<vmem>>, vector<128x128xbf16>
    tpu.vector_store %arg22[%c0_29, %c0_30], %36 {strides = array<i32>} : memref<128x128xbf16, #tpu.memory_space<vmem>>, vector<128x128xbf16>,
    %38 = arith.truncf %35 : vector<128x128xf32> to vector<128x128xbf16>
    %c0_31 = arith.constant 0 : index
    %c0_32 = arith.constant 0 : index
    %39 = vector.load %arg10[%c0_31, %c0_32] : memref<128x128xbf16, #tpu.memory_space<vmem>>, vector<128x128xbf16>
    %cst_33 = arith.constant dense<0.000000e+00> : vector<128x128xf32>
    %40 = tpu.matmul %38, %39, %cst_33 {dimension_numbers = #tpu.dot_dimension_numbers<[1], [0], [0], [1], [0, 0, 1, 1], [], []>} : vector<128x128xbf16>, vector<128x128xbf16>, vector<128x128xf32> -> vector<128x128xf32>
    %c0_34 = arith.constant 0 : index
    %c0_35 = arith.constant 0 : index
    %41 = vector.load %arg11[%c0_34, %c0_35] : memref<1x128xf32, #tpu.memory_space<vmem>>, vector<1x128xf32>
    %42 = vector.broadcast %41 : vector<1x128xf32> to vector<128x128xf32>
    %43 = arith.addf %40, %42 : vector<128x128xf32>
    %cst_36 = arith.constant 0.000000e+00 : f32
    %44 = vector.broadcast %cst_36 : f32 to vector<128x128xf32>
    %45 = arith.maximumf %43, %44 : vector<128x128xf32>
    %46 = arith.truncf %45 : vector<128x128xf32> to vector<128x128xbf16>
    %c0_37 = arith.constant 0 : index
    %c0_38 = arith.constant 0 : index
    %47 = vector.load %arg12[%c0_37, %c0_38] : memref<128x128xbf16, #tpu.memory_space<vmem>>, vector<128x128xbf16>
    %cst_39 = arith.constant dense<0.000000e+00> : vector<128x128xf32>
    %48 = tpu.matmul %46, %47, %cst_39 {dimension_numbers = #tpu.dot_dimension_numbers<[1], [0], [0], [1], [0, 0, 1, 1], [], []>} : vector<128x128xbf16>, vector<128x128xbf16>, vector<128x128xf32> -> vector<128x128xf32>
    %c0_40 = arith.constant 0 : index
    %c0_41 = arith.constant 0 : index
    %49 = vector.load %arg13[%c0_40, %c0_41] : memref<1x128xf32, #tpu.memory_space<vmem>>, vector<1x128xf32>
    %50 = vector.broadcast %49 : vector<1x128xf32> to vector<128x128xf32>
    %51 = arith.addf %48, %50 : vector<128x128xf32>
    %cst_42 = arith.constant 0.000000e+00 : f32
    %52 = vector.broadcast %cst_42 : f32 to vector<128x128xf32>
    %53 = arith.maximumf %51, %52 : vector<128x128xf32>
    %54 = arith.truncf %53 : vector<128x128xf32> to vector<128x128xbf16>
    %c0_43 = arith.constant 0 : index
    %c0_44 = arith.constant 0 : index
    %55 = vector.load %arg14[%c0_43, %c0_44] : memref<128x128xbf16, #tpu.memory_space<vmem>>, vector<128x128xbf16>
    %cst_45 = arith.constant dense<0.000000e+00> : vector<128x128xf32>
    %56 = tpu.matmul %54, %55, %cst_45 {dimension_numbers = #tpu.dot_dimension_numbers<[1], [0], [0], [1], [0, 0, 1, 1], [], []>} : vector<128x128xbf16>, vector<128x128xbf16>, vector<128x128xf32> -> vector<128x128xf32>
    %c0_46 = arith.constant 0 : index
    %c0_47 = arith.constant 0 : index
    %57 = vector.load %arg15[%c0_46, %c0_47] : memref<1x128xf32, #tpu.memory_space<vmem>>, vector<1x128xf32>
    %58 = vector.broadcast %57 : vector<1x128xf32> to vector<128x128xf32>
    %59 = arith.addf %56, %58 : vector<128x128xf32>
    %cst_48 = arith.constant 0.000000e+00 : f32
    %60 = vector.broadcast %cst_48 : f32 to vector<128x128xf32>
    %61 = arith.maximumf %59, %60 : vector<128x128xf32>
    %62 = arith.truncf %61 : vector<128x128xf32> to vector<128x128xbf16>
    %c0_49 = arith.constant 0 : index
    %c0_50 = arith.constant 0 : index
    %63 = vector.load %arg16[%c0_49, %c0_50] : memref<128x128xbf16, #tpu.memory_space<vmem>>, vector<128x128xbf16>
    %cst_51 = arith.constant dense<0.000000e+00> : vector<128x128xf32>
    %64 = tpu.matmul %62, %63, %cst_51 {dimension_numbers = #tpu.dot_dimension_numbers<[1], [0], [0], [1], [0, 0, 1, 1], [], []>} : vector<128x128xbf16>, vector<128x128xbf16>, vector<128x128xf32> -> vector<128x128xf32>
    %c0_52 = arith.constant 0 : index
    %c0_53 = arith.constant 0 : index
    %65 = vector.load %arg17[%c0_52, %c0_53] : memref<1x128xf32, #tpu.memory_space<vmem>>, vector<1x128xf32>
    %66 = vector.broadcast %65 : vector<1x128xf32> to vector<128x128xf32>
    %67 = arith.addf %64, %66 : vector<128x128xf32>
    %68 = arith.truncf %67 : vector<128x128xf32> to vector<128x128xbf16>
    %c0_54 = arith.constant 0 : index
    %c0_55 = arith.constant 0 : index
    %69 = vector.load %arg18[%c0_54, %c0_55] : memref<128x128xbf16, #tpu.memory_space<vmem>>, vector<128x128xbf16>
    tpu.vector_store %arg18[%c0_54, %c0_55], %68 {strides = array<i32>} : memref<128x128xbf16, #tpu.memory_space<vmem>>, vector<128x128xbf16>,
    return
  }
  func.func @transform_0(%arg0: i32) -> (i32, i32) {
    %c0_i32 = arith.constant 0 : i32
    %c0_i32_0 = arith.constant 0 : i32
    return %arg0, %c0_i32 : i32, i32
  }
  func.func @transform_1(%arg0: i32) -> (i32, i32) {
    %c0_i32 = arith.constant 0 : i32
    %c0_i32_0 = arith.constant 0 : i32
    %c0_i32_1 = arith.constant 0 : i32
    return %c0_i32, %c0_i32_0 : i32, i32
  }
  func.func @transform_2(%arg0: i32) -> (i32, i32) {
    %c0_i32 = arith.constant 0 : i32
    %c0_i32_0 = arith.constant 0 : i32
    %c0_i32_1 = arith.constant 0 : i32
    return %c0_i32, %c0_i32_0 : i32, i32
  }
  func.func @transform_3(%arg0: i32) -> (i32, i32) {
    %c0_i32 = arith.constant 0 : i32
    %c0_i32_0 = arith.constant 0 : i32
    %c0_i32_1 = arith.constant 0 : i32
    return %c0_i32, %c0_i32_0 : i32, i32
  }
  func.func @transform_4(%arg0: i32) -> (i32, i32) {
    %c0_i32 = arith.constant 0 : i32
    %c0_i32_0 = arith.constant 0 : i32
    %c0_i32_1 = arith.constant 0 : i32
    return %c0_i32, %c0_i32_0 : i32, i32
  }
  func.func @transform_5(%arg0: i32) -> (i32, i32) {
    %c0_i32 = arith.constant 0 : i32
    %c0_i32_0 = arith.constant 0 : i32
    %c0_i32_1 = arith.constant 0 : i32
    return %c0_i32, %c0_i32_0 : i32, i32
  }
  func.func @transform_6(%arg0: i32) -> (i32, i32) {
    %c0_i32 = arith.constant 0 : i32
    %c0_i32_0 = arith.constant 0 : i32
    %c0_i32_1 = arith.constant 0 : i32
    return %c0_i32, %c0_i32_0 : i32, i32
  }
  func.func @transform_7(%arg0: i32) -> (i32, i32) {
    %c0_i32 = arith.constant 0 : i32
    %c0_i32_0 = arith.constant 0 : i32
    %c0_i32_1 = arith.constant 0 : i32
    return %c0_i32, %c0_i32_0 : i32, i32
  }
  func.func @transform_8(%arg0: i32) -> (i32, i32) {
    %c0_i32 = arith.constant 0 : i32
    %c0_i32_0 = arith.constant 0 : i32
    %c0_i32_1 = arith.constant 0 : i32
    return %c0_i32, %c0_i32_0 : i32, i32
  }
  func.func @transform_9(%arg0: i32) -> (i32, i32) {
    %c0_i32 = arith.constant 0 : i32
    %c0_i32_0 = arith.constant 0 : i32
    %c0_i32_1 = arith.constant 0 : i32
    return %c0_i32, %c0_i32_0 : i32, i32
  }
  func.func @transform_10(%arg0: i32) -> (i32, i32) {
    %c0_i32 = arith.constant 0 : i32
    %c0_i32_0 = arith.constant 0 : i32
    %c0_i32_1 = arith.constant 0 : i32
    return %c0_i32, %c0_i32_0 : i32, i32
  }
  func.func @transform_11(%arg0: i32) -> (i32, i32) {
    %c0_i32 = arith.constant 0 : i32
    %c0_i32_0 = arith.constant 0 : i32
    %c0_i32_1 = arith.constant 0 : i32
    return %c0_i32, %c0_i32_0 : i32, i32
  }
  func.func @transform_12(%arg0: i32) -> (i32, i32) {
    %c0_i32 = arith.constant 0 : i32
    %c0_i32_0 = arith.constant 0 : i32
    %c0_i32_1 = arith.constant 0 : i32
    return %c0_i32, %c0_i32_0 : i32, i32
  }
  func.func @transform_13(%arg0: i32) -> (i32, i32) {
    %c0_i32 = arith.constant 0 : i32
    %c0_i32_0 = arith.constant 0 : i32
    %c0_i32_1 = arith.constant 0 : i32
    return %c0_i32, %c0_i32_0 : i32, i32
  }
  func.func @transform_14(%arg0: i32) -> (i32, i32) {
    %c0_i32 = arith.constant 0 : i32
    %c0_i32_0 = arith.constant 0 : i32
    %c0_i32_1 = arith.constant 0 : i32
    return %c0_i32, %c0_i32_0 : i32, i32
  }
  func.func @transform_15(%arg0: i32) -> (i32, i32) {
    %c0_i32 = arith.constant 0 : i32
    %c0_i32_0 = arith.constant 0 : i32
    %c0_i32_1 = arith.constant 0 : i32
    return %c0_i32, %c0_i32_0 : i32, i32
  }
  func.func @transform_16(%arg0: i32) -> (i32, i32) {
    %c0_i32 = arith.constant 0 : i32
    %c0_i32_0 = arith.constant 0 : i32
    %c0_i32_1 = arith.constant 0 : i32
    return %c0_i32, %c0_i32_0 : i32, i32
  }
  func.func @transform_17(%arg0: i32) -> (i32, i32) {
    %c0_i32 = arith.constant 0 : i32
    %c0_i32_0 = arith.constant 0 : i32
    return %arg0, %c0_i32 : i32, i32
  }
  func.func @transform_18(%arg0: i32) -> (i32, i32) {
    %c0_i32 = arith.constant 0 : i32
    %c0_i32_0 = arith.constant 0 : i32
    return %arg0, %c0_i32 : i32, i32
  }
  func.func @transform_19(%arg0: i32) -> (i32, i32) {
    %c0_i32 = arith.constant 0 : i32
    %c0_i32_0 = arith.constant 0 : i32
    return %arg0, %c0_i32 : i32, i32
  }
  func.func @transform_20(%arg0: i32) -> (i32, i32) {
    %c0_i32 = arith.constant 0 : i32
    %c0_i32_0 = arith.constant 0 : i32
    return %arg0, %c0_i32 : i32, i32
  }
  func.func @transform_21(%arg0: i32) -> (i32, i32) {
    %c0_i32 = arith.constant 0 : i32
    %c0_i32_0 = arith.constant 0 : i32
    return %arg0, %c0_i32 : i32, i32
  }
}

module attributes {stable_mosaic.version = 11 : i64} {
  func.func @_ae_kernel(%arg0: i32, %arg1: memref<128x128xbf16, #tpu.memory_space<vmem>>, %arg2: memref<128x128xbf16, #tpu.memory_space<vmem>>, %arg3: memref<1x128xf32, #tpu.memory_space<vmem>>, %arg4: memref<128x128xbf16, #tpu.memory_space<vmem>>, %arg5: memref<1x128xf32, #tpu.memory_space<vmem>>, %arg6: memref<128x128xbf16, #tpu.memory_space<vmem>>, %arg7: memref<1x128xf32, #tpu.memory_space<vmem>>, %arg8: memref<128x128xbf16, #tpu.memory_space<vmem>>, %arg9: memref<1x128xf32, #tpu.memory_space<vmem>>, %arg10: memref<128x128xbf16, #tpu.memory_space<vmem>>, %arg11: memref<1x128xf32, #tpu.memory_space<vmem>>, %arg12: memref<128x128xbf16, #tpu.memory_space<vmem>>, %arg13: memref<1x128xf32, #tpu.memory_space<vmem>>, %arg14: memref<128x128xbf16, #tpu.memory_space<vmem>>, %arg15: memref<1x128xf32, #tpu.memory_space<vmem>>, %arg16: memref<128x128xbf16, #tpu.memory_space<vmem>>, %arg17: memref<1x128xf32, #tpu.memory_space<vmem>>, %arg18: memref<128x128xbf16, #tpu.memory_space<vmem>>, %arg19: memref<128x128xbf16, #tpu.memory_space<vmem>>, %arg20: memref<128x128xbf16, #tpu.memory_space<vmem>>, %arg21: memref<128x128xbf16, #tpu.memory_space<vmem>>, %arg22: memref<128x128xbf16, #tpu.memory_space<vmem>>) attributes {dimension_semantics = [#tpu.dimension_semantics<parallel>], iteration_bounds = array<i64: 1>, scalar_prefetch = 0 : i64, scratch_operands = 0 : i64, tpu.core_type = #tpu.core_type<tc>, window_params = [{transform_indices = @transform_0, window_bounds = array<i64: 128, 128>}, {pipeline_mode = #tpu.pipeline_mode<synchronous>, transform_indices = @transform_1, window_bounds = array<i64: 128, 128>}, {pipeline_mode = #tpu.pipeline_mode<synchronous>, transform_indices = @transform_2, window_bounds = array<i64: 1, 128>}, {pipeline_mode = #tpu.pipeline_mode<synchronous>, transform_indices = @transform_3, window_bounds = array<i64: 128, 128>}, {pipeline_mode = #tpu.pipeline_mode<synchronous>, transform_indices = @transform_4, window_bounds = array<i64: 1, 128>}, {pipeline_mode = #tpu.pipeline_mode<synchronous>, transform_indices = @transform_5, window_bounds = array<i64: 128, 128>}, {pipeline_mode = #tpu.pipeline_mode<synchronous>, transform_indices = @transform_6, window_bounds = array<i64: 1, 128>}, {pipeline_mode = #tpu.pipeline_mode<synchronous>, transform_indices = @transform_7, window_bounds = array<i64: 128, 128>}, {pipeline_mode = #tpu.pipeline_mode<synchronous>, transform_indices = @transform_8, window_bounds = array<i64: 1, 128>}, {pipeline_mode = #tpu.pipeline_mode<synchronous>, transform_indices = @transform_9, window_bounds = array<i64: 128, 128>}, {pipeline_mode = #tpu.pipeline_mode<synchronous>, transform_indices = @transform_10, window_bounds = array<i64: 1, 128>}, {pipeline_mode = #tpu.pipeline_mode<synchronous>, transform_indices = @transform_11, window_bounds = array<i64: 128, 128>}, {pipeline_mode = #tpu.pipeline_mode<synchronous>, transform_indices = @transform_12, window_bounds = array<i64: 1, 128>}, {pipeline_mode = #tpu.pipeline_mode<synchronous>, transform_indices = @transform_13, window_bounds = array<i64: 128, 128>}, {pipeline_mode = #tpu.pipeline_mode<synchronous>, transform_indices = @transform_14, window_bounds = array<i64: 1, 128>}, {pipeline_mode = #tpu.pipeline_mode<synchronous>, transform_indices = @transform_15, window_bounds = array<i64: 128, 128>}, {pipeline_mode = #tpu.pipeline_mode<synchronous>, transform_indices = @transform_16, window_bounds = array<i64: 1, 128>}, {transform_indices = @transform_17, window_bounds = array<i64: 128, 128>}, {transform_indices = @transform_18, window_bounds = array<i64: 128, 128>}, {transform_indices = @transform_19, window_bounds = array<i64: 128, 128>}, {transform_indices = @transform_20, window_bounds = array<i64: 128, 128>}, {transform_indices = @transform_21, window_bounds = array<i64: 128, 128>}]} {
    %c0 = arith.constant 0 : index
    %c0_0 = arith.constant 0 : index
    %0 = vector.load %arg1[%c0, %c0_0] : memref<128x128xbf16, #tpu.memory_space<vmem>>, vector<128x128xbf16>
    %c0_1 = arith.constant 0 : index
    %c0_2 = arith.constant 0 : index
    %1 = vector.load %arg2[%c0_1, %c0_2] : memref<128x128xbf16, #tpu.memory_space<vmem>>, vector<128x128xbf16>
    %cst = arith.constant dense<0.000000e+00> : vector<128x128xf32>
    %2 = tpu.matmul %0, %1, %cst {dimension_numbers = #tpu.dot_dimension_numbers<[1], [0], [0], [1], [0, 0, 1, 1], [], []>} : vector<128x128xbf16>, vector<128x128xbf16>, vector<128x128xf32> -> vector<128x128xf32>
    %c0_3 = arith.constant 0 : index
    %c0_4 = arith.constant 0 : index
    %3 = vector.load %arg3[%c0_3, %c0_4] : memref<1x128xf32, #tpu.memory_space<vmem>>, vector<1x128xf32>
    %4 = vector.broadcast %3 : vector<1x128xf32> to vector<128x128xf32>
    %5 = arith.addf %2, %4 : vector<128x128xf32>
    %cst_5 = arith.constant 0.000000e+00 : f32
    %6 = vector.broadcast %cst_5 : f32 to vector<128x128xf32>
    %7 = arith.maximumf %5, %6 : vector<128x128xf32>
    %8 = arith.truncf %7 : vector<128x128xf32> to vector<128x128xbf16>
    %c0_6 = arith.constant 0 : index
    %c0_7 = arith.constant 0 : index
    %9 = vector.load %arg19[%c0_6, %c0_7] : memref<128x128xbf16, #tpu.memory_space<vmem>>, vector<128x128xbf16>
    tpu.vector_store %arg19[%c0_6, %c0_7], %8 {strides = array<i32>} : memref<128x128xbf16, #tpu.memory_space<vmem>>, vector<128x128xbf16>,
    %10 = arith.truncf %7 : vector<128x128xf32> to vector<128x128xbf16>
    %c0_8 = arith.constant 0 : index
    %c0_9 = arith.constant 0 : index
    %11 = vector.load %arg4[%c0_8, %c0_9] : memref<128x128xbf16, #tpu.memory_space<vmem>>, vector<128x128xbf16>
    %cst_10 = arith.constant dense<0.000000e+00> : vector<128x128xf32>
    %12 = tpu.matmul %10, %11, %cst_10 {dimension_numbers = #tpu.dot_dimension_numbers<[1], [0], [0], [1], [0, 0, 1, 1], [], []>} : vector<128x128xbf16>, vector<128x128xbf16>, vector<128x128xf32> -> vector<128x128xf32>
    %c0_11 = arith.constant 0 : index
    %c0_12 = arith.constant 0 : index
    %13 = vector.load %arg5[%c0_11, %c0_12] : memref<1x128xf32, #tpu.memory_space<vmem>>, vector<1x128xf32>
    %14 = vector.broadcast %13 : vector<1x128xf32> to vector<128x128xf32>
    %15 = arith.addf %12, %14 : vector<128x128xf32>
    %cst_13 = arith.constant 0.000000e+00 : f32
    %16 = vector.broadcast %cst_13 : f32 to vector<128x128xf32>
    %17 = arith.maximumf %15, %16 : vector<128x128xf32>
    %18 = arith.truncf %17 : vector<128x128xf32> to vector<128x128xbf16>
    %c0_14 = arith.constant 0 : index
    %c0_15 = arith.constant 0 : index
    %19 = vector.load %arg20[%c0_14, %c0_15] : memref<128x128xbf16, #tpu.memory_space<vmem>>, vector<128x128xbf16>
    tpu.vector_store %arg20[%c0_14, %c0_15], %18 {strides = array<i32>} : memref<128x128xbf16, #tpu.memory_space<vmem>>, vector<128x128xbf16>,
    %20 = arith.truncf %17 : vector<128x128xf32> to vector<128x128xbf16>
    %c0_16 = arith.constant 0 : index
    %c0_17 = arith.constant 0 : index
    %21 = vector.load %arg6[%c0_16, %c0_17] : memref<128x128xbf16, #tpu.memory_space<vmem>>, vector<128x128xbf16>
    %cst_18 = arith.constant dense<0.000000e+00> : vector<128x128xf32>
    %22 = tpu.matmul %20, %21, %cst_18 {dimension_numbers = #tpu.dot_dimension_numbers<[1], [0], [0], [1], [0, 0, 1, 1], [], []>} : vector<128x128xbf16>, vector<128x128xbf16>, vector<128x128xf32> -> vector<128x128xf32>
    %c0_19 = arith.constant 0 : index
    %c0_20 = arith.constant 0 : index
    %23 = vector.load %arg7[%c0_19, %c0_20] : memref<1x128xf32, #tpu.memory_space<vmem>>, vector<1x128xf32>
    %24 = vector.broadcast %23 : vector<1x128xf32> to vector<128x128xf32>
    %25 = arith.addf %22, %24 : vector<128x128xf32>
    %cst_21 = arith.constant 0.000000e+00 : f32
    %26 = vector.broadcast %cst_21 : f32 to vector<128x128xf32>
    %27 = arith.maximumf %25, %26 : vector<128x128xf32>
    %28 = arith.truncf %27 : vector<128x128xf32> to vector<128x128xbf16>
    %c0_22 = arith.constant 0 : index
    %c0_23 = arith.constant 0 : index
    %29 = vector.load %arg21[%c0_22, %c0_23] : memref<128x128xbf16, #tpu.memory_space<vmem>>, vector<128x128xbf16>
    tpu.vector_store %arg21[%c0_22, %c0_23], %28 {strides = array<i32>} : memref<128x128xbf16, #tpu.memory_space<vmem>>, vector<128x128xbf16>,
    %30 = arith.truncf %27 : vector<128x128xf32> to vector<128x128xbf16>
    %c0_24 = arith.constant 0 : index
    %c0_25 = arith.constant 0 : index
    %31 = vector.load %arg8[%c0_24, %c0_25] : memref<128x128xbf16, #tpu.memory_space<vmem>>, vector<128x128xbf16>
    %cst_26 = arith.constant dense<0.000000e+00> : vector<128x128xf32>
    %32 = tpu.matmul %30, %31, %cst_26 {dimension_numbers = #tpu.dot_dimension_numbers<[1], [0], [0], [1], [0, 0, 1, 1], [], []>} : vector<128x128xbf16>, vector<128x128xbf16>, vector<128x128xf32> -> vector<128x128xf32>
    %c0_27 = arith.constant 0 : index
    %c0_28 = arith.constant 0 : index
    %33 = vector.load %arg9[%c0_27, %c0_28] : memref<1x128xf32, #tpu.memory_space<vmem>>, vector<1x128xf32>
    %34 = vector.broadcast %33 : vector<1x128xf32> to vector<128x128xf32>
    %35 = arith.addf %32, %34 : vector<128x128xf32>
    %36 = arith.truncf %35 : vector<128x128xf32> to vector<128x128xbf16>
    %c0_29 = arith.constant 0 : index
    %c0_30 = arith.constant 0 : index
    %37 = vector.load %arg22[%c0_29, %c0_30] : memref<128x128xbf16, #tpu.memory_space<vmem>>, vector<128x128xbf16>
    tpu.vector_store %arg22[%c0_29, %c0_30], %36 {strides = array<i32>} : memref<128x128xbf16, #tpu.memory_space<vmem>>, vector<128x128xbf16>,
    %38 = arith.truncf %35 : vector<128x128xf32> to vector<128x128xbf16>
    %c0_31 = arith.constant 0 : index
    %c0_32 = arith.constant 0 : index
    %39 = vector.load %arg10[%c0_31, %c0_32] : memref<128x128xbf16, #tpu.memory_space<vmem>>, vector<128x128xbf16>
    %cst_33 = arith.constant dense<0.000000e+00> : vector<128x128xf32>
    %40 = tpu.matmul %38, %39, %cst_33 {dimension_numbers = #tpu.dot_dimension_numbers<[1], [0], [0], [1], [0, 0, 1, 1], [], []>} : vector<128x128xbf16>, vector<128x128xbf16>, vector<128x128xf32> -> vector<128x128xf32>
    %c0_34 = arith.constant 0 : index
    %c0_35 = arith.constant 0 : index
    %41 = vector.load %arg11[%c0_34, %c0_35] : memref<1x128xf32, #tpu.memory_space<vmem>>, vector<1x128xf32>
    %42 = vector.broadcast %41 : vector<1x128xf32> to vector<128x128xf32>
    %43 = arith.addf %40, %42 : vector<128x128xf32>
    %cst_36 = arith.constant 0.000000e+00 : f32
    %44 = vector.broadcast %cst_36 : f32 to vector<128x128xf32>
    %45 = arith.maximumf %43, %44 : vector<128x128xf32>
    %46 = arith.truncf %45 : vector<128x128xf32> to vector<128x128xbf16>
    %c0_37 = arith.constant 0 : index
    %c0_38 = arith.constant 0 : index
    %47 = vector.load %arg12[%c0_37, %c0_38] : memref<128x128xbf16, #tpu.memory_space<vmem>>, vector<128x128xbf16>
    %cst_39 = arith.constant dense<0.000000e+00> : vector<128x128xf32>
    %48 = tpu.matmul %46, %47, %cst_39 {dimension_numbers = #tpu.dot_dimension_numbers<[1], [0], [0], [1], [0, 0, 1, 1], [], []>} : vector<128x128xbf16>, vector<128x128xbf16>, vector<128x128xf32> -> vector<128x128xf32>
    %c0_40 = arith.constant 0 : index
    %c0_41 = arith.constant 0 : index
    %49 = vector.load %arg13[%c0_40, %c0_41] : memref<1x128xf32, #tpu.memory_space<vmem>>, vector<1x128xf32>
    %50 = vector.broadcast %49 : vector<1x128xf32> to vector<128x128xf32>
    %51 = arith.addf %48, %50 : vector<128x128xf32>
    %cst_42 = arith.constant 0.000000e+00 : f32
    %52 = vector.broadcast %cst_42 : f32 to vector<128x128xf32>
    %53 = arith.maximumf %51, %52 : vector<128x128xf32>
    %54 = arith.truncf %53 : vector<128x128xf32> to vector<128x128xbf16>
    %c0_43 = arith.constant 0 : index
    %c0_44 = arith.constant 0 : index
    %55 = vector.load %arg14[%c0_43, %c0_44] : memref<128x128xbf16, #tpu.memory_space<vmem>>, vector<128x128xbf16>
    %cst_45 = arith.constant dense<0.000000e+00> : vector<128x128xf32>
    %56 = tpu.matmul %54, %55, %cst_45 {dimension_numbers = #tpu.dot_dimension_numbers<[1], [0], [0], [1], [0, 0, 1, 1], [], []>} : vector<128x128xbf16>, vector<128x128xbf16>, vector<128x128xf32> -> vector<128x128xf32>
    %c0_46 = arith.constant 0 : index
    %c0_47 = arith.constant 0 : index
    %57 = vector.load %arg15[%c0_46, %c0_47] : memref<1x128xf32, #tpu.memory_space<vmem>>, vector<1x128xf32>
    %58 = vector.broadcast %57 : vector<1x128xf32> to vector<128x128xf32>
    %59 = arith.addf %56, %58 : vector<128x128xf32>
    %cst_48 = arith.constant 0.000000e+00 : f32
    %60 = vector.broadcast %cst_48 : f32 to vector<128x128xf32>
    %61 = arith.maximumf %59, %60 : vector<128x128xf32>
    %62 = arith.truncf %61 : vector<128x128xf32> to vector<128x128xbf16>
    %c0_49 = arith.constant 0 : index
    %c0_50 = arith.constant 0 : index
    %63 = vector.load %arg16[%c0_49, %c0_50] : memref<128x128xbf16, #tpu.memory_space<vmem>>, vector<128x128xbf16>
    %cst_51 = arith.constant dense<0.000000e+00> : vector<128x128xf32>
    %64 = tpu.matmul %62, %63, %cst_51 {dimension_numbers = #tpu.dot_dimension_numbers<[1], [0], [0], [1], [0, 0, 1, 1], [], []>} : vector<128x128xbf16>, vector<128x128xbf16>, vector<128x128xf32> -> vector<128x128xf32>
    %c0_52 = arith.constant 0 : index
    %c0_53 = arith.constant 0 : index
    %65 = vector.load %arg17[%c0_52, %c0_53] : memref<1x128xf32, #tpu.memory_space<vmem>>, vector<1x128xf32>
    %66 = vector.broadcast %65 : vector<1x128xf32> to vector<128x128xf32>
    %67 = arith.addf %64, %66 : vector<128x128xf32>
    %68 = arith.truncf %67 : vector<128x128xf32> to vector<128x128xbf16>
    %c0_54 = arith.constant 0 : index
    %c0_55 = arith.constant 0 : index
    %69 = vector.load %arg18[%c0_54, %c0_55] : memref<128x128xbf16, #tpu.memory_space<vmem>>, vector<128x128xbf16>
    tpu.vector_store %arg18[%c0_54, %c0_55], %68 {strides = array<i32>} : memref<128x128xbf16, #tpu.memory_space<vmem>>, vector<128x128xbf16>,
    return
  }
  func.func @transform_0(%arg0: i32) -> (i32, i32) {
    %c0_i32 = arith.constant 0 : i32
    %c0_i32_0 = arith.constant 0 : i32
    return %arg0, %c0_i32 : i32, i32
  }
  func.func @transform_1(%arg0: i32) -> (i32, i32) {
    %c0_i32 = arith.constant 0 : i32
    %c0_i32_0 = arith.constant 0 : i32
    %c0_i32_1 = arith.constant 0 : i32
    return %c0_i32, %c0_i32_0 : i32, i32
  }
  func.func @transform_2(%arg0: i32) -> (i32, i32) {
    %c0_i32 = arith.constant 0 : i32
    %c0_i32_0 = arith.constant 0 : i32
    %c0_i32_1 = arith.constant 0 : i32
    return %c0_i32, %c0_i32_0 : i32, i32
  }
  func.func @transform_3(%arg0: i32) -> (i32, i32) {
    %c0_i32 = arith.constant 0 : i32
    %c0_i32_0 = arith.constant 0 : i32
    %c0_i32_1 = arith.constant 0 : i32
    return %c0_i32, %c0_i32_0 : i32, i32
  }
  func.func @transform_4(%arg0: i32) -> (i32, i32) {
    %c0_i32 = arith.constant 0 : i32
    %c0_i32_0 = arith.constant 0 : i32
    %c0_i32_1 = arith.constant 0 : i32
    return %c0_i32, %c0_i32_0 : i32, i32
  }
  func.func @transform_5(%arg0: i32) -> (i32, i32) {
    %c0_i32 = arith.constant 0 : i32
    %c0_i32_0 = arith.constant 0 : i32
    %c0_i32_1 = arith.constant 0 : i32
    return %c0_i32, %c0_i32_0 : i32, i32
  }
  func.func @transform_6(%arg0: i32) -> (i32, i32) {
    %c0_i32 = arith.constant 0 : i32
    %c0_i32_0 = arith.constant 0 : i32
    %c0_i32_1 = arith.constant 0 : i32
    return %c0_i32, %c0_i32_0 : i32, i32
  }
  func.func @transform_7(%arg0: i32) -> (i32, i32) {
    %c0_i32 = arith.constant 0 : i32
    %c0_i32_0 = arith.constant 0 : i32
    %c0_i32_1 = arith.constant 0 : i32
    return %c0_i32, %c0_i32_0 : i32, i32
  }
  func.func @transform_8(%arg0: i32) -> (i32, i32) {
    %c0_i32 = arith.constant 0 : i32
    %c0_i32_0 = arith.constant 0 : i32
    %c0_i32_1 = arith.constant 0 : i32
    return %c0_i32, %c0_i32_0 : i32, i32
  }
  func.func @transform_9(%arg0: i32) -> (i32, i32) {
    %c0_i32 = arith.constant 0 : i32
    %c0_i32_0 = arith.constant 0 : i32
    %c0_i32_1 = arith.constant 0 : i32
    return %c0_i32, %c0_i32_0 : i32, i32
  }
  func.func @transform_10(%arg0: i32) -> (i32, i32) {
    %c0_i32 = arith.constant 0 : i32
    %c0_i32_0 = arith.constant 0 : i32
    %c0_i32_1 = arith.constant 0 : i32
    return %c0_i32, %c0_i32_0 : i32, i32
  }
  func.func @transform_11(%arg0: i32) -> (i32, i32) {
    %c0_i32 = arith.constant 0 : i32
    %c0_i32_0 = arith.constant 0 : i32
    %c0_i32_1 = arith.constant 0 : i32
    return %c0_i32, %c0_i32_0 : i32, i32
  }
  func.func @transform_12(%arg0: i32) -> (i32, i32) {
    %c0_i32 = arith.constant 0 : i32
    %c0_i32_0 = arith.constant 0 : i32
    %c0_i32_1 = arith.constant 0 : i32
    return %c0_i32, %c0_i32_0 : i32, i32
  }
  func.func @transform_13(%arg0: i32) -> (i32, i32) {
    %c0_i32 = arith.constant 0 : i32
    %c0_i32_0 = arith.constant 0 : i32
    %c0_i32_1 = arith.constant 0 : i32
    return %c0_i32, %c0_i32_0 : i32, i32
  }
  func.func @transform_14(%arg0: i32) -> (i32, i32) {
    %c0_i32 = arith.constant 0 : i32
    %c0_i32_0 = arith.constant 0 : i32
    %c0_i32_1 = arith.constant 0 : i32
    return %c0_i32, %c0_i32_0 : i32, i32
  }
  func.func @transform_15(%arg0: i32) -> (i32, i32) {
    %c0_i32 = arith.constant 0 : i32
    %c0_i32_0 = arith.constant 0 : i32
    %c0_i32_1 = arith.constant 0 : i32
    return %c0_i32, %c0_i32_0 : i32, i32
  }
  func.func @transform_16(%arg0: i32) -> (i32, i32) {
    %c0_i32 = arith.constant 0 : i32
    %c0_i32_0 = arith.constant 0 : i32
    %c0_i32_1 = arith.constant 0 : i32
    return %c0_i32, %c0_i32_0 : i32, i32
  }
  func.func @transform_17(%arg0: i32) -> (i32, i32) {
    %c0_i32 = arith.constant 0 : i32
    %c0_i32_0 = arith.constant 0 : i32
    return %arg0, %c0_i32 : i32, i32
  }
  func.func @transform_18(%arg0: i32) -> (i32, i32) {
    %c0_i32 = arith.constant 0 : i32
    %c0_i32_0 = arith.constant 0 : i32
    return %arg0, %c0_i32 : i32, i32
  }
  func.func @transform_19(%arg0: i32) -> (i32, i32) {
    %c0_i32 = arith.constant 0 : i32
    %c0_i32_0 = arith.constant 0 : i32
    return %arg0, %c0_i32 : i32, i32
  }
  func.func @transform_20(%arg0: i32) -> (i32, i32) {
    %c0_i32 = arith.constant 0 : i32
    %c0_i32_0 = arith.constant 0 : i32
    return %arg0, %c0_i32 : i32, i32
  }
  func.func @transform_21(%arg0: i32) -> (i32, i32) {
    %c0_i32 = arith.constant 0 : i32
    %c0_i32_0 = arith.constant 0 : i32
    return %arg0, %c0_i32 : i32, i32
  }
}

</mosaic_0001>

<bundles_post_ra>
// kernel: tpu_custom_call.1
= control target key start
LH: loop header
LB: loop body
LE: loop exit
PB: predicated region body
PF: predicated region fallthrough
CT: control target
= control target key end

     0   :  { %s3082_s0 = inlined_call_operand.hbm [shape: bf16[128,128], index: 0, kind: input, shape index: {}]   ;;  %s3083_s1 = inlined_call_operand.hbm [shape: bf16[128,128], index: 1, kind: input, shape index: {}]   ;;  %s3084_s2 = inlined_call_operand.vmem [shape: f32[1,128], index: 2, kind: input, shape index: {}]   ;;  %s3085_s3 = inlined_call_operand.hbm [shape: bf16[128,128], index: 3, kind: input, shape index: {}]   ;;  %s3086_s4 = inlined_call_operand.vmem [shape: f32[1,128], index: 4, kind: input, shape index: {}]   ;;  %s3087_s5 = inlined_call_operand.hbm [shape: bf16[128,128], index: 5, kind: input, shape index: {}]   ;;  %s3088_s6 = inlined_call_operand.vmem [shape: f32[1,128], index: 6, kind: input, shape index: {}]   ;;  %s3089_s7 = inlined_call_operand.hbm [shape: bf16[128,128], index: 7, kind: input, shape index: {}]   ;;  %s3090_s8 = inlined_call_operand.vmem [shape: f32[1,128], index: 8, kind: input, shape index: {}]   ;;  %s3091_s9 = inlined_call_operand.hbm [shape: bf16[128,128], index: 9, kind: input, shape index: {}]   ;;  %s3092_s10 = inlined_call_operand.vmem [shape: f32[1,128], index: 10, kind: input, shape index: {}]   ;;  %s3093_s11 = inlined_call_operand.hbm [shape: bf16[128,128], index: 11, kind: input, shape index: {}]   ;;  %s3094_s12 = inlined_call_operand.vmem [shape: f32[1,128], index: 12, kind: input, shape index: {}]   ;;  %s3095_s13 = inlined_call_operand.hbm [shape: bf16[128,128], index: 13, kind: input, shape index: {}]   ;;  %s3096_s14 = inlined_call_operand.vmem [shape: f32[1,128], index: 14, kind: input, shape index: {}]   ;;  %s3097_s15 = inlined_call_operand.hbm [shape: bf16[128,128], index: 15, kind: input, shape index: {}]   ;;  %s3098_s16 = inlined_call_operand.vmem [shape: f32[1,128], index: 16, kind: input, shape index: {}]   ;;  %s3099_s17 = inlined_call_operand.hbm [shape: bf16[128,128], index: 17, kind: output, shape index: {0}]   ;;  %s3100_s18 = inlined_call_operand.hbm [shape: bf16[128,128], index: 18, kind: output, shape index: {1}]   ;;  %s3101_s19 = inlined_call_operand.hbm [shape: bf16[128,128], index: 19, kind: output, shape index: {2}]   ;;  %s3102_s20 = inlined_call_operand.hbm [shape: bf16[128,128], index: 20, kind: output, shape index: {3}]   ;;  %s3103_s21 = inlined_call_operand.hbm [shape: bf16[128,128], index: 21, kind: output, shape index: {4}]  }
   0x1   :  { %3104 = sst [smem:[#allocation32_spill]] %s3082_s0 }
   0x2   :  { %3105 = sst [smem:[#allocation33_spill]] %s3083_s1 }
   0x3   :  { %3106 = sst [smem:[#allocation34_spill]] %s3084_s2 }
   0x4   :  { %3107 = sst [smem:[#allocation35_spill]] %s3085_s3 }
   0x5   :  { %3108 = sst [smem:[#allocation36_spill]] %s3086_s4 }
   0x6   :  { %3109 = sst [smem:[#allocation37_spill]] %s3087_s5 }
   0x7   :  { %27 = vsyncpa [#allocation3], 0 }
   0x8   :  { %28 = vsyncpa [#allocation6], 0 }
   0x9   :  { %29 = vsyncpa [#allocation9], 0 }
   0xa   :  { %30 = vsyncpa [#allocation12], 0 }
   0xb   :  { %31 = vsyncpa [#allocation15], 0 }
   0xc   :  { %32 = vsyncpa [#allocation4], 0 }
   0xd   :  { %33 = vsyncpa [#allocation19], 0 }
   0xe   :  { %34 = vsyncpa [#allocation22], 0  ;;  %s3110_s26 = sld [smem:[#allocation33_spill]]  ;;  %s2740_s3 = smov [#allocation5]  }
   0xf   :  { %s54_s28 = sshll.u32 %s2740_s3, 4  ;;  %s3111_s4 = sld [smem:[#allocation37_spill]]  ;;  %s55_s28 = int_to_ptr.vmem [resolvable:$true] %s54_s28 }
  0x10   :  { %s2741_s5 = smov 64   ;;  %s2742_s22 = smov 4  }
  0x11   :  { %s2743_s23 = smov [#allocation8]   ;;  %s112_s25 = sshll.u32 %s3091_s9, 4  ;;  %s113_s25 = int_to_ptr.hbm [resolvable:$true] %s112_s25 }
  0x12   :  { %s84_s1 = sshll.u32 %s2743_s23, 4  ;;  %s142_s29 = sshll.u32 %s3095_s13, 4  ;;  %s85_s1 = int_to_ptr.vmem [resolvable:$true] %s84_s1  ;;  %s143_s29 = int_to_ptr.hbm [resolvable:$true] %s142_s29 }
  0x13   :  { %s2744_s0 = smov [#allocation11]   ;;  %s3112_s24 = sld [smem:[#allocation32_spill]] }
  0x14   :  { %s52_s27 = sshll.u32 %s3110_s26, 4  ;;  %s2746_s3 = smov [#allocation2]   ;;  %s53_s27 = int_to_ptr.hbm [resolvable:$true] %s52_s27 }
  0x15   :  { %s82_s30 = sshll.u32 %s3111_s4, 4  ;;  %s114_s4 = sshll.u32 %s2744_s0, 4  ;;  %s83_s30 = int_to_ptr.hbm [resolvable:$true] %s82_s30  ;;  %s115_s4 = int_to_ptr.vmem [resolvable:$true] %s114_s4 }
  0x16   :  { %60 = dma.hbm_to_vmem [thread:$0]  %s53_s27, 1024, %s55_s28, [#allocation6], %s2741_s5, %s2741_s5, %s2742_s22  }
  0x17   :  { %90 = dma.hbm_to_vmem [thread:$0]  %s83_s30, 1024, %s85_s1, [#allocation9], %s2741_s5, %s2741_s5, %s2742_s22  }
  0x18   :  { %120 = dma.hbm_to_vmem [thread:$0]  %s113_s25, 1024, %s115_s4, [#allocation12], %s2741_s5, %s2741_s5, %s2742_s22  }
  0x19   :  { %s2745_s27 = smov [#allocation14]   ;;  %s39_s2 = sshll.u32 %s3112_s24, 4  ;;  %s40_s2 = int_to_ptr.hbm [resolvable:$true] %s39_s2 }
  0x1a   :  { %s144_s9 = sshll.u32 %s2745_s27, 4  ;;  %s3113_s1 = sld [smem:[#allocation35_spill]]  ;;  %s145_s9 = int_to_ptr.vmem [resolvable:$true] %s144_s9 }
  0x1b   :  { %150 = dma.hbm_to_vmem [thread:$0]  %s143_s29, 1024, %s145_s9, [#allocation15], %s2741_s5, %s2741_s5, %s2742_s22  }
  0x1c   :  { %s41_s0 = sshll.u32 %s2746_s3, 4  ;;  %s2747_s25 = smov [#allocation7]   ;;  %s42_s0 = int_to_ptr.vmem [resolvable:$true] %s41_s0 }
  0x1d   :  { %47 = dma.hbm_to_vmem [thread:$0]  %s40_s2, 1024, %s42_s0, [#allocation3], %s2741_s5, %s2741_s5, %s2742_s22  }
  0x1e   :  { %s69_s4 = sshll.u32 %s2747_s25, 4  ;;  %s97_s23 = sshll.u32 %s3089_s7, 4  ;;  %s70_s4 = int_to_ptr.vmem [resolvable:$true] %s69_s4  ;;  %s98_s23 = int_to_ptr.hbm [resolvable:$true] %s97_s23 }
  0x1f   :  { %s127_s24 = sshll.u32 %s3093_s11, 4  ;;  %s2748_s13 = smov [#allocation10]   ;;  %s128_s24 = int_to_ptr.hbm [resolvable:$true] %s127_s24 }
  0x20   :  { %s67_s26 = sshll.u32 %s3113_s1, 4  ;;  %s99_s30 = sshll.u32 %s2748_s13, 4  ;;  %s68_s26 = int_to_ptr.hbm [resolvable:$true] %s67_s26  ;;  %s100_s30 = int_to_ptr.vmem [resolvable:$true] %s99_s30 }
  0x21   :  { %75 = dma.hbm_to_vmem [thread:$0]  %s68_s26, 1024, %s70_s4, [#allocation6], %s2741_s5, %s2741_s5, %s2742_s22  }
  0x22   :  { %105 = dma.hbm_to_vmem [thread:$0]  %s98_s23, 1024, %s100_s30, [#allocation9], %s2741_s5, %s2741_s5, %s2742_s22  }
  0x23   :  { %s2749_s2 = smov [#allocation13]   ;;  %s157_s0 = sshll.u32 %s3097_s15, 4  ;;  %s158_s0 = int_to_ptr.hbm [resolvable:$true] %s157_s0 }
  0x24   :  { %s129_s7 = sshll.u32 %s2749_s2, 4  ;;  %s2750_s11 = smov [#allocation16]   ;;  %s130_s7 = int_to_ptr.vmem [resolvable:$true] %s129_s7 }
  0x25   :  { %135 = dma.hbm_to_vmem [thread:$0]  %s128_s24, 1024, %s130_s7, [#allocation12], %s2741_s5, %s2741_s5, %s2742_s22  }
  0x26   :  { %s159_s26 = sshll.u32 %s2750_s11, 4  ;;  %s160_s26 = int_to_ptr.vmem [resolvable:$true] %s159_s26 }
  0x27   :  { %165 = dma.hbm_to_vmem [thread:$0]  %s158_s0, 1024, %s160_s26, [#allocation15], %s2741_s5, %s2741_s5, %s2742_s22  }
  0x28   :  { %2724 = dma.done.wait [#allocation3], 1024  }
  0x29   :  { %2725 = vsyncadd [#allocation3], 4294966272 }
  0x2a   :  { %2726 = dma.done.wait [#allocation6], 2048  }
  0x2b   :  { %2727 = vsyncadd [#allocation6], 4294965248 }
  0x2c   :  { %2728 = dma.done.wait [#allocation9], 2048  }
  0x2d   :  { %2729 = vsyncadd [#allocation9], 4294965248 }
  0x2e   :  { %2730 = dma.done.wait [#allocation12], 2048  }
  0x2f   :  { %2731 = vsyncadd [#allocation12], 4294965248 }
  0x30   :  { %2732 = dma.done.wait [#allocation15], 2048  }
  0x31   :  { %2733 = vsyncadd [#allocation15], 4294965248  ;;  %v2072_v0 = vld [vmem:[#allocation5 + $0x38] sm:$0xff]  ;;  %v2071_v1 = vld [vmem:[#allocation5 + $0x30] sm:$0xff]  ;;  %s3114_s4 = sld [smem:[#allocation34_spill]]  ;;  %s1695_s0 = sshll.u32 %s3100_s18, 4  ;;  %s1696_s0 = int_to_ptr.hbm [resolvable:$true] %s1695_s0 }
  0x32   :  { %336 = vmatpush.bf16.msra.mxu0 %v2072_v0  ;;  %v2070_v2 = vld [vmem:[#allocation5 + $0x28] sm:$0xff]  ;;  %v2069_v3 = vld [vmem:[#allocation5 + $0x20] sm:$0xff]  ;;  %v2068_v4 = vld [vmem:[#allocation5 + $0x18] sm:$0xff]  ;;  %s3115_s23 = sld [smem:[#allocation36_spill]]  ;;  %s2752_s11 = smov [#allocation21]  }
  0x33   :  { %v2067_v5 = vld [vmem:[#allocation5 + $0x10] sm:$0xff]  ;;  %v2066_v6 = vld [vmem:[#allocation5 + $0x8] sm:$0xff]  ;;  %v2065_v7 = vld [vmem:[#allocation5] sm:$0xff]  ;;  %s1719_s26 = sshll.u32 %s2752_s11, 4  ;;  %s2753_s18 = smov [#allocation20]   ;;  %s1720_s26 = int_to_ptr.vmem [resolvable:$true] %s1719_s26 }
  0x34   :  { %v2057_v8 = vld [vmem:[#allocation2] sm:$0xff]  ;;  %v2058_v9 = vld [vmem:[#allocation2 + $0x8] sm:$0xff]  ;;  %v2059_v10 = vld [vmem:[#allocation2 + $0x10] sm:$0xff]  ;;  %s1706_s27 = sshll.u32 %s2753_s18, 4  ;;  %s1708_s29 = sshll.u32 %s3101_s19, 4  ;;  %s1707_s27 = int_to_ptr.vmem [resolvable:$true] %s1706_s27  ;;  %s1709_s29 = int_to_ptr.hbm [resolvable:$true] %s1708_s29 }
  0x35   :  { %v2060_v11 = vld [vmem:[#allocation2 + $0x18] sm:$0xff]  ;;  %v2061_v12 = vld [vmem:[#allocation2 + $0x20] sm:$0xff]  ;;  %v2062_v13 = vld [vmem:[#allocation2 + $0x28] sm:$0xff]  ;;  %s2754_s13 = smov [#allocation23]  }
  0x36   :  { %337 = vmatpush.bf16.msra.mxu0 %v2071_v1  ;;  %v2080_v14 = vld [vmem:[#allocation7 + $0x38] sm:$0xff]  ;;  %v2079_v15 = vld [vmem:[#allocation7 + $0x30] sm:$0xff]  ;;  %v2078_v16 = vld [vmem:[#allocation7 + $0x28] sm:$0xff] }
  0x37   :  { %549 = vmatpush.bf16.msra.mxu1 %v2080_v14  ;;  %v2077_v17 = vld [vmem:[#allocation7 + $0x20] sm:$0xff]  ;;  %v2063_v18 = vld [vmem:[#allocation2 + $0x30] sm:$0xff]  ;;  %v2076_v19 = vld [vmem:[#allocation7 + $0x18] sm:$0xff] }
  0x38   :  { %v2075_v20 = vld [vmem:[#allocation7 + $0x10] sm:$0xff]  ;;  %v2074_v21 = vld [vmem:[#allocation7 + $0x8] sm:$0xff]  ;;  %v2073_v22 = vld [vmem:[#allocation7] sm:$0xff] }
  0x39   :  { %v2064_v23 = vld [vmem:[#allocation2 + $0x38] sm:$0xff]  ;;  %v2923_v24 = vld [vmem:[%s3114_s4] ss:$0 sm:$0xff]  ;;  %s1721_s4 = sshll.u32 %s3102_s20, 4  ;;  %s1722_s4 = int_to_ptr.hbm [resolvable:$true] %s1721_s4 }
  0x3a   :  { %338 = vmatpush.bf16.msra.mxu0 %v2070_v2 }
  0x3b   :  { %550 = vmatpush.bf16.msra.mxu1 %v2079_v15 }
  0x3e   :  { %339 = vmatpush.bf16.msra.mxu0 %v2069_v3 }
  0x3f   :  { %551 = vmatpush.bf16.msra.mxu1 %v2078_v16 }
  0x42   :  { %340 = vmatpush.bf16.msra.mxu0 %v2068_v4 }
  0x43   :  { %552 = vmatpush.bf16.msra.mxu1 %v2077_v17 }
  0x46   :  { %341 = vmatpush.bf16.msra.mxu0 %v2067_v5 }
  0x47   :  { %553 = vmatpush.bf16.msra.mxu1 %v2076_v19 }
  0x4a   :  { %342 = vmatpush.bf16.msra.mxu0 %v2066_v6 }
  0x4b   :  { %554 = vmatpush.bf16.msra.mxu1 %v2075_v20 }
  0x4e   :  { %343 = vmatpush.bf16.msra.mxu0 %v2065_v7 }
  0x4f   :  { %555 = vmatpush.bf16.msra.mxu1 %v2074_v21 }
  0x51   :  { %344 = vmatmul.bf16.vlgmr.msra.gmra.mxu0 %v2057_v8 }
  0x53   :  { %556 = vmatpush.bf16.msra.mxu1 %v2073_v22 }
  0x61   :  { %349 = vmatmul.bf16.gmra.mxu0 %v2058_v9 }
  0x71   :  { %354 = vmatmul.bf16.gmra.mxu0 %v2059_v10 }
  0x81   :  { %359 = vmatmul.bf16.gmra.mxu0 %v2060_v11 }
  0x91   :  { %364 = vmatmul.bf16.gmra.mxu0 %v2061_v12 }
  0xa1   :  { %369 = vmatmul.bf16.gmra.mxu0 %v2062_v13 }
  0xb1   :  { %374 = vmatmul.bf16.gmra.mxu0 %v2063_v18 }
  0xc1   :  { %379 = vmatmul.bf16.gmra.mxu0 %v2064_v23 }
  0xce   :  { %v345_v25 = vpop.f32.mrf.mxu0 }
  0xcf   :  { %v346_v26 = vadd.f32 %v2923_v24, %v345_v25 }
  0xd1   :  { %v385_v27 = vmax.f32 %v346_v26, 0.0 }
  0xd3   :  { %v401_v30 = vpack.c.bf16 %v385_v27, %v385_v27 }
  0xd5   :  { %v469_v34 = vunpack.c.l.b16 %v401_v30 }
  0xd6   :  { %v347_v28 = vpop.f32.mrf.mxu0 }
  0xd7   :  { %v348_v29 = vadd.f32 %v2923_v24, %v347_v28 }
  0xd9   :  { %v386_v31 = vmax.f32 %v348_v29, 0.0 }
  0xdb   :  { %v2132_v32 = vpack.c.bf16 %v386_v31, %v385_v27  ;;  %v402_v33 = vpack.c.bf16 %v386_v31, %v386_v31 }
  0xdd   :  { %2133 = vst [vmem:[#allocation18] sm:$0xff] %v2132_v32   ;;  %v470_v35 = vunpack.c.l.b16 %v402_v33 }
  0xde   :  { %v350_v36 = vpop.f32.mrf.mxu0 }
  0xdf   :  { %v485_v37 = vpack.c.b16 %v470_v35, %v469_v34  ;;  %v351_v38 = vadd.f32 %v2923_v24, %v350_v36  ;;  %v2088_v35 = vld [vmem:[#allocation8 + $0x38] sm:$0xff] }
  0xe0   :  { %762 = vmatpush.bf16.msra.mxu2 %v2088_v35 }
  0xe1   :  { %557 = vmatmul.bf16.vlgmr.msra.gmra.mxu1 %v485_v37  ;;  %v387_v39 = vmax.f32 %v351_v38, 0.0  ;;  %v2087_v37 = vld [vmem:[#allocation8 + $0x30] sm:$0xff] }
  0xe3   :  { %v403_v42 = vpack.c.bf16 %v387_v39, %v387_v39 }
  0xe4   :  { %763 = vmatpush.bf16.msra.mxu2 %v2087_v37 }
  0xe5   :  { %v471_v46 = vunpack.c.l.b16 %v403_v42 }
  0xe6   :  { %v352_v40 = vpop.f32.mrf.mxu0 }
  0xe7   :  { %v353_v41 = vadd.f32 %v2923_v24, %v352_v40  ;;  %v2086_v40 = vld [vmem:[#allocation8 + $0x28] sm:$0xff] }
  0xe8   :  { %764 = vmatpush.bf16.msra.mxu2 %v2086_v40 }
  0xe9   :  { %v388_v43 = vmax.f32 %v353_v41, 0.0 }
  0xeb   :  { %v2137_v44 = vpack.c.bf16 %v388_v43, %v387_v39  ;;  %v404_v45 = vpack.c.bf16 %v388_v43, %v388_v43 }
  0xed   :  { %2329 = vst [vmem:[#allocation18 + $0x8] sm:$0xff] %v2137_v44   ;;  %v472_v47 = vunpack.c.l.b16 %v404_v45 }
  0xee   :  { %v355_v48 = vpop.f32.mrf.mxu0 }
  0xef   :  { %v486_v49 = vpack.c.b16 %v472_v47, %v471_v46  ;;  %v356_v50 = vadd.f32 %v2923_v24, %v355_v48  ;;  %v2085_v46 = vld [vmem:[#allocation8 + $0x20] sm:$0xff] }
  0xf0   :  { %765 = vmatpush.bf16.msra.mxu2 %v2085_v46 }
  0xf1   :  { %562 = vmatmul.bf16.gmra.mxu1 %v486_v49  ;;  %v389_v51 = vmax.f32 %v356_v50, 0.0 }
  0xf3   :  { %v405_v54 = vpack.c.bf16 %v389_v51, %v389_v51 }
  0xf5   :  { %v473_v58 = vunpack.c.l.b16 %v405_v54 }
  0xf6   :  { %v357_v52 = vpop.f32.mrf.mxu0 }
  0xf7   :  { %v358_v53 = vadd.f32 %v2923_v24, %v357_v52 }
  0xf9   :  { %v390_v55 = vmax.f32 %v358_v53, 0.0  ;;  %v2083_v53 = vld [vmem:[#allocation8 + $0x10] sm:$0xff] }
  0xfb   :  { %v2142_v56 = vpack.c.bf16 %v390_v55, %v389_v51  ;;  %v406_v57 = vpack.c.bf16 %v390_v55, %v390_v55  ;;  %v2084_v51 = vld [vmem:[#allocation8 + $0x18] sm:$0xff] }
  0xfc   :  { %766 = vmatpush.bf16.msra.mxu2 %v2084_v51 }
  0xfd   :  { %2330 = vst [vmem:[#allocation18 + $0x10] sm:$0xff] %v2142_v56   ;;  %v474_v59 = vunpack.c.l.b16 %v406_v57  ;;  %v2082_v57 = vld [vmem:[#allocation8 + $0x8] sm:$0xff] }
  0xfe   :  { %v360_v60 = vpop.f32.mrf.mxu0 }
  0xff   :  { %v487_v61 = vpack.c.b16 %v474_v59, %v473_v58  ;;  %v361_v62 = vadd.f32 %v2923_v24, %v360_v60 }
 0x100   :  { %767 = vmatpush.bf16.msra.mxu2 %v2083_v53 }
 0x101   :  { %567 = vmatmul.bf16.gmra.mxu1 %v487_v61  ;;  %v391_v63 = vmax.f32 %v361_v62, 0.0  ;;  %v2081_v62 = vld [vmem:[#allocation8] sm:$0xff] }
 0x103   :  { %v407_v2 = vpack.c.bf16 %v391_v63, %v391_v63 }
 0x104   :  { %768 = vmatpush.bf16.msra.mxu2 %v2082_v57 }
 0x105   :  { %v475_v6 = vunpack.c.l.b16 %v407_v2  ;;  %v2944_v2 = vld [vmem:[%s3115_s23] ss:$0 sm:$0xff] }
 0x106   :  { %v362_v0 = vpop.f32.mrf.mxu0 }
 0x107   :  { %v363_v1 = vadd.f32 %v2923_v24, %v362_v0 }
 0x108   :  { %769 = vmatpush.bf16.msra.mxu2 %v2081_v62 }
 0x109   :  { %v392_v3 = vmax.f32 %v363_v1, 0.0 }
 0x10b   :  { %v2147_v4 = vpack.c.bf16 %v392_v3, %v391_v63  ;;  %v408_v5 = vpack.c.bf16 %v392_v3, %v392_v3 }
 0x10d   :  { %2331 = vst [vmem:[#allocation18 + $0x18] sm:$0xff] %v2147_v4   ;;  %v476_v7 = vunpack.c.l.b16 %v408_v5 }
 0x10e   :  { %v365_v8 = vpop.f32.mrf.mxu0 }
 0x10f   :  { %v488_v9 = vpack.c.b16 %v476_v7, %v475_v6  ;;  %v366_v10 = vadd.f32 %v2923_v24, %v365_v8 }
 0x111   :  { %572 = vmatmul.bf16.gmra.mxu1 %v488_v9  ;;  %v393_v11 = vmax.f32 %v366_v10, 0.0 }
 0x113   :  { %v409_v14 = vpack.c.bf16 %v393_v11, %v393_v11 }
 0x115   :  { %v477_v18 = vunpack.c.l.b16 %v409_v14 }
 0x116   :  { %v367_v12 = vpop.f32.mrf.mxu0 }
 0x117   :  { %v368_v13 = vadd.f32 %v2923_v24, %v367_v12 }
 0x119   :  { %v394_v15 = vmax.f32 %v368_v13, 0.0 }
 0x11b   :  { %v410_v16 = vpack.c.bf16 %v394_v15, %v394_v15  ;;  %v2152_v17 = vpack.c.bf16 %v394_v15, %v393_v11 }
 0x11d   :  { %2332 = vst [vmem:[#allocation18 + $0x20] sm:$0xff] %v2152_v17   ;;  %v478_v19 = vunpack.c.l.b16 %v410_v16 }
 0x11e   :  { %v370_v20 = vpop.f32.mrf.mxu0 }
 0x11f   :  { %v489_v21 = vpack.c.b16 %v478_v19, %v477_v18  ;;  %v371_v22 = vadd.f32 %v2923_v24, %v370_v20 }
 0x121   :  { %577 = vmatmul.bf16.gmra.mxu1 %v489_v21  ;;  %v395_v23 = vmax.f32 %v371_v22, 0.0 }
 0x123   :  { %v411_v27 = vpack.c.bf16 %v395_v23, %v395_v23 }
 0x125   :  { %v479_v31 = vunpack.c.l.b16 %v411_v27 }
 0x126   :  { %v372_v25 = vpop.f32.mrf.mxu0 }
 0x127   :  { %v373_v26 = vadd.f32 %v2923_v24, %v372_v25 }
 0x129   :  { %v396_v28 = vmax.f32 %v373_v26, 0.0 }
 0x12b   :  { %v412_v29 = vpack.c.bf16 %v396_v28, %v396_v28  ;;  %v2157_v30 = vpack.c.bf16 %v396_v28, %v395_v23 }
 0x12d   :  { %2333 = vst [vmem:[#allocation18 + $0x28] sm:$0xff] %v2157_v30   ;;  %v480_v32 = vunpack.c.l.b16 %v412_v29 }
 0x12e   :  { %v375_v33 = vpop.f32.mrf.mxu0 }
 0x12f   :  { %v490_v34 = vpack.c.b16 %v480_v32, %v479_v31  ;;  %v376_v36 = vadd.f32 %v2923_v24, %v375_v33 }
 0x131   :  { %582 = vmatmul.bf16.gmra.mxu1 %v490_v34  ;;  %v397_v38 = vmax.f32 %v376_v36, 0.0 }
 0x133   :  { %v413_v42 = vpack.c.bf16 %v397_v38, %v397_v38 }
 0x135   :  { %v481_v47 = vunpack.c.l.b16 %v413_v42 }
 0x136   :  { %v377_v39 = vpop.f32.mrf.mxu0 }
 0x137   :  { %v378_v41 = vadd.f32 %v2923_v24, %v377_v39 }
 0x139   :  { %v398_v43 = vmax.f32 %v378_v41, 0.0 }
 0x13b   :  { %v414_v44 = vpack.c.bf16 %v398_v43, %v398_v43  ;;  %v2162_v45 = vpack.c.bf16 %v398_v43, %v397_v38 }
 0x13d   :  { %2334 = vst [vmem:[#allocation18 + $0x30] sm:$0xff] %v2162_v45   ;;  %v482_v48 = vunpack.c.l.b16 %v414_v44 }
 0x13e   :  { %v380_v49 = vpop.f32.mrf.mxu0 }
 0x13f   :  { %v491_v50 = vpack.c.b16 %v482_v48, %v481_v47  ;;  %v381_v52 = vadd.f32 %v2923_v24, %v380_v49 }
 0x141   :  { %587 = vmatmul.bf16.gmra.mxu1 %v491_v50  ;;  %v399_v54 = vmax.f32 %v381_v52, 0.0 }
 0x143   :  { %v415_v58 = vpack.c.bf16 %v399_v54, %v399_v54 }
 0x145   :  { %v483_v63 = vunpack.c.l.b16 %v415_v58 }
 0x146   :  { %v382_v55 = vpop.f32.mrf.mxu0 }
 0x147   :  { %v383_v56 = vadd.f32 %v2923_v24, %v382_v55 }
 0x149   :  { %v400_v59 = vmax.f32 %v383_v56, 0.0 }
 0x14b   :  { %v416_v60 = vpack.c.bf16 %v400_v59, %v400_v59  ;;  %v2167_v61 = vpack.c.bf16 %v400_v59, %v399_v54 }
 0x14d   :  { %2335 = vst [vmem:[#allocation18 + $0x38] sm:$0xff] %v2167_v61   ;;  %v484_v0 = vunpack.c.l.b16 %v416_v60 }
 0x14f   :  { %v492_v1 = vpack.c.b16 %v484_v0, %v483_v63 }
 0x151   :  { %592 = vmatmul.bf16.gmra.mxu1 %v492_v1 }
 0x15e   :  { %v558_v3 = vpop.f32.mrf.mxu1 }
 0x15f   :  { %v559_v24 = vadd.f32 %v2944_v2, %v558_v3 }
 0x161   :  { %v598_v4 = vmax.f32 %v559_v24, 0.0 }
 0x163   :  { %v614_v7 = vpack.c.bf16 %v598_v4, %v598_v4 }
 0x165   :  { %v682_v11 = vunpack.c.l.b16 %v614_v7 }
 0x166   :  { %v560_v5 = vpop.f32.mrf.mxu1 }
 0x167   :  { %v561_v6 = vadd.f32 %v2944_v2, %v560_v5 }
 0x169   :  { %v599_v8 = vmax.f32 %v561_v6, 0.0 }
 0x16b   :  { %v2172_v9 = vpack.c.bf16 %v599_v8, %v598_v4  ;;  %v615_v10 = vpack.c.bf16 %v599_v8, %v599_v8 }
 0x16d   :  { %2173 = vst [vmem:[#allocation20] sm:$0xff] %v2172_v9   ;;  %v683_v12 = vunpack.c.l.b16 %v615_v10 }
 0x16e   :  { %v563_v13 = vpop.f32.mrf.mxu1 }
 0x16f   :  { %v698_v14 = vpack.c.b16 %v683_v12, %v682_v11  ;;  %v564_v15 = vadd.f32 %v2944_v2, %v563_v13  ;;  %v2096_v13 = vld [vmem:[#allocation10 + $0x38] sm:$0xff] }
 0x170   :  { %975 = vmatpush.bf16.msra.mxu3 %v2096_v13 }
 0x171   :  { %770 = vmatmul.bf16.vlgmr.msra.gmra.mxu2 %v698_v14  ;;  %v600_v16 = vmax.f32 %v564_v15, 0.0  ;;  %v2095_v14 = vld [vmem:[#allocation10 + $0x30] sm:$0xff] }
 0x173   :  { %v616_v19 = vpack.c.bf16 %v600_v16, %v600_v16 }
 0x174   :  { %976 = vmatpush.bf16.msra.mxu3 %v2095_v14 }
 0x175   :  { %v684_v23 = vunpack.c.l.b16 %v616_v19 }
 0x176   :  { %v565_v17 = vpop.f32.mrf.mxu1 }
 0x177   :  { %v566_v18 = vadd.f32 %v2944_v2, %v565_v17 }
 0x179   :  { %v601_v20 = vmax.f32 %v566_v18, 0.0  ;;  %v2094_v18 = vld [vmem:[#allocation10 + $0x28] sm:$0xff] }
 0x17a   :  { %977 = vmatpush.bf16.msra.mxu3 %v2094_v18 }
 0x17b   :  { %v2177_v21 = vpack.c.bf16 %v601_v20, %v600_v16  ;;  %v617_v22 = vpack.c.bf16 %v601_v20, %v601_v20 }
 0x17d   :  { %2336 = vst [vmem:[#allocation20 + $0x8] sm:$0xff] %v2177_v21   ;;  %v685_v25 = vunpack.c.l.b16 %v617_v22 }
 0x17e   :  { %v568_v26 = vpop.f32.mrf.mxu1 }
 0x17f   :  { %v699_v27 = vpack.c.b16 %v685_v25, %v684_v23  ;;  %v569_v28 = vadd.f32 %v2944_v2, %v568_v26 }
 0x181   :  { %775 = vmatmul.bf16.gmra.mxu2 %v699_v27  ;;  %v602_v29 = vmax.f32 %v569_v28, 0.0 }
 0x183   :  { %v618_v32 = vpack.c.bf16 %v602_v29, %v602_v29 }
 0x185   :  { %v686_v36 = vunpack.c.l.b16 %v618_v32  ;;  %v2092_v32 = vld [vmem:[#allocation10 + $0x18] sm:$0xff] }
 0x186   :  { %v570_v30 = vpop.f32.mrf.mxu1 }
 0x187   :  { %v571_v31 = vadd.f32 %v2944_v2, %v570_v30 }
 0x189   :  { %v603_v33 = vmax.f32 %v571_v31, 0.0 }
 0x18b   :  { %v2182_v34 = vpack.c.bf16 %v603_v33, %v602_v29  ;;  %v619_v35 = vpack.c.bf16 %v603_v33, %v603_v33  ;;  %v2093_v29 = vld [vmem:[#allocation10 + $0x20] sm:$0xff] }
 0x18c   :  { %978 = vmatpush.bf16.msra.mxu3 %v2093_v29 }
 0x18d   :  { %2337 = vst [vmem:[#allocation20 + $0x10] sm:$0xff] %v2182_v34   ;;  %v687_v37 = vunpack.c.l.b16 %v619_v35 }
 0x18e   :  { %v573_v38 = vpop.f32.mrf.mxu1 }
 0x18f   :  { %v700_v39 = vpack.c.b16 %v687_v37, %v686_v36  ;;  %v574_v40 = vadd.f32 %v2944_v2, %v573_v38  ;;  %v2091_v36 = vld [vmem:[#allocation10 + $0x10] sm:$0xff] }
 0x190   :  { %979 = vmatpush.bf16.msra.mxu3 %v2092_v32 }
 0x191   :  { %780 = vmatmul.bf16.gmra.mxu2 %v700_v39  ;;  %v604_v41 = vmax.f32 %v574_v40, 0.0 }
 0x193   :  { %v620_v44 = vpack.c.bf16 %v604_v41, %v604_v41 }
 0x194   :  { %980 = vmatpush.bf16.msra.mxu3 %v2091_v36 }
 0x195   :  { %v688_v48 = vunpack.c.l.b16 %v620_v44 }
 0x196   :  { %v575_v42 = vpop.f32.mrf.mxu1 }
 0x197   :  { %v576_v43 = vadd.f32 %v2944_v2, %v575_v42 }
 0x199   :  { %v605_v45 = vmax.f32 %v576_v43, 0.0  ;;  %v2089_v43 = vld [vmem:[#allocation10] sm:$0xff] }
 0x19b   :  { %v2187_v46 = vpack.c.bf16 %v605_v45, %v604_v41  ;;  %v621_v47 = vpack.c.bf16 %v605_v45, %v605_v45  ;;  %v2090_v41 = vld [vmem:[#allocation10 + $0x8] sm:$0xff] }
 0x19c   :  { %981 = vmatpush.bf16.msra.mxu3 %v2090_v41 }
 0x19d   :  { %2338 = vst [vmem:[#allocation20 + $0x18] sm:$0xff] %v2187_v46   ;;  %v689_v49 = vunpack.c.l.b16 %v621_v47  ;;  %v2104_v46 = vld [vmem:[#allocation11 + $0x38] sm:$0xff] }
 0x19e   :  { %v578_v50 = vpop.f32.mrf.mxu1  ;;  %1172 = vmatpush.bf16.msrb.mxu0 %v2104_v46 }
 0x19f   :  { %v701_v51 = vpack.c.b16 %v689_v49, %v688_v48  ;;  %v579_v52 = vadd.f32 %v2944_v2, %v578_v50 }
 0x1a0   :  { %982 = vmatpush.bf16.msra.mxu3 %v2089_v43 }
 0x1a1   :  { %785 = vmatmul.bf16.gmra.mxu2 %v701_v51  ;;  %v606_v53 = vmax.f32 %v579_v52, 0.0 }
 0x1a3   :  { %v622_v56 = vpack.c.bf16 %v606_v53, %v606_v53 }
 0x1a5   :  { %v690_v60 = vunpack.c.l.b16 %v622_v56 }
 0x1a6   :  { %v580_v54 = vpop.f32.mrf.mxu1 }
 0x1a7   :  { %v581_v55 = vadd.f32 %v2944_v2, %v580_v54 }
 0x1a9   :  { %v607_v57 = vmax.f32 %v581_v55, 0.0 }
 0x1ab   :  { %v623_v58 = vpack.c.bf16 %v607_v57, %v607_v57  ;;  %v2192_v59 = vpack.c.bf16 %v607_v57, %v606_v53 }
 0x1ad   :  { %2339 = vst [vmem:[#allocation20 + $0x20] sm:$0xff] %v2192_v59   ;;  %v691_v61 = vunpack.c.l.b16 %v623_v58  ;;  %v2103_v59 = vld [vmem:[#allocation11 + $0x30] sm:$0xff] }
 0x1ae   :  { %v583_v62 = vpop.f32.mrf.mxu1  ;;  %1173 = vmatpush.bf16.msrb.mxu0 %v2103_v59 }
 0x1af   :  { %v702_v63 = vpack.c.b16 %v691_v61, %v690_v60  ;;  %v584_v0 = vadd.f32 %v2944_v2, %v583_v62 }
 0x1b1   :  { %790 = vmatmul.bf16.gmra.mxu2 %v702_v63  ;;  %v608_v1 = vmax.f32 %v584_v0, 0.0 }
 0x1b3   :  { %v624_v4 = vpack.c.bf16 %v608_v1, %v608_v1 }
 0x1b5   :  { %v692_v8 = vunpack.c.l.b16 %v624_v4 }
 0x1b6   :  { %v585_v3 = vpop.f32.mrf.mxu1 }
 0x1b7   :  { %v586_v24 = vadd.f32 %v2944_v2, %v585_v3 }
 0x1b9   :  { %v609_v5 = vmax.f32 %v586_v24, 0.0 }
 0x1bb   :  { %v625_v6 = vpack.c.bf16 %v609_v5, %v609_v5  ;;  %v2197_v7 = vpack.c.bf16 %v609_v5, %v608_v1 }
 0x1bd   :  { %2340 = vst [vmem:[#allocation20 + $0x28] sm:$0xff] %v2197_v7   ;;  %v693_v9 = vunpack.c.l.b16 %v625_v6 }
 0x1be   :  { %v588_v10 = vpop.f32.mrf.mxu1 }
 0x1bf   :  { %v703_v11 = vpack.c.b16 %v693_v9, %v692_v8  ;;  %v589_v12 = vadd.f32 %v2944_v2, %v588_v10  ;;  %v2102_v8 = vld [vmem:[#allocation11 + $0x28] sm:$0xff] }
 0x1c0   :  { %1174 = vmatpush.bf16.msrb.mxu0 %v2102_v8 }
 0x1c1   :  { %795 = vmatmul.bf16.gmra.mxu2 %v703_v11  ;;  %v610_v15 = vmax.f32 %v589_v12, 0.0 }
 0x1c3   :  { %v626_v19 = vpack.c.bf16 %v610_v15, %v610_v15 }
 0x1c5   :  { %v694_v23 = vunpack.c.l.b16 %v626_v19 }
 0x1c6   :  { %v590_v16 = vpop.f32.mrf.mxu1 }
 0x1c7   :  { %v591_v17 = vadd.f32 %v2944_v2, %v590_v16 }
 0x1c9   :  { %v611_v20 = vmax.f32 %v591_v17, 0.0 }
 0x1cb   :  { %v627_v21 = vpack.c.bf16 %v611_v20, %v611_v20  ;;  %v2202_v22 = vpack.c.bf16 %v611_v20, %v610_v15 }
 0x1cd   :  { %2341 = vst [vmem:[#allocation20 + $0x30] sm:$0xff] %v2202_v22   ;;  %v695_v25 = vunpack.c.l.b16 %v627_v21  ;;  %v2101_v21 = vld [vmem:[#allocation11 + $0x20] sm:$0xff] }
 0x1ce   :  { %v593_v26 = vpop.f32.mrf.mxu1  ;;  %1175 = vmatpush.bf16.msrb.mxu0 %v2101_v21  ;;  %v2112_v21 = vld [vmem:[#allocation13 + $0x38] sm:$0xff] }
 0x1cf   :  { %v704_v27 = vpack.c.b16 %v695_v25, %v694_v23  ;;  %v594_v28 = vadd.f32 %v2944_v2, %v593_v26  ;;  %1313 = vmatpush.bf16.msrb.mxu1 %v2112_v21 }
 0x1d1   :  { %800 = vmatmul.bf16.gmra.mxu2 %v704_v27  ;;  %v612_v30 = vmax.f32 %v594_v28, 0.0 }
 0x1d3   :  { %v628_v34 = vpack.c.bf16 %v612_v30, %v612_v30 }
 0x1d5   :  { %v696_v39 = vunpack.c.l.b16 %v628_v34 }
 0x1d6   :  { %v595_v31 = vpop.f32.mrf.mxu1 }
 0x1d7   :  { %v596_v33 = vadd.f32 %v2944_v2, %v595_v31  ;;  %v2965_v2 = vld [vmem:[%s3088_s6] ss:$0 sm:$0xff] }
 0x1d9   :  { %v613_v35 = vmax.f32 %v596_v33, 0.0 }
 0x1db   :  { %v629_v37 = vpack.c.bf16 %v613_v35, %v613_v35  ;;  %v2207_v38 = vpack.c.bf16 %v613_v35, %v612_v30  ;;  %v2100_v35 = vld [vmem:[#allocation11 + $0x18] sm:$0xff] }
 0x1dc   :  { %1176 = vmatpush.bf16.msrb.mxu0 %v2100_v35 }
 0x1dd   :  { %2342 = vst [vmem:[#allocation20 + $0x38] sm:$0xff] %v2207_v38   ;;  %v697_v40 = vunpack.c.l.b16 %v629_v37 }
 0x1df   :  { %v705_v42 = vpack.c.b16 %v697_v40, %v696_v39 }
 0x1e1   :  { %805 = vmatmul.bf16.gmra.mxu2 %v705_v42 }
 0x1f4   :  { %v771_v44 = vpop.f32.mrf.mxu2 }
 0x1f5   :  { %v772_v45 = vadd.f32 %v2965_v2, %v771_v44 }
 0x1f7   :  { %v811_v47 = vmax.f32 %v772_v45, 0.0 }
 0x1f9   :  { %v827_v50 = vpack.c.bf16 %v811_v47, %v811_v47 }
 0x1fb   :  { %v895_v54 = vunpack.c.l.b16 %v827_v50 }
 0x1fc   :  { %v773_v48 = vpop.f32.mrf.mxu2 }
 0x1fd   :  { %v774_v49 = vadd.f32 %v2965_v2, %v773_v48  ;;  %v2099_v48 = vld [vmem:[#allocation11 + $0x10] sm:$0xff] }
 0x1fe   :  { %1177 = vmatpush.bf16.msrb.mxu0 %v2099_v48 }
 0x1ff   :  { %v812_v51 = vmax.f32 %v774_v49, 0.0 }
 0x201   :  { %v2212_v52 = vpack.c.bf16 %v812_v51, %v811_v47  ;;  %v828_v53 = vpack.c.bf16 %v812_v51, %v812_v51 }
 0x203   :  { %2213 = vst [vmem:[#allocation21] sm:$0xff] %v2212_v52   ;;  %v896_v55 = vunpack.c.l.b16 %v828_v53 }
 0x204   :  { %v776_v56 = vpop.f32.mrf.mxu2 }
 0x205   :  { %v911_v57 = vpack.c.b16 %v896_v55, %v895_v54  ;;  %v777_v58 = vadd.f32 %v2965_v2, %v776_v56 }
 0x207   :  { %983 = vmatmul.bf16.vlgmr.msra.gmra.mxu3 %v911_v57  ;;  %v813_v60 = vmax.f32 %v777_v58, 0.0 }
 0x209   :  { %v829_v63 = vpack.c.bf16 %v813_v60, %v813_v60 }
 0x20b   :  { %v897_v24 = vunpack.c.l.b16 %v829_v63 }
 0x20c   :  { %v778_v61 = vpop.f32.mrf.mxu2 }
 0x20d   :  { %v779_v62 = vadd.f32 %v2965_v2, %v778_v61  ;;  %v2098_v61 = vld [vmem:[#allocation11 + $0x8] sm:$0xff] }
 0x20e   :  { %1178 = vmatpush.bf16.msrb.mxu0 %v2098_v61 }
 0x20f   :  { %v814_v0 = vmax.f32 %v779_v62, 0.0 }
 0x211   :  { %v2217_v1 = vpack.c.bf16 %v814_v0, %v813_v60  ;;  %v830_v3 = vpack.c.bf16 %v814_v0, %v814_v0 }
 0x213   :  { %2343 = vst [vmem:[#allocation21 + $0x8] sm:$0xff] %v2217_v1   ;;  %v898_v4 = vunpack.c.l.b16 %v830_v3 }
 0x214   :  { %v781_v5 = vpop.f32.mrf.mxu2 }
 0x215   :  { %v912_v6 = vpack.c.b16 %v898_v4, %v897_v24  ;;  %v782_v7 = vadd.f32 %v2965_v2, %v781_v5 }
 0x217   :  { %988 = vmatmul.bf16.gmra.mxu3 %v912_v6  ;;  %v815_v9 = vmax.f32 %v782_v7, 0.0 }
 0x219   :  { %v831_v12 = vpack.c.bf16 %v815_v9, %v815_v9 }
 0x21b   :  { %v899_v16 = vunpack.c.l.b16 %v831_v12 }
 0x21c   :  { %v783_v10 = vpop.f32.mrf.mxu2 }
 0x21d   :  { %v784_v11 = vadd.f32 %v2965_v2, %v783_v10 }
 0x21f   :  { %v816_v13 = vmax.f32 %v784_v11, 0.0 }
 0x221   :  { %v2222_v14 = vpack.c.bf16 %v816_v13, %v815_v9  ;;  %v832_v15 = vpack.c.bf16 %v816_v13, %v816_v13 }
 0x223   :  { %2344 = vst [vmem:[#allocation21 + $0x10] sm:$0xff] %v2222_v14   ;;  %v900_v17 = vunpack.c.l.b16 %v832_v15  ;;  %v2097_v15 = vld [vmem:[#allocation11] sm:$0xff] }
 0x224   :  { %v786_v18 = vpop.f32.mrf.mxu2  ;;  %1179 = vmatpush.bf16.msrb.mxu0 %v2097_v15 }
 0x225   :  { %v913_v19 = vpack.c.b16 %v900_v17, %v899_v16  ;;  %v787_v20 = vadd.f32 %v2965_v2, %v786_v18 }
 0x227   :  { %993 = vmatmul.bf16.gmra.mxu3 %v913_v19  ;;  %v817_v22 = vmax.f32 %v787_v20, 0.0 }
 0x229   :  { %v833_v26 = vpack.c.bf16 %v817_v22, %v817_v22 }
 0x22b   :  { %v901_v30 = vunpack.c.l.b16 %v833_v26 }
 0x22c   :  { %v788_v23 = vpop.f32.mrf.mxu2 }
 0x22d   :  { %v789_v25 = vadd.f32 %v2965_v2, %v788_v23  ;;  %v2986_v23 = vld [vmem:[%s3090_s8] ss:$0 sm:$0xff]  ;;  %s1734_s8 = sshll.u32 %s3103_s21, 4  ;;  %s1735_s8 = int_to_ptr.hbm [resolvable:$true] %s1734_s8 }
 0x22f   :  { %v818_v27 = vmax.f32 %v789_v25, 0.0 }
 0x231   :  { %v2227_v28 = vpack.c.bf16 %v818_v27, %v817_v22  ;;  %v834_v29 = vpack.c.bf16 %v818_v27, %v818_v27 }
 0x233   :  { %2345 = vst [vmem:[#allocation21 + $0x18] sm:$0xff] %v2227_v28   ;;  %v902_v31 = vunpack.c.l.b16 %v834_v29 }
 0x234   :  { %v791_v32 = vpop.f32.mrf.mxu2 }
 0x235   :  { %v914_v33 = vpack.c.b16 %v902_v31, %v901_v30  ;;  %v792_v34 = vadd.f32 %v2965_v2, %v791_v32  ;;  %v2111_v32 = vld [vmem:[#allocation13 + $0x30] sm:$0xff] }
 0x236   :  { %1314 = vmatpush.bf16.msrb.mxu1 %v2111_v32 }
 0x237   :  { %998 = vmatmul.bf16.gmra.mxu3 %v914_v33  ;;  %v819_v36 = vmax.f32 %v792_v34, 0.0 }
 0x239   :  { %v835_v39 = vpack.c.bf16 %v819_v36, %v819_v36 }
 0x23b   :  { %v903_v43 = vunpack.c.l.b16 %v835_v39 }
 0x23c   :  { %v793_v37 = vpop.f32.mrf.mxu2 }
 0x23d   :  { %v794_v38 = vadd.f32 %v2965_v2, %v793_v37 }
 0x23f   :  { %v820_v40 = vmax.f32 %v794_v38, 0.0 }
 0x241   :  { %v836_v41 = vpack.c.bf16 %v820_v40, %v820_v40  ;;  %v2232_v42 = vpack.c.bf16 %v820_v40, %v819_v36 }
 0x243   :  { %2346 = vst [vmem:[#allocation21 + $0x20] sm:$0xff] %v2232_v42   ;;  %v904_v44 = vunpack.c.l.b16 %v836_v41 }
 0x244   :  { %v796_v45 = vpop.f32.mrf.mxu2 }
 0x245   :  { %v915_v46 = vpack.c.b16 %v904_v44, %v903_v43  ;;  %v797_v47 = vadd.f32 %v2965_v2, %v796_v45  ;;  %v2110_v43 = vld [vmem:[#allocation13 + $0x28] sm:$0xff] }
 0x246   :  { %1315 = vmatpush.bf16.msrb.mxu1 %v2110_v43 }
 0x247   :  { %1003 = vmatmul.bf16.gmra.mxu3 %v915_v46  ;;  %v821_v49 = vmax.f32 %v797_v47, 0.0 }
 0x249   :  { %v837_v52 = vpack.c.bf16 %v821_v49, %v821_v49 }
 0x24b   :  { %v905_v56 = vunpack.c.l.b16 %v837_v52 }
 0x24c   :  { %v798_v50 = vpop.f32.mrf.mxu2 }
 0x24d   :  { %v799_v51 = vadd.f32 %v2965_v2, %v798_v50 }
 0x24f   :  { %v822_v53 = vmax.f32 %v799_v51, 0.0 }
 0x251   :  { %v838_v54 = vpack.c.bf16 %v822_v53, %v822_v53  ;;  %v2237_v55 = vpack.c.bf16 %v822_v53, %v821_v49 }
 0x253   :  { %2347 = vst [vmem:[#allocation21 + $0x28] sm:$0xff] %v2237_v55   ;;  %v906_v57 = vunpack.c.l.b16 %v838_v54  ;;  %v2109_v54 = vld [vmem:[#allocation13 + $0x20] sm:$0xff] }
 0x254   :  { %v801_v58 = vpop.f32.mrf.mxu2  ;;  %1316 = vmatpush.bf16.msrb.mxu1 %v2109_v54  ;;  %v2119_v54 = vld [vmem:[#allocation14 + $0x30] sm:$0xff] }
 0x255   :  { %v916_v59 = vpack.c.b16 %v906_v57, %v905_v56  ;;  %v802_v60 = vadd.f32 %v2965_v2, %v801_v58 }
 0x257   :  { %1008 = vmatmul.bf16.gmra.mxu3 %v916_v59  ;;  %v823_v62 = vmax.f32 %v802_v60, 0.0 }
 0x259   :  { %v839_v1 = vpack.c.bf16 %v823_v62, %v823_v62 }
 0x25b   :  { %v907_v5 = vunpack.c.l.b16 %v839_v1  ;;  %v2108_v1 = vld [vmem:[#allocation13 + $0x18] sm:$0xff] }
 0x25c   :  { %v803_v63 = vpop.f32.mrf.mxu2  ;;  %1317 = vmatpush.bf16.msrb.mxu1 %v2108_v1 }
 0x25d   :  { %v804_v0 = vadd.f32 %v2965_v2, %v803_v63 }
 0x25f   :  { %v824_v3 = vmax.f32 %v804_v0, 0.0 }
 0x261   :  { %v840_v24 = vpack.c.bf16 %v824_v3, %v824_v3  ;;  %v2242_v4 = vpack.c.bf16 %v824_v3, %v823_v62 }
 0x263   :  { %2348 = vst [vmem:[#allocation21 + $0x30] sm:$0xff] %v2242_v4   ;;  %v908_v6 = vunpack.c.l.b16 %v840_v24 }
 0x264   :  { %v806_v7 = vpop.f32.mrf.mxu2 }
 0x265   :  { %v917_v8 = vpack.c.b16 %v908_v6, %v907_v5  ;;  %v807_v9 = vadd.f32 %v2965_v2, %v806_v7 }
 0x267   :  { %1013 = vmatmul.bf16.gmra.mxu3 %v917_v8  ;;  %v825_v10 = vmax.f32 %v807_v9, 0.0 }
 0x269   :  { %v841_v13 = vpack.c.bf16 %v825_v10, %v825_v10 }
 0x26b   :  { %v909_v18 = vunpack.c.l.b16 %v841_v13 }
 0x26c   :  { %v808_v11 = vpop.f32.mrf.mxu2 }
 0x26d   :  { %v809_v12 = vadd.f32 %v2965_v2, %v808_v11 }
 0x26f   :  { %v826_v14 = vmax.f32 %v809_v12, 0.0  ;;  %v2107_v12 = vld [vmem:[#allocation13 + $0x10] sm:$0xff] }
 0x270   :  { %1318 = vmatpush.bf16.msrb.mxu1 %v2107_v12 }
 0x271   :  { %v842_v16 = vpack.c.bf16 %v826_v14, %v826_v14  ;;  %v2247_v17 = vpack.c.bf16 %v826_v14, %v825_v10 }
 0x273   :  { %2349 = vst [vmem:[#allocation21 + $0x38] sm:$0xff] %v2247_v17   ;;  %v910_v19 = vunpack.c.l.b16 %v842_v16 }
 0x274   :  { %1727 = dma.vmem_to_hbm [thread:$0]  %s1720_s26, 1024, %s1722_s4, [#allocation22], %s2741_s5, %s2741_s5, %s2742_s22  }
 0x275   :  { %v918_v20 = vpack.c.b16 %v910_v19, %v909_v18 }
 0x277   :  { %1018 = vmatmul.bf16.gmra.mxu3 %v918_v20 }
 0x28a   :  { %v984_v22 = vpop.f32.mrf.mxu3 }
 0x28b   :  { %v985_v2 = vadd.f32 %v2986_v23, %v984_v22 }
 0x28d   :  { %v1024_v26 = vpack.c.bf16 %v985_v2, %v985_v2 }
 0x28f   :  { %v1092_v30 = vunpack.c.l.b16 %v1024_v26 }
 0x292   :  { %v986_v25 = vpop.f32.mrf.mxu3 }
 0x293   :  { %v987_v27 = vadd.f32 %v2986_v23, %v986_v25 }
 0x295   :  { %v1025_v28 = vpack.c.bf16 %v987_v27, %v987_v27  ;;  %v2252_v29 = vpack.c.bf16 %v987_v27, %v985_v2  ;;  %v2106_v2 = vld [vmem:[#allocation13 + $0x8] sm:$0xff]  ;;  %v2105_v27 = vld [vmem:[#allocation13] sm:$0xff] }
 0x296   :  { %1319 = vmatpush.bf16.msrb.mxu1 %v2106_v2  ;;  %v2115_v2 = vld [vmem:[#allocation14 + $0x10] sm:$0xff] }
 0x297   :  { %2253 = vst [vmem:[#allocation23] sm:$0xff] %v2252_v29   ;;  %v1093_v31 = vunpack.c.l.b16 %v1025_v28 }
 0x299   :  { %v1108_v33 = vpack.c.b16 %v1093_v31, %v1092_v30 }
 0x29a   :  { %v989_v34 = vpop.f32.mrf.mxu3  ;;  %1320 = vmatpush.bf16.msrb.mxu1 %v2105_v27 }
 0x29b   :  { %1180 = vmatmul.bf16.vlgmr.msrb.gmra.mxu0 %v1108_v33  ;;  %v990_v35 = vadd.f32 %v2986_v23, %v989_v34 }
 0x29d   :  { %v1026_v37 = vpack.c.bf16 %v990_v35, %v990_v35 }
 0x29f   :  { %v1094_v41 = vunpack.c.l.b16 %v1026_v37 }
 0x2a2   :  { %v991_v36 = vpop.f32.mrf.mxu3 }
 0x2a3   :  { %v992_v38 = vadd.f32 %v2986_v23, %v991_v36 }
 0x2a5   :  { %v1027_v39 = vpack.c.bf16 %v992_v38, %v992_v38  ;;  %v2257_v40 = vpack.c.bf16 %v992_v38, %v990_v35 }
 0x2a7   :  { %2350 = vst [vmem:[#allocation23 + $0x8] sm:$0xff] %v2257_v40   ;;  %v1095_v42 = vunpack.c.l.b16 %v1027_v39 }
 0x2a9   :  { %v1109_v44 = vpack.c.b16 %v1095_v42, %v1094_v41 }
 0x2aa   :  { %v994_v45 = vpop.f32.mrf.mxu3 }
 0x2ab   :  { %1185 = vmatmul.bf16.gmra.mxu0 %v1109_v44  ;;  %v995_v46 = vadd.f32 %v2986_v23, %v994_v45 }
 0x2ad   :  { %v1028_v48 = vpack.c.bf16 %v995_v46, %v995_v46 }
 0x2af   :  { %v1096_v52 = vunpack.c.l.b16 %v1028_v48 }
 0x2b2   :  { %v996_v47 = vpop.f32.mrf.mxu3 }
 0x2b3   :  { %v997_v49 = vadd.f32 %v2986_v23, %v996_v47  ;;  %v2120_v47 = vld [vmem:[#allocation14 + $0x38] sm:$0xff] }
 0x2b4   :  { %1454 = vmatpush.bf16.msrb.mxu2 %v2120_v47 }
 0x2b5   :  { %v1029_v50 = vpack.c.bf16 %v997_v49, %v997_v49  ;;  %v2262_v51 = vpack.c.bf16 %v997_v49, %v995_v46  ;;  %v3007_v49 = vld [vmem:[%s3092_s10] ss:$0 sm:$0xff]  ;;  %s1732_s10 = sshll.u32 %s2754_s13, 4  ;;  %s1733_s10 = int_to_ptr.vmem [resolvable:$true] %s1732_s10 }
 0x2b7   :  { %2351 = vst [vmem:[#allocation23 + $0x10] sm:$0xff] %v2262_v51   ;;  %v1097_v53 = vunpack.c.l.b16 %v1029_v50 }
 0x2b8   :  { %1455 = vmatpush.bf16.msrb.mxu2 %v2119_v54 }
 0x2b9   :  { %v1110_v55 = vpack.c.b16 %v1097_v53, %v1096_v52 }
 0x2ba   :  { %v999_v56 = vpop.f32.mrf.mxu3 }
 0x2bb   :  { %1190 = vmatmul.bf16.gmra.mxu0 %v1110_v55  ;;  %v1000_v57 = vadd.f32 %v2986_v23, %v999_v56 }
 0x2bd   :  { %v1030_v59 = vpack.c.bf16 %v1000_v57, %v1000_v57 }
 0x2bf   :  { %v1098_v63 = vunpack.c.l.b16 %v1030_v59 }
 0x2c2   :  { %v1001_v58 = vpop.f32.mrf.mxu3 }
 0x2c3   :  { %v1002_v60 = vadd.f32 %v2986_v23, %v1001_v58 }
 0x2c5   :  { %v1031_v61 = vpack.c.bf16 %v1002_v60, %v1002_v60  ;;  %v2267_v62 = vpack.c.bf16 %v1002_v60, %v1000_v57 }
 0x2c7   :  { %2352 = vst [vmem:[#allocation23 + $0x18] sm:$0xff] %v2267_v62   ;;  %v1099_v0 = vunpack.c.l.b16 %v1031_v61  ;;  %v2118_v62 = vld [vmem:[#allocation14 + $0x28] sm:$0xff] }
 0x2c8   :  { %1456 = vmatpush.bf16.msrb.mxu2 %v2118_v62 }
 0x2c9   :  { %v1111_v3 = vpack.c.b16 %v1099_v0, %v1098_v63 }
 0x2ca   :  { %v1004_v24 = vpop.f32.mrf.mxu3 }
 0x2cb   :  { %1195 = vmatmul.bf16.gmra.mxu0 %v1111_v3  ;;  %v1005_v4 = vadd.f32 %v2986_v23, %v1004_v24 }
 0x2cd   :  { %v1032_v6 = vpack.c.bf16 %v1005_v4, %v1005_v4 }
 0x2cf   :  { %v1100_v10 = vunpack.c.l.b16 %v1032_v6 }
 0x2d2   :  { %v1006_v5 = vpop.f32.mrf.mxu3 }
 0x2d3   :  { %v1007_v7 = vadd.f32 %v2986_v23, %v1006_v5 }
 0x2d5   :  { %v1033_v8 = vpack.c.bf16 %v1007_v7, %v1007_v7  ;;  %v2272_v9 = vpack.c.bf16 %v1007_v7, %v1005_v4  ;;  %v2117_v7 = vld [vmem:[#allocation14 + $0x20] sm:$0xff] }
 0x2d6   :  { %1457 = vmatpush.bf16.msrb.mxu2 %v2117_v7 }
 0x2d7   :  { %2353 = vst [vmem:[#allocation23 + $0x20] sm:$0xff] %v2272_v9   ;;  %v1101_v11 = vunpack.c.l.b16 %v1033_v8 }
 0x2d9   :  { %v1112_v13 = vpack.c.b16 %v1101_v11, %v1100_v10 }
 0x2da   :  { %v1009_v14 = vpop.f32.mrf.mxu3 }
 0x2db   :  { %1200 = vmatmul.bf16.gmra.mxu0 %v1112_v13  ;;  %v1010_v15 = vadd.f32 %v2986_v23, %v1009_v14 }
 0x2dd   :  { %v1034_v17 = vpack.c.bf16 %v1010_v15, %v1010_v15 }
 0x2df   :  { %v1102_v21 = vunpack.c.l.b16 %v1034_v17 }
 0x2e2   :  { %v1011_v16 = vpop.f32.mrf.mxu3 }
 0x2e3   :  { %v1012_v18 = vadd.f32 %v2986_v23, %v1011_v16 }
 0x2e5   :  { %v1035_v19 = vpack.c.bf16 %v1012_v18, %v1012_v18  ;;  %v2277_v20 = vpack.c.bf16 %v1012_v18, %v1010_v15  ;;  %v2116_v15 = vld [vmem:[#allocation14 + $0x18] sm:$0xff] }
 0x2e6   :  { %1458 = vmatpush.bf16.msrb.mxu2 %v2116_v15 }
 0x2e7   :  { %2354 = vst [vmem:[#allocation23 + $0x28] sm:$0xff] %v2277_v20   ;;  %v1103_v22 = vunpack.c.l.b16 %v1035_v19 }
 0x2e9   :  { %v1113_v25 = vpack.c.b16 %v1103_v22, %v1102_v21 }
 0x2ea   :  { %v1014_v26 = vpop.f32.mrf.mxu3  ;;  %1459 = vmatpush.bf16.msrb.mxu2 %v2115_v2 }
 0x2eb   :  { %1205 = vmatmul.bf16.gmra.mxu0 %v1113_v25  ;;  %v1015_v28 = vadd.f32 %v2986_v23, %v1014_v26 }
 0x2ed   :  { %v1036_v30 = vpack.c.bf16 %v1015_v28, %v1015_v28 }
 0x2ef   :  { %v1104_v34 = vunpack.c.l.b16 %v1036_v30 }
 0x2f2   :  { %v1016_v29 = vpop.f32.mrf.mxu3 }
 0x2f3   :  { %v1017_v31 = vadd.f32 %v2986_v23, %v1016_v29 }
 0x2f5   :  { %v1037_v32 = vpack.c.bf16 %v1017_v31, %v1017_v31  ;;  %v2282_v33 = vpack.c.bf16 %v1017_v31, %v1015_v28 }
 0x2f7   :  { %2355 = vst [vmem:[#allocation23 + $0x30] sm:$0xff] %v2282_v33   ;;  %v1105_v35 = vunpack.c.l.b16 %v1037_v32  ;;  %v2114_v32 = vld [vmem:[#allocation14 + $0x8] sm:$0xff]  ;;  %v2113_v33 = vld [vmem:[#allocation14] sm:$0xff] }
 0x2f8   :  { %1460 = vmatpush.bf16.msrb.mxu2 %v2114_v32 }
 0x2f9   :  { %v1114_v36 = vpack.c.b16 %v1105_v35, %v1104_v34 }
 0x2fa   :  { %v1019_v37 = vpop.f32.mrf.mxu3 }
 0x2fb   :  { %1210 = vmatmul.bf16.gmra.mxu0 %v1114_v36  ;;  %v1020_v38 = vadd.f32 %v2986_v23, %v1019_v37 }
 0x2fc   :  { %1461 = vmatpush.bf16.msrb.mxu2 %v2113_v33  ;;  %v2122_v33 = vld [vmem:[#allocation16 + $0x8] sm:$0xff] }
 0x2fd   :  { %v1038_v40 = vpack.c.bf16 %v1020_v38, %v1020_v38 }
 0x2ff   :  { %v1106_v44 = vunpack.c.l.b16 %v1038_v40 }
 0x302   :  { %v1021_v39 = vpop.f32.mrf.mxu3 }
 0x303   :  { %v1022_v41 = vadd.f32 %v2986_v23, %v1021_v39 }
 0x305   :  { %v1039_v42 = vpack.c.bf16 %v1022_v41, %v1022_v41  ;;  %v2287_v43 = vpack.c.bf16 %v1022_v41, %v1020_v38 }
 0x307   :  { %2356 = vst [vmem:[#allocation23 + $0x38] sm:$0xff] %v2287_v43   ;;  %v1107_v45 = vunpack.c.l.b16 %v1039_v42 }
 0x308   :  { %1740 = dma.vmem_to_hbm [thread:$0]  %s1733_s10, 1024, %s1735_s8, [#allocation22], %s2741_s5, %s2741_s5, %s2742_s22  }
 0x309   :  { %v1115_v46 = vpack.c.b16 %v1107_v45, %v1106_v44 }
 0x30b   :  { %1215 = vmatmul.bf16.gmra.mxu0 %v1115_v46 }
 0x318   :  { %v1181_v48 = vpop.f32.mrf.mxu0 }
 0x319   :  { %v1182_v50 = vadd.f32 %v3007_v49, %v1181_v48 }
 0x31b   :  { %v1221_v52 = vmax.f32 %v1182_v50, 0.0  ;;  %v3028_v50 = vld [vmem:[%s3094_s12] ss:$0 sm:$0xff]  ;;  %s1682_s12 = sshll.u32 %s3099_s17, 4  ;;  %s1683_s12 = int_to_ptr.hbm [resolvable:$true] %s1682_s12 }
 0x320   :  { %v1183_v51 = vpop.f32.mrf.mxu0 }
 0x321   :  { %v1184_v23 = vadd.f32 %v3007_v49, %v1183_v51  ;;  %v2128_v51 = vld [vmem:[#allocation16 + $0x38] sm:$0xff] }
 0x322   :  { %1595 = vmatpush.bf16.msrb.mxu3 %v2128_v51 }
 0x323   :  { %v1222_v53 = vmax.f32 %v1184_v23, 0.0 }
 0x325   :  { %v1237_v55 = vpack.c.bf16 %v1222_v53, %v1221_v52 }
 0x327   :  { %1321 = vmatmul.bf16.vlgmr.msrb.gmra.mxu1 %v1237_v55 }
 0x328   :  { %v1186_v56 = vpop.f32.mrf.mxu0 }
 0x329   :  { %v1187_v57 = vadd.f32 %v3007_v49, %v1186_v56 }
 0x32b   :  { %v1223_v60 = vmax.f32 %v1187_v57, 0.0  ;;  %v2127_v57 = vld [vmem:[#allocation16 + $0x30] sm:$0xff] }
 0x32c   :  { %1596 = vmatpush.bf16.msrb.mxu3 %v2127_v57 }
 0x330   :  { %v1188_v58 = vpop.f32.mrf.mxu0 }
 0x331   :  { %v1189_v59 = vadd.f32 %v3007_v49, %v1188_v58 }
 0x333   :  { %v1224_v61 = vmax.f32 %v1189_v59, 0.0 }
 0x335   :  { %v1238_v63 = vpack.c.bf16 %v1224_v61, %v1223_v60 }
 0x337   :  { %1326 = vmatmul.bf16.gmra.mxu1 %v1238_v63 }
 0x338   :  { %v1191_v0 = vpop.f32.mrf.mxu0 }
 0x339   :  { %v1192_v1 = vadd.f32 %v3007_v49, %v1191_v0 }
 0x33b   :  { %v1225_v4 = vmax.f32 %v1192_v1, 0.0  ;;  %v2126_v1 = vld [vmem:[#allocation16 + $0x28] sm:$0xff] }
 0x33c   :  { %1597 = vmatpush.bf16.msrb.mxu3 %v2126_v1 }
 0x340   :  { %v1193_v3 = vpop.f32.mrf.mxu0 }
 0x341   :  { %v1194_v24 = vadd.f32 %v3007_v49, %v1193_v3 }
 0x343   :  { %v1226_v5 = vmax.f32 %v1194_v24, 0.0 }
 0x345   :  { %v1239_v6 = vpack.c.bf16 %v1226_v5, %v1225_v4 }
 0x347   :  { %1331 = vmatmul.bf16.gmra.mxu1 %v1239_v6 }
 0x348   :  { %v1196_v8 = vpop.f32.mrf.mxu0 }
 0x349   :  { %v1197_v9 = vadd.f32 %v3007_v49, %v1196_v8 }
 0x34b   :  { %v1227_v12 = vmax.f32 %v1197_v9, 0.0  ;;  %v2125_v9 = vld [vmem:[#allocation16 + $0x20] sm:$0xff] }
 0x34c   :  { %1598 = vmatpush.bf16.msrb.mxu3 %v2125_v9 }
 0x350   :  { %v1198_v10 = vpop.f32.mrf.mxu0 }
 0x351   :  { %v1199_v11 = vadd.f32 %v3007_v49, %v1198_v10 }
 0x353   :  { %v1228_v13 = vmax.f32 %v1199_v11, 0.0 }
 0x355   :  { %v1240_v14 = vpack.c.bf16 %v1228_v13, %v1227_v12 }
 0x357   :  { %1336 = vmatmul.bf16.gmra.mxu1 %v1240_v14 }
 0x358   :  { %v1201_v16 = vpop.f32.mrf.mxu0 }
 0x359   :  { %v1202_v17 = vadd.f32 %v3007_v49, %v1201_v16 }
 0x35b   :  { %v1229_v20 = vmax.f32 %v1202_v17, 0.0  ;;  %v2124_v17 = vld [vmem:[#allocation16 + $0x18] sm:$0xff] }
 0x35c   :  { %1599 = vmatpush.bf16.msrb.mxu3 %v2124_v17 }
 0x360   :  { %v1203_v18 = vpop.f32.mrf.mxu0 }
 0x361   :  { %v1204_v19 = vadd.f32 %v3007_v49, %v1203_v18 }
 0x363   :  { %v1230_v21 = vmax.f32 %v1204_v19, 0.0 }
 0x365   :  { %v1241_v22 = vpack.c.bf16 %v1230_v21, %v1229_v20 }
 0x367   :  { %1341 = vmatmul.bf16.gmra.mxu1 %v1241_v22 }
 0x368   :  { %v1206_v25 = vpop.f32.mrf.mxu0 }
 0x369   :  { %v1207_v26 = vadd.f32 %v3007_v49, %v1206_v25 }
 0x36b   :  { %v1231_v29 = vmax.f32 %v1207_v26, 0.0  ;;  %v2123_v26 = vld [vmem:[#allocation16 + $0x10] sm:$0xff] }
 0x36c   :  { %1600 = vmatpush.bf16.msrb.mxu3 %v2123_v26 }
 0x370   :  { %v1208_v27 = vpop.f32.mrf.mxu0  ;;  %1601 = vmatpush.bf16.msrb.mxu3 %v2122_v33 }
 0x371   :  { %v1209_v28 = vadd.f32 %v3007_v49, %v1208_v27 }
 0x373   :  { %v1232_v30 = vmax.f32 %v1209_v28, 0.0 }
 0x375   :  { %v1242_v31 = vpack.c.bf16 %v1232_v30, %v1231_v29 }
 0x377   :  { %1346 = vmatmul.bf16.gmra.mxu1 %v1242_v31 }
 0x378   :  { %v1211_v34 = vpop.f32.mrf.mxu0 }
 0x379   :  { %v1212_v35 = vadd.f32 %v3007_v49, %v1211_v34 }
 0x37b   :  { %v1233_v38 = vmax.f32 %v1212_v35, 0.0  ;;  %v2121_v35 = vld [vmem:[#allocation16] sm:$0xff] }
 0x37c   :  { %1602 = vmatpush.bf16.msrb.mxu3 %v2121_v35 }
 0x380   :  { %v1213_v36 = vpop.f32.mrf.mxu0 }
 0x381   :  { %v1214_v37 = vadd.f32 %v3007_v49, %v1213_v36 }
 0x383   :  { %v1234_v39 = vmax.f32 %v1214_v37, 0.0 }
 0x385   :  { %v1243_v40 = vpack.c.bf16 %v1234_v39, %v1233_v38 }
 0x387   :  { %1351 = vmatmul.bf16.gmra.mxu1 %v1243_v40 }
 0x388   :  { %v1216_v41 = vpop.f32.mrf.mxu0 }
 0x389   :  { %v1217_v42 = vadd.f32 %v3007_v49, %v1216_v41 }
 0x38b   :  { %v1235_v45 = vmax.f32 %v1217_v42, 0.0 }
 0x390   :  { %v1218_v43 = vpop.f32.mrf.mxu0 }
 0x391   :  { %v1219_v44 = vadd.f32 %v3007_v49, %v1218_v43 }
 0x393   :  { %v1236_v46 = vmax.f32 %v1219_v44, 0.0 }
 0x395   :  { %v1244_v47 = vpack.c.bf16 %v1236_v46, %v1235_v45 }
 0x397   :  { %1356 = vmatmul.bf16.gmra.mxu1 %v1244_v47 }
 0x3a4   :  { %v1322_v48 = vpop.f32.mrf.mxu1 }
 0x3a5   :  { %v1323_v23 = vadd.f32 %v3028_v50, %v1322_v48 }
 0x3a7   :  { %v1362_v54 = vmax.f32 %v1323_v23, 0.0  ;;  %v2386_v23 = vld [vmem:[%s3096_s14] ss:$0 sm:$0xff]  ;;  %s2751_s14 = smov [#allocation18]  }
 0x3a8   :  { %s1693_s7 = sshll.u32 %s2751_s14, 4  ;;  %s1694_s7 = int_to_ptr.vmem [resolvable:$true] %s1693_s7 }
 0x3a9   :  { %1701 = dma.vmem_to_hbm [thread:$0]  %s1694_s7, 1024, %s1696_s0, [#allocation19], %s2741_s5, %s2741_s5, %s2742_s22  }
 0x3aa   :  { %1714 = dma.vmem_to_hbm [thread:$0]  %s1707_s27, 1024, %s1709_s29, [#allocation19], %s2741_s5, %s2741_s5, %s2742_s22  }
 0x3ac   :  { %v1324_v52 = vpop.f32.mrf.mxu1 }
 0x3ad   :  { %v1325_v53 = vadd.f32 %v3028_v50, %v1324_v52 }
 0x3af   :  { %v1363_v55 = vmax.f32 %v1325_v53, 0.0 }
 0x3b1   :  { %v1378_v49 = vpack.c.bf16 %v1363_v55, %v1362_v54 }
 0x3b3   :  { %1462 = vmatmul.bf16.vlgmr.msrb.gmra.mxu2 %v1378_v49 }
 0x3b4   :  { %v1327_v56 = vpop.f32.mrf.mxu1 }
 0x3b5   :  { %v1328_v58 = vadd.f32 %v3028_v50, %v1327_v56 }
 0x3b7   :  { %v1364_v61 = vmax.f32 %v1328_v58, 0.0 }
 0x3bc   :  { %v1329_v59 = vpop.f32.mrf.mxu1 }
 0x3bd   :  { %v1330_v60 = vadd.f32 %v3028_v50, %v1329_v59 }
 0x3bf   :  { %v1365_v62 = vmax.f32 %v1330_v60, 0.0 }
 0x3c1   :  { %v1379_v63 = vpack.c.bf16 %v1365_v62, %v1364_v61 }
 0x3c3   :  { %1467 = vmatmul.bf16.gmra.mxu2 %v1379_v63 }
 0x3c4   :  { %v1332_v0 = vpop.f32.mrf.mxu1 }
 0x3c5   :  { %v1333_v3 = vadd.f32 %v3028_v50, %v1332_v0 }
 0x3c7   :  { %v1366_v5 = vmax.f32 %v1333_v3, 0.0 }
 0x3cc   :  { %v1334_v24 = vpop.f32.mrf.mxu1 }
 0x3cd   :  { %v1335_v4 = vadd.f32 %v3028_v50, %v1334_v24 }
 0x3cf   :  { %v1367_v6 = vmax.f32 %v1335_v4, 0.0 }
 0x3d1   :  { %v1380_v7 = vpack.c.bf16 %v1367_v6, %v1366_v5 }
 0x3d3   :  { %1472 = vmatmul.bf16.gmra.mxu2 %v1380_v7 }
 0x3d4   :  { %v1337_v8 = vpop.f32.mrf.mxu1 }
 0x3d5   :  { %v1338_v10 = vadd.f32 %v3028_v50, %v1337_v8 }
 0x3d7   :  { %v1368_v13 = vmax.f32 %v1338_v10, 0.0 }
 0x3dc   :  { %v1339_v11 = vpop.f32.mrf.mxu1 }
 0x3dd   :  { %v1340_v12 = vadd.f32 %v3028_v50, %v1339_v11 }
 0x3df   :  { %v1369_v14 = vmax.f32 %v1340_v12, 0.0 }
 0x3e1   :  { %v1381_v15 = vpack.c.bf16 %v1369_v14, %v1368_v13 }
 0x3e3   :  { %1477 = vmatmul.bf16.gmra.mxu2 %v1381_v15 }
 0x3e4   :  { %v1342_v16 = vpop.f32.mrf.mxu1 }
 0x3e5   :  { %v1343_v18 = vadd.f32 %v3028_v50, %v1342_v16 }
 0x3e7   :  { %v1370_v21 = vmax.f32 %v1343_v18, 0.0 }
 0x3ec   :  { %v1344_v19 = vpop.f32.mrf.mxu1 }
 0x3ed   :  { %v1345_v20 = vadd.f32 %v3028_v50, %v1344_v19 }
 0x3ef   :  { %v1371_v22 = vmax.f32 %v1345_v20, 0.0 }
 0x3f1   :  { %v1382_v2 = vpack.c.bf16 %v1371_v22, %v1370_v21 }
 0x3f3   :  { %1482 = vmatmul.bf16.gmra.mxu2 %v1382_v2 }
 0x3f4   :  { %v1347_v25 = vpop.f32.mrf.mxu1 }
 0x3f5   :  { %v1348_v27 = vadd.f32 %v3028_v50, %v1347_v25 }
 0x3f7   :  { %v1372_v30 = vmax.f32 %v1348_v27, 0.0 }
 0x3fc   :  { %v1349_v28 = vpop.f32.mrf.mxu1 }
 0x3fd   :  { %v1350_v29 = vadd.f32 %v3028_v50, %v1349_v28 }
 0x3ff   :  { %v1373_v31 = vmax.f32 %v1350_v29, 0.0 }
 0x401   :  { %v1383_v32 = vpack.c.bf16 %v1373_v31, %v1372_v30 }
 0x403   :  { %1487 = vmatmul.bf16.gmra.mxu2 %v1383_v32 }
 0x404   :  { %v1352_v34 = vpop.f32.mrf.mxu1 }
 0x405   :  { %v1353_v36 = vadd.f32 %v3028_v50, %v1352_v34 }
 0x407   :  { %v1374_v39 = vmax.f32 %v1353_v36, 0.0 }
 0x40c   :  { %v1354_v37 = vpop.f32.mrf.mxu1 }
 0x40d   :  { %v1355_v38 = vadd.f32 %v3028_v50, %v1354_v37 }
 0x40f   :  { %v1375_v40 = vmax.f32 %v1355_v38, 0.0 }
 0x411   :  { %v1384_v41 = vpack.c.bf16 %v1375_v40, %v1374_v39 }
 0x413   :  { %1492 = vmatmul.bf16.gmra.mxu2 %v1384_v41 }
 0x414   :  { %v1357_v42 = vpop.f32.mrf.mxu1 }
 0x415   :  { %v1358_v43 = vadd.f32 %v3028_v50, %v1357_v42 }
 0x417   :  { %v1376_v46 = vmax.f32 %v1358_v43, 0.0  ;;  %v2387_v43 = vld [vmem:[%s3098_s16] ss:$0 sm:$0xff]  ;;  %s2755_s16 = smov [#allocation17]  }
 0x418   :  { %s1680_s19 = sshll.u32 %s2755_s16, 4  ;;  %s1681_s19 = int_to_ptr.vmem [resolvable:$true] %s1680_s19 }
 0x41c   :  { %v1359_v44 = vpop.f32.mrf.mxu1 }
 0x41d   :  { %v1360_v45 = vadd.f32 %v3028_v50, %v1359_v44 }
 0x41f   :  { %v1377_v47 = vmax.f32 %v1360_v45, 0.0 }
 0x421   :  { %v1385_v48 = vpack.c.bf16 %v1377_v47, %v1376_v46 }
 0x423   :  { %1497 = vmatmul.bf16.gmra.mxu2 %v1385_v48 }
 0x436   :  { %v1463_v51 = vpop.f32.mrf.mxu2 }
 0x437   :  { %v1464_v52 = vadd.f32 %v2386_v23, %v1463_v51 }
 0x439   :  { %v1503_v55 = vmax.f32 %v1464_v52, 0.0 }
 0x43e   :  { %v1465_v53 = vpop.f32.mrf.mxu2 }
 0x43f   :  { %v1466_v54 = vadd.f32 %v2386_v23, %v1465_v53 }
 0x441   :  { %v1504_v49 = vmax.f32 %v1466_v54, 0.0 }
 0x443   :  { %v1519_v56 = vpack.c.bf16 %v1504_v49, %v1503_v55 }
 0x445   :  { %1603 = vmatmul.bf16.vlgmr.msrb.gmra.mxu3 %v1519_v56 }
 0x446   :  { %v1468_v57 = vpop.f32.mrf.mxu2 }
 0x447   :  { %v1469_v58 = vadd.f32 %v2386_v23, %v1468_v57 }
 0x449   :  { %v1505_v60 = vmax.f32 %v1469_v58, 0.0 }
 0x44e   :  { %v1470_v59 = vpop.f32.mrf.mxu2 }
 0x44f   :  { %v1471_v50 = vadd.f32 %v2386_v23, %v1470_v59 }
 0x451   :  { %v1506_v61 = vmax.f32 %v1471_v50, 0.0 }
 0x453   :  { %v1520_v62 = vpack.c.bf16 %v1506_v61, %v1505_v60 }
 0x455   :  { %1608 = vmatmul.bf16.gmra.mxu3 %v1520_v62 }
 0x456   :  { %v1473_v63 = vpop.f32.mrf.mxu2 }
 0x457   :  { %v1474_v0 = vadd.f32 %v2386_v23, %v1473_v63 }
 0x459   :  { %v1507_v24 = vmax.f32 %v1474_v0, 0.0 }
 0x45e   :  { %v1475_v1 = vpop.f32.mrf.mxu2 }
 0x45f   :  { %v1476_v3 = vadd.f32 %v2386_v23, %v1475_v1 }
 0x461   :  { %v1508_v4 = vmax.f32 %v1476_v3, 0.0 }
 0x463   :  { %v1521_v5 = vpack.c.bf16 %v1508_v4, %v1507_v24 }
 0x465   :  { %1613 = vmatmul.bf16.gmra.mxu3 %v1521_v5 }
 0x466   :  { %v1478_v6 = vpop.f32.mrf.mxu2 }
 0x467   :  { %v1479_v7 = vadd.f32 %v2386_v23, %v1478_v6 }
 0x469   :  { %v1509_v10 = vmax.f32 %v1479_v7, 0.0 }
 0x46e   :  { %v1480_v8 = vpop.f32.mrf.mxu2 }
 0x46f   :  { %v1481_v9 = vadd.f32 %v2386_v23, %v1480_v8 }
 0x471   :  { %v1510_v11 = vmax.f32 %v1481_v9, 0.0 }
 0x473   :  { %v1522_v12 = vpack.c.bf16 %v1510_v11, %v1509_v10 }
 0x475   :  { %1618 = vmatmul.bf16.gmra.mxu3 %v1522_v12 }
 0x476   :  { %v1483_v13 = vpop.f32.mrf.mxu2 }
 0x477   :  { %v1484_v14 = vadd.f32 %v2386_v23, %v1483_v13 }
 0x479   :  { %v1511_v17 = vmax.f32 %v1484_v14, 0.0 }
 0x47e   :  { %v1485_v15 = vpop.f32.mrf.mxu2 }
 0x47f   :  { %v1486_v16 = vadd.f32 %v2386_v23, %v1485_v15 }
 0x481   :  { %v1512_v18 = vmax.f32 %v1486_v16, 0.0 }
 0x483   :  { %v1523_v19 = vpack.c.bf16 %v1512_v18, %v1511_v17 }
 0x485   :  { %1623 = vmatmul.bf16.gmra.mxu3 %v1523_v19 }
 0x486   :  { %v1488_v20 = vpop.f32.mrf.mxu2 }
 0x487   :  { %v1489_v21 = vadd.f32 %v2386_v23, %v1488_v20 }
 0x489   :  { %v1513_v25 = vmax.f32 %v1489_v21, 0.0 }
 0x48e   :  { %v1490_v22 = vpop.f32.mrf.mxu2 }
 0x48f   :  { %v1491_v2 = vadd.f32 %v2386_v23, %v1490_v22 }
 0x491   :  { %v1514_v26 = vmax.f32 %v1491_v2, 0.0 }
 0x493   :  { %v1524_v27 = vpack.c.bf16 %v1514_v26, %v1513_v25 }
 0x495   :  { %1628 = vmatmul.bf16.gmra.mxu3 %v1524_v27 }
 0x496   :  { %v1493_v28 = vpop.f32.mrf.mxu2 }
 0x497   :  { %v1494_v29 = vadd.f32 %v2386_v23, %v1493_v28 }
 0x499   :  { %v1515_v32 = vmax.f32 %v1494_v29, 0.0 }
 0x49e   :  { %v1495_v30 = vpop.f32.mrf.mxu2 }
 0x49f   :  { %v1496_v31 = vadd.f32 %v2386_v23, %v1495_v30 }
 0x4a1   :  { %v1516_v33 = vmax.f32 %v1496_v31, 0.0 }
 0x4a3   :  { %v1525_v34 = vpack.c.bf16 %v1516_v33, %v1515_v32 }
 0x4a5   :  { %1633 = vmatmul.bf16.gmra.mxu3 %v1525_v34 }
 0x4a6   :  { %v1498_v35 = vpop.f32.mrf.mxu2 }
 0x4a7   :  { %v1499_v36 = vadd.f32 %v2386_v23, %v1498_v35 }
 0x4a9   :  { %v1517_v39 = vmax.f32 %v1499_v36, 0.0 }
 0x4ae   :  { %v1500_v37 = vpop.f32.mrf.mxu2 }
 0x4af   :  { %v1501_v38 = vadd.f32 %v2386_v23, %v1500_v37 }
 0x4b1   :  { %v1518_v40 = vmax.f32 %v1501_v38, 0.0 }
 0x4b3   :  { %v1526_v41 = vpack.c.bf16 %v1518_v40, %v1517_v39 }
 0x4b5   :  { %1638 = vmatmul.bf16.gmra.mxu3 %v1526_v41 }
 0x4c8   :  { %v1604_v42 = vpop.f32.mrf.mxu3 }
 0x4c9   :  { %v1605_v45 = vadd.f32 %v2387_v43, %v1604_v42 }
 0x4d0   :  { %v1606_v44 = vpop.f32.mrf.mxu3 }
 0x4d1   :  { %v1607_v46 = vadd.f32 %v2387_v43, %v1606_v44 }
 0x4d3   :  { %v2292_v47 = vpack.c.bf16 %v1607_v46, %v1605_v45 }
 0x4d5   :  { %2293 = vst [vmem:[#allocation17] sm:$0xff] %v2292_v47  }
 0x4d8   :  { %v1609_v48 = vpop.f32.mrf.mxu3 }
 0x4d9   :  { %v1610_v23 = vadd.f32 %v2387_v43, %v1609_v48 }
 0x4e0   :  { %v1611_v51 = vpop.f32.mrf.mxu3 }
 0x4e1   :  { %v1612_v52 = vadd.f32 %v2387_v43, %v1611_v51 }
 0x4e3   :  { %v2297_v53 = vpack.c.bf16 %v1612_v52, %v1610_v23 }
 0x4e5   :  { %2357 = vst [vmem:[#allocation17 + $0x8] sm:$0xff] %v2297_v53  }
 0x4e8   :  { %v1614_v54 = vpop.f32.mrf.mxu3 }
 0x4e9   :  { %v1615_v49 = vadd.f32 %v2387_v43, %v1614_v54 }
 0x4f0   :  { %v1616_v55 = vpop.f32.mrf.mxu3 }
 0x4f1   :  { %v1617_v56 = vadd.f32 %v2387_v43, %v1616_v55 }
 0x4f3   :  { %v2302_v57 = vpack.c.bf16 %v1617_v56, %v1615_v49 }
 0x4f5   :  { %2358 = vst [vmem:[#allocation17 + $0x10] sm:$0xff] %v2302_v57  }
 0x4f8   :  { %v1619_v58 = vpop.f32.mrf.mxu3 }
 0x4f9   :  { %v1620_v50 = vadd.f32 %v2387_v43, %v1619_v58 }
 0x500   :  { %v1621_v59 = vpop.f32.mrf.mxu3 }
 0x501   :  { %v1622_v60 = vadd.f32 %v2387_v43, %v1621_v59 }
 0x503   :  { %v2307_v61 = vpack.c.bf16 %v1622_v60, %v1620_v50 }
 0x505   :  { %2359 = vst [vmem:[#allocation17 + $0x18] sm:$0xff] %v2307_v61  }
 0x508   :  { %v1624_v62 = vpop.f32.mrf.mxu3 }
 0x509   :  { %v1625_v0 = vadd.f32 %v2387_v43, %v1624_v62 }
 0x510   :  { %v1626_v63 = vpop.f32.mrf.mxu3 }
 0x511   :  { %v1627_v1 = vadd.f32 %v2387_v43, %v1626_v63 }
 0x513   :  { %v2312_v3 = vpack.c.bf16 %v1627_v1, %v1625_v0 }
 0x515   :  { %2360 = vst [vmem:[#allocation17 + $0x20] sm:$0xff] %v2312_v3  }
 0x518   :  { %v1629_v24 = vpop.f32.mrf.mxu3 }
 0x519   :  { %v1630_v5 = vadd.f32 %v2387_v43, %v1629_v24 }
 0x520   :  { %v1631_v4 = vpop.f32.mrf.mxu3 }
 0x521   :  { %v1632_v6 = vadd.f32 %v2387_v43, %v1631_v4 }
 0x523   :  { %v2317_v7 = vpack.c.bf16 %v1632_v6, %v1630_v5 }
 0x525   :  { %2361 = vst [vmem:[#allocation17 + $0x28] sm:$0xff] %v2317_v7  }
 0x528   :  { %v1634_v8 = vpop.f32.mrf.mxu3 }
 0x529   :  { %v1635_v10 = vadd.f32 %v2387_v43, %v1634_v8 }
 0x530   :  { %v1636_v9 = vpop.f32.mrf.mxu3 }
 0x531   :  { %v1637_v11 = vadd.f32 %v2387_v43, %v1636_v9 }
 0x533   :  { %v2322_v12 = vpack.c.bf16 %v1637_v11, %v1635_v10 }
 0x535   :  { %2362 = vst [vmem:[#allocation17 + $0x30] sm:$0xff] %v2322_v12  }
 0x538   :  { %v1639_v13 = vpop.f32.mrf.mxu3 }
 0x539   :  { %v1640_v15 = vadd.f32 %v2387_v43, %v1639_v13 }
 0x540   :  { %v1641_v14 = vpop.f32.mrf.mxu3 }
 0x541   :  { %v1642_v16 = vadd.f32 %v2387_v43, %v1641_v14 }
 0x543   :  { %v2327_v17 = vpack.c.bf16 %v1642_v16, %v1640_v15 }
 0x545   :  { %2363 = vst [vmem:[#allocation17 + $0x38] sm:$0xff] %v2327_v17  }
 0x546   :  { %1688 = dma.vmem_to_hbm [thread:$0]  %s1681_s19, 1024, %s1683_s12, [#allocation4], %s2741_s5, %s2741_s5, %s2742_s22  }
 0x547   :  { %2734 = dma.done.wait [#allocation4], 1024  }
 0x548   :  { %2735 = vsyncadd [#allocation4], 4294966272 }
 0x549   :  { %2736 = dma.done.wait [#allocation19], 2048  }
 0x54a   :  { %2737 = vsyncadd [#allocation19], 4294965248 }
 0x54b   :  { %2738 = dma.done.wait [#allocation22], 2048  }
 0x54c   :  { %2739 = vsyncadd [#allocation22], 4294965248 }
 0x54d   :  { %1761 = vsyncpa [#allocation3], 1 }
 0x54e   :  { %1762 = vsyncpa [#allocation6], 1 }
 0x54f   :  { %1763 = vsyncpa [#allocation9], 1 }
 0x550   :  { %1764 = vsyncpa [#allocation12], 1 }
 0x551   :  { %1765 = vsyncpa [#allocation15], 1 }
 0x552   :  { %1766 = vsyncpa [#allocation4], 1 }
 0x553   :  { %1767 = vsyncpa [#allocation19], 1 }
 0x554   :  { %1768 = vsyncpa [#allocation22], 1 }

// kernel: tpu_custom_call.1
= control target key start
LH: loop header
LB: loop body
LE: loop exit
PB: predicated region body
PF: predicated region fallthrough
CT: control target
= control target key end

     0   :  { %s3082_s0 = inlined_call_operand.hbm [shape: bf16[128,128], index: 0, kind: input, shape index: {}]   ;;  %s3083_s1 = inlined_call_operand.hbm [shape: bf16[128,128], index: 1, kind: input, shape index: {}]   ;;  %s3084_s2 = inlined_call_operand.vmem [shape: f32[1,128], index: 2, kind: input, shape index: {}]   ;;  %s3085_s3 = inlined_call_operand.hbm [shape: bf16[128,128], index: 3, kind: input, shape index: {}]   ;;  %s3086_s4 = inlined_call_operand.vmem [shape: f32[1,128], index: 4, kind: input, shape index: {}]   ;;  %s3087_s5 = inlined_call_operand.hbm [shape: bf16[128,128], index: 5, kind: input, shape index: {}]   ;;  %s3088_s6 = inlined_call_operand.vmem [shape: f32[1,128], index: 6, kind: input, shape index: {}]   ;;  %s3089_s7 = inlined_call_operand.hbm [shape: bf16[128,128], index: 7, kind: input, shape index: {}]   ;;  %s3090_s8 = inlined_call_operand.vmem [shape: f32[1,128], index: 8, kind: input, shape index: {}]   ;;  %s3091_s9 = inlined_call_operand.hbm [shape: bf16[128,128], index: 9, kind: input, shape index: {}]   ;;  %s3092_s10 = inlined_call_operand.vmem [shape: f32[1,128], index: 10, kind: input, shape index: {}]   ;;  %s3093_s11 = inlined_call_operand.hbm [shape: bf16[128,128], index: 11, kind: input, shape index: {}]   ;;  %s3094_s12 = inlined_call_operand.vmem [shape: f32[1,128], index: 12, kind: input, shape index: {}]   ;;  %s3095_s13 = inlined_call_operand.hbm [shape: bf16[128,128], index: 13, kind: input, shape index: {}]   ;;  %s3096_s14 = inlined_call_operand.vmem [shape: f32[1,128], index: 14, kind: input, shape index: {}]   ;;  %s3097_s15 = inlined_call_operand.hbm [shape: bf16[128,128], index: 15, kind: input, shape index: {}]   ;;  %s3098_s16 = inlined_call_operand.vmem [shape: f32[1,128], index: 16, kind: input, shape index: {}]   ;;  %s3099_s17 = inlined_call_operand.hbm [shape: bf16[128,128], index: 17, kind: output, shape index: {0}]   ;;  %s3100_s18 = inlined_call_operand.hbm [shape: bf16[128,128], index: 18, kind: output, shape index: {1}]   ;;  %s3101_s19 = inlined_call_operand.hbm [shape: bf16[128,128], index: 19, kind: output, shape index: {2}]   ;;  %s3102_s20 = inlined_call_operand.hbm [shape: bf16[128,128], index: 20, kind: output, shape index: {3}]   ;;  %s3103_s21 = inlined_call_operand.hbm [shape: bf16[128,128], index: 21, kind: output, shape index: {4}]  }
   0x1   :  { %3104 = sst [smem:[#allocation32_spill]] %s3082_s0 }
   0x2   :  { %3105 = sst [smem:[#allocation33_spill]] %s3083_s1 }
   0x3   :  { %3106 = sst [smem:[#allocation34_spill]] %s3084_s2 }
   0x4   :  { %3107 = sst [smem:[#allocation35_spill]] %s3085_s3 }
   0x5   :  { %3108 = sst [smem:[#allocation36_spill]] %s3086_s4 }
   0x6   :  { %3109 = sst [smem:[#allocation37_spill]] %s3087_s5 }
   0x7   :  { %27 = vsyncpa [#allocation3], 0 }
   0x8   :  { %28 = vsyncpa [#allocation6], 0 }
   0x9   :  { %29 = vsyncpa [#allocation9], 0 }
   0xa   :  { %30 = vsyncpa [#allocation12], 0 }
   0xb   :  { %31 = vsyncpa [#allocation15], 0 }
   0xc   :  { %32 = vsyncpa [#allocation4], 0 }
   0xd   :  { %33 = vsyncpa [#allocation19], 0 }
   0xe   :  { %34 = vsyncpa [#allocation22], 0  ;;  %s3110_s26 = sld [smem:[#allocation33_spill]]  ;;  %s2740_s3 = smov [#allocation5]  }
   0xf   :  { %s54_s28 = sshll.u32 %s2740_s3, 4  ;;  %s3111_s4 = sld [smem:[#allocation37_spill]]  ;;  %s55_s28 = int_to_ptr.vmem [resolvable:$true] %s54_s28 }
  0x10   :  { %s2741_s5 = smov 64   ;;  %s2742_s22 = smov 4  }
  0x11   :  { %s2743_s23 = smov [#allocation8]   ;;  %s112_s25 = sshll.u32 %s3091_s9, 4  ;;  %s113_s25 = int_to_ptr.hbm [resolvable:$true] %s112_s25 }
  0x12   :  { %s84_s1 = sshll.u32 %s2743_s23, 4  ;;  %s142_s29 = sshll.u32 %s3095_s13, 4  ;;  %s85_s1 = int_to_ptr.vmem [resolvable:$true] %s84_s1  ;;  %s143_s29 = int_to_ptr.hbm [resolvable:$true] %s142_s29 }
  0x13   :  { %s2744_s0 = smov [#allocation11]   ;;  %s3112_s24 = sld [smem:[#allocation32_spill]] }
  0x14   :  { %s52_s27 = sshll.u32 %s3110_s26, 4  ;;  %s2746_s3 = smov [#allocation2]   ;;  %s53_s27 = int_to_ptr.hbm [resolvable:$true] %s52_s27 }
  0x15   :  { %s82_s30 = sshll.u32 %s3111_s4, 4  ;;  %s114_s4 = sshll.u32 %s2744_s0, 4  ;;  %s83_s30 = int_to_ptr.hbm [resolvable:$true] %s82_s30  ;;  %s115_s4 = int_to_ptr.vmem [resolvable:$true] %s114_s4 }
  0x16   :  { %60 = dma.hbm_to_vmem [thread:$0]  %s53_s27, 1024, %s55_s28, [#allocation6], %s2741_s5, %s2741_s5, %s2742_s22  }
  0x17   :  { %90 = dma.hbm_to_vmem [thread:$0]  %s83_s30, 1024, %s85_s1, [#allocation9], %s2741_s5, %s2741_s5, %s2742_s22  }
  0x18   :  { %120 = dma.hbm_to_vmem [thread:$0]  %s113_s25, 1024, %s115_s4, [#allocation12], %s2741_s5, %s2741_s5, %s2742_s22  }
  0x19   :  { %s2745_s27 = smov [#allocation14]   ;;  %s39_s2 = sshll.u32 %s3112_s24, 4  ;;  %s40_s2 = int_to_ptr.hbm [resolvable:$true] %s39_s2 }
  0x1a   :  { %s144_s9 = sshll.u32 %s2745_s27, 4  ;;  %s3113_s1 = sld [smem:[#allocation35_spill]]  ;;  %s145_s9 = int_to_ptr.vmem [resolvable:$true] %s144_s9 }
  0x1b   :  { %150 = dma.hbm_to_vmem [thread:$0]  %s143_s29, 1024, %s145_s9, [#allocation15], %s2741_s5, %s2741_s5, %s2742_s22  }
  0x1c   :  { %s41_s0 = sshll.u32 %s2746_s3, 4  ;;  %s2747_s25 = smov [#allocation7]   ;;  %s42_s0 = int_to_ptr.vmem [resolvable:$true] %s41_s0 }
  0x1d   :  { %47 = dma.hbm_to_vmem [thread:$0]  %s40_s2, 1024, %s42_s0, [#allocation3], %s2741_s5, %s2741_s5, %s2742_s22  }
  0x1e   :  { %s69_s4 = sshll.u32 %s2747_s25, 4  ;;  %s97_s23 = sshll.u32 %s3089_s7, 4  ;;  %s70_s4 = int_to_ptr.vmem [resolvable:$true] %s69_s4  ;;  %s98_s23 = int_to_ptr.hbm [resolvable:$true] %s97_s23 }
  0x1f   :  { %s127_s24 = sshll.u32 %s3093_s11, 4  ;;  %s2748_s13 = smov [#allocation10]   ;;  %s128_s24 = int_to_ptr.hbm [resolvable:$true] %s127_s24 }
  0x20   :  { %s67_s26 = sshll.u32 %s3113_s1, 4  ;;  %s99_s30 = sshll.u32 %s2748_s13, 4  ;;  %s68_s26 = int_to_ptr.hbm [resolvable:$true] %s67_s26  ;;  %s100_s30 = int_to_ptr.vmem [resolvable:$true] %s99_s30 }
  0x21   :  { %75 = dma.hbm_to_vmem [thread:$0]  %s68_s26, 1024, %s70_s4, [#allocation6], %s2741_s5, %s2741_s5, %s2742_s22  }
  0x22   :  { %105 = dma.hbm_to_vmem [thread:$0]  %s98_s23, 1024, %s100_s30, [#allocation9], %s2741_s5, %s2741_s5, %s2742_s22  }
  0x23   :  { %s2749_s2 = smov [#allocation13]   ;;  %s157_s0 = sshll.u32 %s3097_s15, 4  ;;  %s158_s0 = int_to_ptr.hbm [resolvable:$true] %s157_s0 }
  0x24   :  { %s129_s7 = sshll.u32 %s2749_s2, 4  ;;  %s2750_s11 = smov [#allocation16]   ;;  %s130_s7 = int_to_ptr.vmem [resolvable:$true] %s129_s7 }
  0x25   :  { %135 = dma.hbm_to_vmem [thread:$0]  %s128_s24, 1024, %s130_s7, [#allocation12], %s2741_s5, %s2741_s5, %s2742_s22  }
  0x26   :  { %s159_s26 = sshll.u32 %s2750_s11, 4  ;;  %s160_s26 = int_to_ptr.vmem [resolvable:$true] %s159_s26 }
  0x27   :  { %165 = dma.hbm_to_vmem [thread:$0]  %s158_s0, 1024, %s160_s26, [#allocation15], %s2741_s5, %s2741_s5, %s2742_s22  }
  0x28   :  { %2724 = dma.done.wait [#allocation3], 1024  }
  0x29   :  { %2725 = vsyncadd [#allocation3], 4294966272 }
  0x2a   :  { %2726 = dma.done.wait [#allocation6], 2048  }
  0x2b   :  { %2727 = vsyncadd [#allocation6], 4294965248 }
  0x2c   :  { %2728 = dma.done.wait [#allocation9], 2048  }
  0x2d   :  { %2729 = vsyncadd [#allocation9], 4294965248 }
  0x2e   :  { %2730 = dma.done.wait [#allocation12], 2048  }
  0x2f   :  { %2731 = vsyncadd [#allocation12], 4294965248 }
  0x30   :  { %2732 = dma.done.wait [#allocation15], 2048  }
  0x31   :  { %2733 = vsyncadd [#allocation15], 4294965248  ;;  %v2072_v0 = vld [vmem:[#allocation5 + $0x38] sm:$0xff]  ;;  %v2071_v1 = vld [vmem:[#allocation5 + $0x30] sm:$0xff]  ;;  %s3114_s4 = sld [smem:[#allocation34_spill]]  ;;  %s1695_s0 = sshll.u32 %s3100_s18, 4  ;;  %s1696_s0 = int_to_ptr.hbm [resolvable:$true] %s1695_s0 }
  0x32   :  { %336 = vmatpush.bf16.msra.mxu0 %v2072_v0  ;;  %v2070_v2 = vld [vmem:[#allocation5 + $0x28] sm:$0xff]  ;;  %v2069_v3 = vld [vmem:[#allocation5 + $0x20] sm:$0xff]  ;;  %v2068_v4 = vld [vmem:[#allocation5 + $0x18] sm:$0xff]  ;;  %s3115_s23 = sld [smem:[#allocation36_spill]]  ;;  %s2752_s11 = smov [#allocation21]  }
  0x33   :  { %v2067_v5 = vld [vmem:[#allocation5 + $0x10] sm:$0xff]  ;;  %v2066_v6 = vld [vmem:[#allocation5 + $0x8] sm:$0xff]  ;;  %v2065_v7 = vld [vmem:[#allocation5] sm:$0xff]  ;;  %s1719_s26 = sshll.u32 %s2752_s11, 4  ;;  %s2753_s18 = smov [#allocation20]   ;;  %s1720_s26 = int_to_ptr.vmem [resolvable:$true] %s1719_s26 }
  0x34   :  { %v2057_v8 = vld [vmem:[#allocation2] sm:$0xff]  ;;  %v2058_v9 = vld [vmem:[#allocation2 + $0x8] sm:$0xff]  ;;  %v2059_v10 = vld [vmem:[#allocation2 + $0x10] sm:$0xff]  ;;  %s1706_s27 = sshll.u32 %s2753_s18, 4  ;;  %s1708_s29 = sshll.u32 %s3101_s19, 4  ;;  %s1707_s27 = int_to_ptr.vmem [resolvable:$true] %s1706_s27  ;;  %s1709_s29 = int_to_ptr.hbm [resolvable:$true] %s1708_s29 }
  0x35   :  { %v2060_v11 = vld [vmem:[#allocation2 + $0x18] sm:$0xff]  ;;  %v2061_v12 = vld [vmem:[#allocation2 + $0x20] sm:$0xff]  ;;  %v2062_v13 = vld [vmem:[#allocation2 + $0x28] sm:$0xff]  ;;  %s2754_s13 = smov [#allocation23]  }
  0x36   :  { %337 = vmatpush.bf16.msra.mxu0 %v2071_v1  ;;  %v2080_v14 = vld [vmem:[#allocation7 + $0x38] sm:$0xff]  ;;  %v2079_v15 = vld [vmem:[#allocation7 + $0x30] sm:$0xff]  ;;  %v2078_v16 = vld [vmem:[#allocation7 + $0x28] sm:$0xff] }
  0x37   :  { %549 = vmatpush.bf16.msra.mxu1 %v2080_v14  ;;  %v2077_v17 = vld [vmem:[#allocation7 + $0x20] sm:$0xff]  ;;  %v2063_v18 = vld [vmem:[#allocation2 + $0x30] sm:$0xff]  ;;  %v2076_v19 = vld [vmem:[#allocation7 + $0x18] sm:$0xff] }
  0x38   :  { %v2075_v20 = vld [vmem:[#allocation7 + $0x10] sm:$0xff]  ;;  %v2074_v21 = vld [vmem:[#allocation7 + $0x8] sm:$0xff]  ;;  %v2073_v22 = vld [vmem:[#allocation7] sm:$0xff] }
  0x39   :  { %v2064_v23 = vld [vmem:[#allocation2 + $0x38] sm:$0xff]  ;;  %v2923_v24 = vld [vmem:[%s3114_s4] ss:$0 sm:$0xff]  ;;  %s1721_s4 = sshll.u32 %s3102_s20, 4  ;;  %s1722_s4 = int_to_ptr.hbm [resolvable:$true] %s1721_s4 }
  0x3a   :  { %338 = vmatpush.bf16.msra.mxu0 %v2070_v2 }
  0x3b   :  { %550 = vmatpush.bf16.msra.mxu1 %v2079_v15 }
  0x3e   :  { %339 = vmatpush.bf16.msra.mxu0 %v2069_v3 }
  0x3f   :  { %551 = vmatpush.bf16.msra.mxu1 %v2078_v16 }
  0x42   :  { %340 = vmatpush.bf16.msra.mxu0 %v2068_v4 }
  0x43   :  { %552 = vmatpush.bf16.msra.mxu1 %v2077_v17 }
  0x46   :  { %341 = vmatpush.bf16.msra.mxu0 %v2067_v5 }
  0x47   :  { %553 = vmatpush.bf16.msra.mxu1 %v2076_v19 }
  0x4a   :  { %342 = vmatpush.bf16.msra.mxu0 %v2066_v6 }
  0x4b   :  { %554 = vmatpush.bf16.msra.mxu1 %v2075_v20 }
  0x4e   :  { %343 = vmatpush.bf16.msra.mxu0 %v2065_v7 }
  0x4f   :  { %555 = vmatpush.bf16.msra.mxu1 %v2074_v21 }
  0x51   :  { %344 = vmatmul.bf16.vlgmr.msra.gmra.mxu0 %v2057_v8 }
  0x53   :  { %556 = vmatpush.bf16.msra.mxu1 %v2073_v22 }
  0x61   :  { %349 = vmatmul.bf16.gmra.mxu0 %v2058_v9 }
  0x71   :  { %354 = vmatmul.bf16.gmra.mxu0 %v2059_v10 }
  0x81   :  { %359 = vmatmul.bf16.gmra.mxu0 %v2060_v11 }
  0x91   :  { %364 = vmatmul.bf16.gmra.mxu0 %v2061_v12 }
  0xa1   :  { %369 = vmatmul.bf16.gmra.mxu0 %v2062_v13 }
  0xb1   :  { %374 = vmatmul.bf16.gmra.mxu0 %v2063_v18 }
  0xc1   :  { %379 = vmatmul.bf16.gmra.mxu0 %v2064_v23 }
  0xce   :  { %v345_v25 = vpop.f32.mrf.mxu0 }
  0xcf   :  { %v346_v26 = vadd.f32 %v2923_v24, %v345_v25 }
  0xd1   :  { %v385_v27 = vmax.f32 %v346_v26, 0.0 }
  0xd3   :  { %v401_v30 = vpack.c.bf16 %v385_v27, %v385_v27 }
  0xd5   :  { %v469_v34 = vunpack.c.l.b16 %v401_v30 }
  0xd6   :  { %v347_v28 = vpop.f32.mrf.mxu0 }
  0xd7   :  { %v348_v29 = vadd.f32 %v2923_v24, %v347_v28 }
  0xd9   :  { %v386_v31 = vmax.f32 %v348_v29, 0.0 }
  0xdb   :  { %v2132_v32 = vpack.c.bf16 %v386_v31, %v385_v27  ;;  %v402_v33 = vpack.c.bf16 %v386_v31, %v386_v31 }
  0xdd   :  { %2133 = vst [vmem:[#allocation18] sm:$0xff] %v2132_v32   ;;  %v470_v35 = vunpack.c.l.b16 %v402_v33 }
  0xde   :  { %v350_v36 = vpop.f32.mrf.mxu0 }
  0xdf   :  { %v485_v37 = vpack.c.b16 %v470_v35, %v469_v34  ;;  %v351_v38 = vadd.f32 %v2923_v24, %v350_v36  ;;  %v2088_v35 = vld [vmem:[#allocation8 + $0x38] sm:$0xff] }
  0xe0   :  { %762 = vmatpush.bf16.msra.mxu2 %v2088_v35 }
  0xe1   :  { %557 = vmatmul.bf16.vlgmr.msra.gmra.mxu1 %v485_v37  ;;  %v387_v39 = vmax.f32 %v351_v38, 0.0  ;;  %v2087_v37 = vld [vmem:[#allocation8 + $0x30] sm:$0xff] }
  0xe3   :  { %v403_v42 = vpack.c.bf16 %v387_v39, %v387_v39 }
  0xe4   :  { %763 = vmatpush.bf16.msra.mxu2 %v2087_v37 }
  0xe5   :  { %v471_v46 = vunpack.c.l.b16 %v403_v42 }
  0xe6   :  { %v352_v40 = vpop.f32.mrf.mxu0 }
  0xe7   :  { %v353_v41 = vadd.f32 %v2923_v24, %v352_v40  ;;  %v2086_v40 = vld [vmem:[#allocation8 + $0x28] sm:$0xff] }
  0xe8   :  { %764 = vmatpush.bf16.msra.mxu2 %v2086_v40 }
  0xe9   :  { %v388_v43 = vmax.f32 %v353_v41, 0.0 }
  0xeb   :  { %v2137_v44 = vpack.c.bf16 %v388_v43, %v387_v39  ;;  %v404_v45 = vpack.c.bf16 %v388_v43, %v388_v43 }
  0xed   :  { %2329 = vst [vmem:[#allocation18 + $0x8] sm:$0xff] %v2137_v44   ;;  %v472_v47 = vunpack.c.l.b16 %v404_v45 }
  0xee   :  { %v355_v48 = vpop.f32.mrf.mxu0 }
  0xef   :  { %v486_v49 = vpack.c.b16 %v472_v47, %v471_v46  ;;  %v356_v50 = vadd.f32 %v2923_v24, %v355_v48  ;;  %v2085_v46 = vld [vmem:[#allocation8 + $0x20] sm:$0xff] }
  0xf0   :  { %765 = vmatpush.bf16.msra.mxu2 %v2085_v46 }
  0xf1   :  { %562 = vmatmul.bf16.gmra.mxu1 %v486_v49  ;;  %v389_v51 = vmax.f32 %v356_v50, 0.0 }
  0xf3   :  { %v405_v54 = vpack.c.bf16 %v389_v51, %v389_v51 }
  0xf5   :  { %v473_v58 = vunpack.c.l.b16 %v405_v54 }
  0xf6   :  { %v357_v52 = vpop.f32.mrf.mxu0 }
  0xf7   :  { %v358_v53 = vadd.f32 %v2923_v24, %v357_v52 }
  0xf9   :  { %v390_v55 = vmax.f32 %v358_v53, 0.0  ;;  %v2083_v53 = vld [vmem:[#allocation8 + $0x10] sm:$0xff] }
  0xfb   :  { %v2142_v56 = vpack.c.bf16 %v390_v55, %v389_v51  ;;  %v406_v57 = vpack.c.bf16 %v390_v55, %v390_v55  ;;  %v2084_v51 = vld [vmem:[#allocation8 + $0x18] sm:$0xff] }
  0xfc   :  { %766 = vmatpush.bf16.msra.mxu2 %v2084_v51 }
  0xfd   :  { %2330 = vst [vmem:[#allocation18 + $0x10] sm:$0xff] %v2142_v56   ;;  %v474_v59 = vunpack.c.l.b16 %v406_v57  ;;  %v2082_v57 = vld [vmem:[#allocation8 + $0x8] sm:$0xff] }
  0xfe   :  { %v360_v60 = vpop.f32.mrf.mxu0 }
  0xff   :  { %v487_v61 = vpack.c.b16 %v474_v59, %v473_v58  ;;  %v361_v62 = vadd.f32 %v2923_v24, %v360_v60 }
 0x100   :  { %767 = vmatpush.bf16.msra.mxu2 %v2083_v53 }
 0x101   :  { %567 = vmatmul.bf16.gmra.mxu1 %v487_v61  ;;  %v391_v63 = vmax.f32 %v361_v62, 0.0  ;;  %v2081_v62 = vld [vmem:[#allocation8] sm:$0xff] }
 0x103   :  { %v407_v2 = vpack.c.bf16 %v391_v63, %v391_v63 }
 0x104   :  { %768 = vmatpush.bf16.msra.mxu2 %v2082_v57 }
 0x105   :  { %v475_v6 = vunpack.c.l.b16 %v407_v2  ;;  %v2944_v2 = vld [vmem:[%s3115_s23] ss:$0 sm:$0xff] }
 0x106   :  { %v362_v0 = vpop.f32.mrf.mxu0 }
 0x107   :  { %v363_v1 = vadd.f32 %v2923_v24, %v362_v0 }
 0x108   :  { %769 = vmatpush.bf16.msra.mxu2 %v2081_v62 }
 0x109   :  { %v392_v3 = vmax.f32 %v363_v1, 0.0 }
 0x10b   :  { %v2147_v4 = vpack.c.bf16 %v392_v3, %v391_v63  ;;  %v408_v5 = vpack.c.bf16 %v392_v3, %v392_v3 }
 0x10d   :  { %2331 = vst [vmem:[#allocation18 + $0x18] sm:$0xff] %v2147_v4   ;;  %v476_v7 = vunpack.c.l.b16 %v408_v5 }
 0x10e   :  { %v365_v8 = vpop.f32.mrf.mxu0 }
 0x10f   :  { %v488_v9 = vpack.c.b16 %v476_v7, %v475_v6  ;;  %v366_v10 = vadd.f32 %v2923_v24, %v365_v8 }
 0x111   :  { %572 = vmatmul.bf16.gmra.mxu1 %v488_v9  ;;  %v393_v11 = vmax.f32 %v366_v10, 0.0 }
 0x113   :  { %v409_v14 = vpack.c.bf16 %v393_v11, %v393_v11 }
 0x115   :  { %v477_v18 = vunpack.c.l.b16 %v409_v14 }
 0x116   :  { %v367_v12 = vpop.f32.mrf.mxu0 }
 0x117   :  { %v368_v13 = vadd.f32 %v2923_v24, %v367_v12 }
 0x119   :  { %v394_v15 = vmax.f32 %v368_v13, 0.0 }
 0x11b   :  { %v410_v16 = vpack.c.bf16 %v394_v15, %v394_v15  ;;  %v2152_v17 = vpack.c.bf16 %v394_v15, %v393_v11 }
 0x11d   :  { %2332 = vst [vmem:[#allocation18 + $0x20] sm:$0xff] %v2152_v17   ;;  %v478_v19 = vunpack.c.l.b16 %v410_v16 }
 0x11e   :  { %v370_v20 = vpop.f32.mrf.mxu0 }
 0x11f   :  { %v489_v21 = vpack.c.b16 %v478_v19, %v477_v18  ;;  %v371_v22 = vadd.f32 %v2923_v24, %v370_v20 }
 0x121   :  { %577 = vmatmul.bf16.gmra.mxu1 %v489_v21  ;;  %v395_v23 = vmax.f32 %v371_v22, 0.0 }
 0x123   :  { %v411_v27 = vpack.c.bf16 %v395_v23, %v395_v23 }
 0x125   :  { %v479_v31 = vunpack.c.l.b16 %v411_v27 }
 0x126   :  { %v372_v25 = vpop.f32.mrf.mxu0 }
 0x127   :  { %v373_v26 = vadd.f32 %v2923_v24, %v372_v25 }
 0x129   :  { %v396_v28 = vmax.f32 %v373_v26, 0.0 }
 0x12b   :  { %v412_v29 = vpack.c.bf16 %v396_v28, %v396_v28  ;;  %v2157_v30 = vpack.c.bf16 %v396_v28, %v395_v23 }
 0x12d   :  { %2333 = vst [vmem:[#allocation18 + $0x28] sm:$0xff] %v2157_v30   ;;  %v480_v32 = vunpack.c.l.b16 %v412_v29 }
 0x12e   :  { %v375_v33 = vpop.f32.mrf.mxu0 }
 0x12f   :  { %v490_v34 = vpack.c.b16 %v480_v32, %v479_v31  ;;  %v376_v36 = vadd.f32 %v2923_v24, %v375_v33 }
 0x131   :  { %582 = vmatmul.bf16.gmra.mxu1 %v490_v34  ;;  %v397_v38 = vmax.f32 %v376_v36, 0.0 }
 0x133   :  { %v413_v42 = vpack.c.bf16 %v397_v38, %v397_v38 }
 0x135   :  { %v481_v47 = vunpack.c.l.b16 %v413_v42 }
 0x136   :  { %v377_v39 = vpop.f32.mrf.mxu0 }
 0x137   :  { %v378_v41 = vadd.f32 %v2923_v24, %v377_v39 }
 0x139   :  { %v398_v43 = vmax.f32 %v378_v41, 0.0 }
 0x13b   :  { %v414_v44 = vpack.c.bf16 %v398_v43, %v398_v43  ;;  %v2162_v45 = vpack.c.bf16 %v398_v43, %v397_v38 }
 0x13d   :  { %2334 = vst [vmem:[#allocation18 + $0x30] sm:$0xff] %v2162_v45   ;;  %v482_v48 = vunpack.c.l.b16 %v414_v44 }
 0x13e   :  { %v380_v49 = vpop.f32.mrf.mxu0 }
 0x13f   :  { %v491_v50 = vpack.c.b16 %v482_v48, %v481_v47  ;;  %v381_v52 = vadd.f32 %v2923_v24, %v380_v49 }
 0x141   :  { %587 = vmatmul.bf16.gmra.mxu1 %v491_v50  ;;  %v399_v54 = vmax.f32 %v381_v52, 0.0 }
 0x143   :  { %v415_v58 = vpack.c.bf16 %v399_v54, %v399_v54 }
 0x145   :  { %v483_v63 = vunpack.c.l.b16 %v415_v58 }
 0x146   :  { %v382_v55 = vpop.f32.mrf.mxu0 }
 0x147   :  { %v383_v56 = vadd.f32 %v2923_v24, %v382_v55 }
 0x149   :  { %v400_v59 = vmax.f32 %v383_v56, 0.0 }
 0x14b   :  { %v416_v60 = vpack.c.bf16 %v400_v59, %v400_v59  ;;  %v2167_v61 = vpack.c.bf16 %v400_v59, %v399_v54 }
 0x14d   :  { %2335 = vst [vmem:[#allocation18 + $0x38] sm:$0xff] %v2167_v61   ;;  %v484_v0 = vunpack.c.l.b16 %v416_v60 }
 0x14f   :  { %v492_v1 = vpack.c.b16 %v484_v0, %v483_v63 }
 0x151   :  { %592 = vmatmul.bf16.gmra.mxu1 %v492_v1 }
 0x15e   :  { %v558_v3 = vpop.f32.mrf.mxu1 }
 0x15f   :  { %v559_v24 = vadd.f32 %v2944_v2, %v558_v3 }
 0x161   :  { %v598_v4 = vmax.f32 %v559_v24, 0.0 }
 0x163   :  { %v614_v7 = vpack.c.bf16 %v598_v4, %v598_v4 }
 0x165   :  { %v682_v11 = vunpack.c.l.b16 %v614_v7 }
 0x166   :  { %v560_v5 = vpop.f32.mrf.mxu1 }
 0x167   :  { %v561_v6 = vadd.f32 %v2944_v2, %v560_v5 }
 0x169   :  { %v599_v8 = vmax.f32 %v561_v6, 0.0 }
 0x16b   :  { %v2172_v9 = vpack.c.bf16 %v599_v8, %v598_v4  ;;  %v615_v10 = vpack.c.bf16 %v599_v8, %v599_v8 }
 0x16d   :  { %2173 = vst [vmem:[#allocation20] sm:$0xff] %v2172_v9   ;;  %v683_v12 = vunpack.c.l.b16 %v615_v10 }
 0x16e   :  { %v563_v13 = vpop.f32.mrf.mxu1 }
 0x16f   :  { %v698_v14 = vpack.c.b16 %v683_v12, %v682_v11  ;;  %v564_v15 = vadd.f32 %v2944_v2, %v563_v13  ;;  %v2096_v13 = vld [vmem:[#allocation10 + $0x38] sm:$0xff] }
 0x170   :  { %975 = vmatpush.bf16.msra.mxu3 %v2096_v13 }
 0x171   :  { %770 = vmatmul.bf16.vlgmr.msra.gmra.mxu2 %v698_v14  ;;  %v600_v16 = vmax.f32 %v564_v15, 0.0  ;;  %v2095_v14 = vld [vmem:[#allocation10 + $0x30] sm:$0xff] }
 0x173   :  { %v616_v19 = vpack.c.bf16 %v600_v16, %v600_v16 }
 0x174   :  { %976 = vmatpush.bf16.msra.mxu3 %v2095_v14 }
 0x175   :  { %v684_v23 = vunpack.c.l.b16 %v616_v19 }
 0x176   :  { %v565_v17 = vpop.f32.mrf.mxu1 }
 0x177   :  { %v566_v18 = vadd.f32 %v2944_v2, %v565_v17 }
 0x179   :  { %v601_v20 = vmax.f32 %v566_v18, 0.0  ;;  %v2094_v18 = vld [vmem:[#allocation10 + $0x28] sm:$0xff] }
 0x17a   :  { %977 = vmatpush.bf16.msra.mxu3 %v2094_v18 }
 0x17b   :  { %v2177_v21 = vpack.c.bf16 %v601_v20, %v600_v16  ;;  %v617_v22 = vpack.c.bf16 %v601_v20, %v601_v20 }
 0x17d   :  { %2336 = vst [vmem:[#allocation20 + $0x8] sm:$0xff] %v2177_v21   ;;  %v685_v25 = vunpack.c.l.b16 %v617_v22 }
 0x17e   :  { %v568_v26 = vpop.f32.mrf.mxu1 }
 0x17f   :  { %v699_v27 = vpack.c.b16 %v685_v25, %v684_v23  ;;  %v569_v28 = vadd.f32 %v2944_v2, %v568_v26 }
 0x181   :  { %775 = vmatmul.bf16.gmra.mxu2 %v699_v27  ;;  %v602_v29 = vmax.f32 %v569_v28, 0.0 }
 0x183   :  { %v618_v32 = vpack.c.bf16 %v602_v29, %v602_v29 }
 0x185   :  { %v686_v36 = vunpack.c.l.b16 %v618_v32  ;;  %v2092_v32 = vld [vmem:[#allocation10 + $0x18] sm:$0xff] }
 0x186   :  { %v570_v30 = vpop.f32.mrf.mxu1 }
 0x187   :  { %v571_v31 = vadd.f32 %v2944_v2, %v570_v30 }
 0x189   :  { %v603_v33 = vmax.f32 %v571_v31, 0.0 }
 0x18b   :  { %v2182_v34 = vpack.c.bf16 %v603_v33, %v602_v29  ;;  %v619_v35 = vpack.c.bf16 %v603_v33, %v603_v33  ;;  %v2093_v29 = vld [vmem:[#allocation10 + $0x20] sm:$0xff] }
 0x18c   :  { %978 = vmatpush.bf16.msra.mxu3 %v2093_v29 }
 0x18d   :  { %2337 = vst [vmem:[#allocation20 + $0x10] sm:$0xff] %v2182_v34   ;;  %v687_v37 = vunpack.c.l.b16 %v619_v35 }
 0x18e   :  { %v573_v38 = vpop.f32.mrf.mxu1 }
 0x18f   :  { %v700_v39 = vpack.c.b16 %v687_v37, %v686_v36  ;;  %v574_v40 = vadd.f32 %v2944_v2, %v573_v38  ;;  %v2091_v36 = vld [vmem:[#allocation10 + $0x10] sm:$0xff] }
 0x190   :  { %979 = vmatpush.bf16.msra.mxu3 %v2092_v32 }
 0x191   :  { %780 = vmatmul.bf16.gmra.mxu2 %v700_v39  ;;  %v604_v41 = vmax.f32 %v574_v40, 0.0 }
 0x193   :  { %v620_v44 = vpack.c.bf16 %v604_v41, %v604_v41 }
 0x194   :  { %980 = vmatpush.bf16.msra.mxu3 %v2091_v36 }
 0x195   :  { %v688_v48 = vunpack.c.l.b16 %v620_v44 }
 0x196   :  { %v575_v42 = vpop.f32.mrf.mxu1 }
 0x197   :  { %v576_v43 = vadd.f32 %v2944_v2, %v575_v42 }
 0x199   :  { %v605_v45 = vmax.f32 %v576_v43, 0.0  ;;  %v2089_v43 = vld [vmem:[#allocation10] sm:$0xff] }
 0x19b   :  { %v2187_v46 = vpack.c.bf16 %v605_v45, %v604_v41  ;;  %v621_v47 = vpack.c.bf16 %v605_v45, %v605_v45  ;;  %v2090_v41 = vld [vmem:[#allocation10 + $0x8] sm:$0xff] }
 0x19c   :  { %981 = vmatpush.bf16.msra.mxu3 %v2090_v41 }
 0x19d   :  { %2338 = vst [vmem:[#allocation20 + $0x18] sm:$0xff] %v2187_v46   ;;  %v689_v49 = vunpack.c.l.b16 %v621_v47  ;;  %v2104_v46 = vld [vmem:[#allocation11 + $0x38] sm:$0xff] }
 0x19e   :  { %v578_v50 = vpop.f32.mrf.mxu1  ;;  %1172 = vmatpush.bf16.msrb.mxu0 %v2104_v46 }
 0x19f   :  { %v701_v51 = vpack.c.b16 %v689_v49, %v688_v48  ;;  %v579_v52 = vadd.f32 %v2944_v2, %v578_v50 }
 0x1a0   :  { %982 = vmatpush.bf16.msra.mxu3 %v2089_v43 }
 0x1a1   :  { %785 = vmatmul.bf16.gmra.mxu2 %v701_v51  ;;  %v606_v53 = vmax.f32 %v579_v52, 0.0 }
 0x1a3   :  { %v622_v56 = vpack.c.bf16 %v606_v53, %v606_v53 }
 0x1a5   :  { %v690_v60 = vunpack.c.l.b16 %v622_v56 }
 0x1a6   :  { %v580_v54 = vpop.f32.mrf.mxu1 }
 0x1a7   :  { %v581_v55 = vadd.f32 %v2944_v2, %v580_v54 }
 0x1a9   :  { %v607_v57 = vmax.f32 %v581_v55, 0.0 }
 0x1ab   :  { %v623_v58 = vpack.c.bf16 %v607_v57, %v607_v57  ;;  %v2192_v59 = vpack.c.bf16 %v607_v57, %v606_v53 }
 0x1ad   :  { %2339 = vst [vmem:[#allocation20 + $0x20] sm:$0xff] %v2192_v59   ;;  %v691_v61 = vunpack.c.l.b16 %v623_v58  ;;  %v2103_v59 = vld [vmem:[#allocation11 + $0x30] sm:$0xff] }
 0x1ae   :  { %v583_v62 = vpop.f32.mrf.mxu1  ;;  %1173 = vmatpush.bf16.msrb.mxu0 %v2103_v59 }
 0x1af   :  { %v702_v63 = vpack.c.b16 %v691_v61, %v690_v60  ;;  %v584_v0 = vadd.f32 %v2944_v2, %v583_v62 }
 0x1b1   :  { %790 = vmatmul.bf16.gmra.mxu2 %v702_v63  ;;  %v608_v1 = vmax.f32 %v584_v0, 0.0 }
 0x1b3   :  { %v624_v4 = vpack.c.bf16 %v608_v1, %v608_v1 }
 0x1b5   :  { %v692_v8 = vunpack.c.l.b16 %v624_v4 }
 0x1b6   :  { %v585_v3 = vpop.f32.mrf.mxu1 }
 0x1b7   :  { %v586_v24 = vadd.f32 %v2944_v2, %v585_v3 }
 0x1b9   :  { %v609_v5 = vmax.f32 %v586_v24, 0.0 }
 0x1bb   :  { %v625_v6 = vpack.c.bf16 %v609_v5, %v609_v5  ;;  %v2197_v7 = vpack.c.bf16 %v609_v5, %v608_v1 }
 0x1bd   :  { %2340 = vst [vmem:[#allocation20 + $0x28] sm:$0xff] %v2197_v7   ;;  %v693_v9 = vunpack.c.l.b16 %v625_v6 }
 0x1be   :  { %v588_v10 = vpop.f32.mrf.mxu1 }
 0x1bf   :  { %v703_v11 = vpack.c.b16 %v693_v9, %v692_v8  ;;  %v589_v12 = vadd.f32 %v2944_v2, %v588_v10  ;;  %v2102_v8 = vld [vmem:[#allocation11 + $0x28] sm:$0xff] }
 0x1c0   :  { %1174 = vmatpush.bf16.msrb.mxu0 %v2102_v8 }
 0x1c1   :  { %795 = vmatmul.bf16.gmra.mxu2 %v703_v11  ;;  %v610_v15 = vmax.f32 %v589_v12, 0.0 }
 0x1c3   :  { %v626_v19 = vpack.c.bf16 %v610_v15, %v610_v15 }
 0x1c5   :  { %v694_v23 = vunpack.c.l.b16 %v626_v19 }
 0x1c6   :  { %v590_v16 = vpop.f32.mrf.mxu1 }
 0x1c7   :  { %v591_v17 = vadd.f32 %v2944_v2, %v590_v16 }
 0x1c9   :  { %v611_v20 = vmax.f32 %v591_v17, 0.0 }
 0x1cb   :  { %v627_v21 = vpack.c.bf16 %v611_v20, %v611_v20  ;;  %v2202_v22 = vpack.c.bf16 %v611_v20, %v610_v15 }
 0x1cd   :  { %2341 = vst [vmem:[#allocation20 + $0x30] sm:$0xff] %v2202_v22   ;;  %v695_v25 = vunpack.c.l.b16 %v627_v21  ;;  %v2101_v21 = vld [vmem:[#allocation11 + $0x20] sm:$0xff] }
 0x1ce   :  { %v593_v26 = vpop.f32.mrf.mxu1  ;;  %1175 = vmatpush.bf16.msrb.mxu0 %v2101_v21  ;;  %v2112_v21 = vld [vmem:[#allocation13 + $0x38] sm:$0xff] }
 0x1cf   :  { %v704_v27 = vpack.c.b16 %v695_v25, %v694_v23  ;;  %v594_v28 = vadd.f32 %v2944_v2, %v593_v26  ;;  %1313 = vmatpush.bf16.msrb.mxu1 %v2112_v21 }
 0x1d1   :  { %800 = vmatmul.bf16.gmra.mxu2 %v704_v27  ;;  %v612_v30 = vmax.f32 %v594_v28, 0.0 }
 0x1d3   :  { %v628_v34 = vpack.c.bf16 %v612_v30, %v612_v30 }
 0x1d5   :  { %v696_v39 = vunpack.c.l.b16 %v628_v34 }
 0x1d6   :  { %v595_v31 = vpop.f32.mrf.mxu1 }
 0x1d7   :  { %v596_v33 = vadd.f32 %v2944_v2, %v595_v31  ;;  %v2965_v2 = vld [vmem:[%s3088_s6] ss:$0 sm:$0xff] }
 0x1d9   :  { %v613_v35 = vmax.f32 %v596_v33, 0.0 }
 0x1db   :  { %v629_v37 = vpack.c.bf16 %v613_v35, %v613_v35  ;;  %v2207_v38 = vpack.c.bf16 %v613_v35, %v612_v30  ;;  %v2100_v35 = vld [vmem:[#allocation11 + $0x18] sm:$0xff] }
 0x1dc   :  { %1176 = vmatpush.bf16.msrb.mxu0 %v2100_v35 }
 0x1dd   :  { %2342 = vst [vmem:[#allocation20 + $0x38] sm:$0xff] %v2207_v38   ;;  %v697_v40 = vunpack.c.l.b16 %v629_v37 }
 0x1df   :  { %v705_v42 = vpack.c.b16 %v697_v40, %v696_v39 }
 0x1e1   :  { %805 = vmatmul.bf16.gmra.mxu2 %v705_v42 }
 0x1f4   :  { %v771_v44 = vpop.f32.mrf.mxu2 }
 0x1f5   :  { %v772_v45 = vadd.f32 %v2965_v2, %v771_v44 }
 0x1f7   :  { %v811_v47 = vmax.f32 %v772_v45, 0.0 }
 0x1f9   :  { %v827_v50 = vpack.c.bf16 %v811_v47, %v811_v47 }
 0x1fb   :  { %v895_v54 = vunpack.c.l.b16 %v827_v50 }
 0x1fc   :  { %v773_v48 = vpop.f32.mrf.mxu2 }
 0x1fd   :  { %v774_v49 = vadd.f32 %v2965_v2, %v773_v48  ;;  %v2099_v48 = vld [vmem:[#allocation11 + $0x10] sm:$0xff] }
 0x1fe   :  { %1177 = vmatpush.bf16.msrb.mxu0 %v2099_v48 }
 0x1ff   :  { %v812_v51 = vmax.f32 %v774_v49, 0.0 }
 0x201   :  { %v2212_v52 = vpack.c.bf16 %v812_v51, %v811_v47  ;;  %v828_v53 = vpack.c.bf16 %v812_v51, %v812_v51 }
 0x203   :  { %2213 = vst [vmem:[#allocation21] sm:$0xff] %v2212_v52   ;;  %v896_v55 = vunpack.c.l.b16 %v828_v53 }
 0x204   :  { %v776_v56 = vpop.f32.mrf.mxu2 }
 0x205   :  { %v911_v57 = vpack.c.b16 %v896_v55, %v895_v54  ;;  %v777_v58 = vadd.f32 %v2965_v2, %v776_v56 }
 0x207   :  { %983 = vmatmul.bf16.vlgmr.msra.gmra.mxu3 %v911_v57  ;;  %v813_v60 = vmax.f32 %v777_v58, 0.0 }
 0x209   :  { %v829_v63 = vpack.c.bf16 %v813_v60, %v813_v60 }
 0x20b   :  { %v897_v24 = vunpack.c.l.b16 %v829_v63 }
 0x20c   :  { %v778_v61 = vpop.f32.mrf.mxu2 }
 0x20d   :  { %v779_v62 = vadd.f32 %v2965_v2, %v778_v61  ;;  %v2098_v61 = vld [vmem:[#allocation11 + $0x8] sm:$0xff] }
 0x20e   :  { %1178 = vmatpush.bf16.msrb.mxu0 %v2098_v61 }
 0x20f   :  { %v814_v0 = vmax.f32 %v779_v62, 0.0 }
 0x211   :  { %v2217_v1 = vpack.c.bf16 %v814_v0, %v813_v60  ;;  %v830_v3 = vpack.c.bf16 %v814_v0, %v814_v0 }
 0x213   :  { %2343 = vst [vmem:[#allocation21 + $0x8] sm:$0xff] %v2217_v1   ;;  %v898_v4 = vunpack.c.l.b16 %v830_v3 }
 0x214   :  { %v781_v5 = vpop.f32.mrf.mxu2 }
 0x215   :  { %v912_v6 = vpack.c.b16 %v898_v4, %v897_v24  ;;  %v782_v7 = vadd.f32 %v2965_v2, %v781_v5 }
 0x217   :  { %988 = vmatmul.bf16.gmra.mxu3 %v912_v6  ;;  %v815_v9 = vmax.f32 %v782_v7, 0.0 }
 0x219   :  { %v831_v12 = vpack.c.bf16 %v815_v9, %v815_v9 }
 0x21b   :  { %v899_v16 = vunpack.c.l.b16 %v831_v12 }
 0x21c   :  { %v783_v10 = vpop.f32.mrf.mxu2 }
 0x21d   :  { %v784_v11 = vadd.f32 %v2965_v2, %v783_v10 }
 0x21f   :  { %v816_v13 = vmax.f32 %v784_v11, 0.0 }
 0x221   :  { %v2222_v14 = vpack.c.bf16 %v816_v13, %v815_v9  ;;  %v832_v15 = vpack.c.bf16 %v816_v13, %v816_v13 }
 0x223   :  { %2344 = vst [vmem:[#allocation21 + $0x10] sm:$0xff] %v2222_v14   ;;  %v900_v17 = vunpack.c.l.b16 %v832_v15  ;;  %v2097_v15 = vld [vmem:[#allocation11] sm:$0xff] }
 0x224   :  { %v786_v18 = vpop.f32.mrf.mxu2  ;;  %1179 = vmatpush.bf16.msrb.mxu0 %v2097_v15 }
 0x225   :  { %v913_v19 = vpack.c.b16 %v900_v17, %v899_v16  ;;  %v787_v20 = vadd.f32 %v2965_v2, %v786_v18 }
 0x227   :  { %993 = vmatmul.bf16.gmra.mxu3 %v913_v19  ;;  %v817_v22 = vmax.f32 %v787_v20, 0.0 }
 0x229   :  { %v833_v26 = vpack.c.bf16 %v817_v22, %v817_v22 }
 0x22b   :  { %v901_v30 = vunpack.c.l.b16 %v833_v26 }
 0x22c   :  { %v788_v23 = vpop.f32.mrf.mxu2 }
 0x22d   :  { %v789_v25 = vadd.f32 %v2965_v2, %v788_v23  ;;  %v2986_v23 = vld [vmem:[%s3090_s8] ss:$0 sm:$0xff]  ;;  %s1734_s8 = sshll.u32 %s3103_s21, 4  ;;  %s1735_s8 = int_to_ptr.hbm [resolvable:$true] %s1734_s8 }
 0x22f   :  { %v818_v27 = vmax.f32 %v789_v25, 0.0 }
 0x231   :  { %v2227_v28 = vpack.c.bf16 %v818_v27, %v817_v22  ;;  %v834_v29 = vpack.c.bf16 %v818_v27, %v818_v27 }
 0x233   :  { %2345 = vst [vmem:[#allocation21 + $0x18] sm:$0xff] %v2227_v28   ;;  %v902_v31 = vunpack.c.l.b16 %v834_v29 }
 0x234   :  { %v791_v32 = vpop.f32.mrf.mxu2 }
 0x235   :  { %v914_v33 = vpack.c.b16 %v902_v31, %v901_v30  ;;  %v792_v34 = vadd.f32 %v2965_v2, %v791_v32  ;;  %v2111_v32 = vld [vmem:[#allocation13 + $0x30] sm:$0xff] }
 0x236   :  { %1314 = vmatpush.bf16.msrb.mxu1 %v2111_v32 }
 0x237   :  { %998 = vmatmul.bf16.gmra.mxu3 %v914_v33  ;;  %v819_v36 = vmax.f32 %v792_v34, 0.0 }
 0x239   :  { %v835_v39 = vpack.c.bf16 %v819_v36, %v819_v36 }
 0x23b   :  { %v903_v43 = vunpack.c.l.b16 %v835_v39 }
 0x23c   :  { %v793_v37 = vpop.f32.mrf.mxu2 }
 0x23d   :  { %v794_v38 = vadd.f32 %v2965_v2, %v793_v37 }
 0x23f   :  { %v820_v40 = vmax.f32 %v794_v38, 0.0 }
 0x241   :  { %v836_v41 = vpack.c.bf16 %v820_v40, %v820_v40  ;;  %v2232_v42 = vpack.c.bf16 %v820_v40, %v819_v36 }
 0x243   :  { %2346 = vst [vmem:[#allocation21 + $0x20] sm:$0xff] %v2232_v42   ;;  %v904_v44 = vunpack.c.l.b16 %v836_v41 }
 0x244   :  { %v796_v45 = vpop.f32.mrf.mxu2 }
 0x245   :  { %v915_v46 = vpack.c.b16 %v904_v44, %v903_v43  ;;  %v797_v47 = vadd.f32 %v2965_v2, %v796_v45  ;;  %v2110_v43 = vld [vmem:[#allocation13 + $0x28] sm:$0xff] }
 0x246   :  { %1315 = vmatpush.bf16.msrb.mxu1 %v2110_v43 }
 0x247   :  { %1003 = vmatmul.bf16.gmra.mxu3 %v915_v46  ;;  %v821_v49 = vmax.f32 %v797_v47, 0.0 }
 0x249   :  { %v837_v52 = vpack.c.bf16 %v821_v49, %v821_v49 }
 0x24b   :  { %v905_v56 = vunpack.c.l.b16 %v837_v52 }
 0x24c   :  { %v798_v50 = vpop.f32.mrf.mxu2 }
 0x24d   :  { %v799_v51 = vadd.f32 %v2965_v2, %v798_v50 }
 0x24f   :  { %v822_v53 = vmax.f32 %v799_v51, 0.0 }
 0x251   :  { %v838_v54 = vpack.c.bf16 %v822_v53, %v822_v53  ;;  %v2237_v55 = vpack.c.bf16 %v822_v53, %v821_v49 }
 0x253   :  { %2347 = vst [vmem:[#allocation21 + $0x28] sm:$0xff] %v2237_v55   ;;  %v906_v57 = vunpack.c.l.b16 %v838_v54  ;;  %v2109_v54 = vld [vmem:[#allocation13 + $0x20] sm:$0xff] }
 0x254   :  { %v801_v58 = vpop.f32.mrf.mxu2  ;;  %1316 = vmatpush.bf16.msrb.mxu1 %v2109_v54  ;;  %v2119_v54 = vld [vmem:[#allocation14 + $0x30] sm:$0xff] }
 0x255   :  { %v916_v59 = vpack.c.b16 %v906_v57, %v905_v56  ;;  %v802_v60 = vadd.f32 %v2965_v2, %v801_v58 }
 0x257   :  { %1008 = vmatmul.bf16.gmra.mxu3 %v916_v59  ;;  %v823_v62 = vmax.f32 %v802_v60, 0.0 }
 0x259   :  { %v839_v1 = vpack.c.bf16 %v823_v62, %v823_v62 }
 0x25b   :  { %v907_v5 = vunpack.c.l.b16 %v839_v1  ;;  %v2108_v1 = vld [vmem:[#allocation13 + $0x18] sm:$0xff] }
 0x25c   :  { %v803_v63 = vpop.f32.mrf.mxu2  ;;  %1317 = vmatpush.bf16.msrb.mxu1 %v2108_v1 }
 0x25d   :  { %v804_v0 = vadd.f32 %v2965_v2, %v803_v63 }
 0x25f   :  { %v824_v3 = vmax.f32 %v804_v0, 0.0 }
 0x261   :  { %v840_v24 = vpack.c.bf16 %v824_v3, %v824_v3  ;;  %v2242_v4 = vpack.c.bf16 %v824_v3, %v823_v62 }
 0x263   :  { %2348 = vst [vmem:[#allocation21 + $0x30] sm:$0xff] %v2242_v4   ;;  %v908_v6 = vunpack.c.l.b16 %v840_v24 }
 0x264   :  { %v806_v7 = vpop.f32.mrf.mxu2 }
 0x265   :  { %v917_v8 = vpack.c.b16 %v908_v6, %v907_v5  ;;  %v807_v9 = vadd.f32 %v2965_v2, %v806_v7 }
 0x267   :  { %1013 = vmatmul.bf16.gmra.mxu3 %v917_v8  ;;  %v825_v10 = vmax.f32 %v807_v9, 0.0 }
 0x269   :  { %v841_v13 = vpack.c.bf16 %v825_v10, %v825_v10 }
 0x26b   :  { %v909_v18 = vunpack.c.l.b16 %v841_v13 }
 0x26c   :  { %v808_v11 = vpop.f32.mrf.mxu2 }
 0x26d   :  { %v809_v12 = vadd.f32 %v2965_v2, %v808_v11 }
 0x26f   :  { %v826_v14 = vmax.f32 %v809_v12, 0.0  ;;  %v2107_v12 = vld [vmem:[#allocation13 + $0x10] sm:$0xff] }
 0x270   :  { %1318 = vmatpush.bf16.msrb.mxu1 %v2107_v12 }
 0x271   :  { %v842_v16 = vpack.c.bf16 %v826_v14, %v826_v14  ;;  %v2247_v17 = vpack.c.bf16 %v826_v14, %v825_v10 }
 0x273   :  { %2349 = vst [vmem:[#allocation21 + $0x38] sm:$0xff] %v2247_v17   ;;  %v910_v19 = vunpack.c.l.b16 %v842_v16 }
 0x274   :  { %1727 = dma.vmem_to_hbm [thread:$0]  %s1720_s26, 1024, %s1722_s4, [#allocation22], %s2741_s5, %s2741_s5, %s2742_s22  }
 0x275   :  { %v918_v20 = vpack.c.b16 %v910_v19, %v909_v18 }
 0x277   :  { %1018 = vmatmul.bf16.gmra.mxu3 %v918_v20 }
 0x28a   :  { %v984_v22 = vpop.f32.mrf.mxu3 }
 0x28b   :  { %v985_v2 = vadd.f32 %v2986_v23, %v984_v22 }
 0x28d   :  { %v1024_v26 = vpack.c.bf16 %v985_v2, %v985_v2 }
 0x28f   :  { %v1092_v30 = vunpack.c.l.b16 %v1024_v26 }
 0x292   :  { %v986_v25 = vpop.f32.mrf.mxu3 }
 0x293   :  { %v987_v27 = vadd.f32 %v2986_v23, %v986_v25 }
 0x295   :  { %v1025_v28 = vpack.c.bf16 %v987_v27, %v987_v27  ;;  %v2252_v29 = vpack.c.bf16 %v987_v27, %v985_v2  ;;  %v2106_v2 = vld [vmem:[#allocation13 + $0x8] sm:$0xff]  ;;  %v2105_v27 = vld [vmem:[#allocation13] sm:$0xff] }
 0x296   :  { %1319 = vmatpush.bf16.msrb.mxu1 %v2106_v2  ;;  %v2115_v2 = vld [vmem:[#allocation14 + $0x10] sm:$0xff] }
 0x297   :  { %2253 = vst [vmem:[#allocation23] sm:$0xff] %v2252_v29   ;;  %v1093_v31 = vunpack.c.l.b16 %v1025_v28 }
 0x299   :  { %v1108_v33 = vpack.c.b16 %v1093_v31, %v1092_v30 }
 0x29a   :  { %v989_v34 = vpop.f32.mrf.mxu3  ;;  %1320 = vmatpush.bf16.msrb.mxu1 %v2105_v27 }
 0x29b   :  { %1180 = vmatmul.bf16.vlgmr.msrb.gmra.mxu0 %v1108_v33  ;;  %v990_v35 = vadd.f32 %v2986_v23, %v989_v34 }
 0x29d   :  { %v1026_v37 = vpack.c.bf16 %v990_v35, %v990_v35 }
 0x29f   :  { %v1094_v41 = vunpack.c.l.b16 %v1026_v37 }
 0x2a2   :  { %v991_v36 = vpop.f32.mrf.mxu3 }
 0x2a3   :  { %v992_v38 = vadd.f32 %v2986_v23, %v991_v36 }
 0x2a5   :  { %v1027_v39 = vpack.c.bf16 %v992_v38, %v992_v38  ;;  %v2257_v40 = vpack.c.bf16 %v992_v38, %v990_v35 }
 0x2a7   :  { %2350 = vst [vmem:[#allocation23 + $0x8] sm:$0xff] %v2257_v40   ;;  %v1095_v42 = vunpack.c.l.b16 %v1027_v39 }
 0x2a9   :  { %v1109_v44 = vpack.c.b16 %v1095_v42, %v1094_v41 }
 0x2aa   :  { %v994_v45 = vpop.f32.mrf.mxu3 }
 0x2ab   :  { %1185 = vmatmul.bf16.gmra.mxu0 %v1109_v44  ;;  %v995_v46 = vadd.f32 %v2986_v23, %v994_v45 }
 0x2ad   :  { %v1028_v48 = vpack.c.bf16 %v995_v46, %v995_v46 }
 0x2af   :  { %v1096_v52 = vunpack.c.l.b16 %v1028_v48 }
 0x2b2   :  { %v996_v47 = vpop.f32.mrf.mxu3 }
 0x2b3   :  { %v997_v49 = vadd.f32 %v2986_v23, %v996_v47  ;;  %v2120_v47 = vld [vmem:[#allocation14 + $0x38] sm:$0xff] }
 0x2b4   :  { %1454 = vmatpush.bf16.msrb.mxu2 %v2120_v47 }
 0x2b5   :  { %v1029_v50 = vpack.c.bf16 %v997_v49, %v997_v49  ;;  %v2262_v51 = vpack.c.bf16 %v997_v49, %v995_v46  ;;  %v3007_v49 = vld [vmem:[%s3092_s10] ss:$0 sm:$0xff]  ;;  %s1732_s10 = sshll.u32 %s2754_s13, 4  ;;  %s1733_s10 = int_to_ptr.vmem [resolvable:$true] %s1732_s10 }
 0x2b7   :  { %2351 = vst [vmem:[#allocation23 + $0x10] sm:$0xff] %v2262_v51   ;;  %v1097_v53 = vunpack.c.l.b16 %v1029_v50 }
 0x2b8   :  { %1455 = vmatpush.bf16.msrb.mxu2 %v2119_v54 }
 0x2b9   :  { %v1110_v55 = vpack.c.b16 %v1097_v53, %v1096_v52 }
 0x2ba   :  { %v999_v56 = vpop.f32.mrf.mxu3 }
 0x2bb   :  { %1190 = vmatmul.bf16.gmra.mxu0 %v1110_v55  ;;  %v1000_v57 = vadd.f32 %v2986_v23, %v999_v56 }
 0x2bd   :  { %v1030_v59 = vpack.c.bf16 %v1000_v57, %v1000_v57 }
 0x2bf   :  { %v1098_v63 = vunpack.c.l.b16 %v1030_v59 }
 0x2c2   :  { %v1001_v58 = vpop.f32.mrf.mxu3 }
 0x2c3   :  { %v1002_v60 = vadd.f32 %v2986_v23, %v1001_v58 }
 0x2c5   :  { %v1031_v61 = vpack.c.bf16 %v1002_v60, %v1002_v60  ;;  %v2267_v62 = vpack.c.bf16 %v1002_v60, %v1000_v57 }
 0x2c7   :  { %2352 = vst [vmem:[#allocation23 + $0x18] sm:$0xff] %v2267_v62   ;;  %v1099_v0 = vunpack.c.l.b16 %v1031_v61  ;;  %v2118_v62 = vld [vmem:[#allocation14 + $0x28] sm:$0xff] }
 0x2c8   :  { %1456 = vmatpush.bf16.msrb.mxu2 %v2118_v62 }
 0x2c9   :  { %v1111_v3 = vpack.c.b16 %v1099_v0, %v1098_v63 }
 0x2ca   :  { %v1004_v24 = vpop.f32.mrf.mxu3 }
 0x2cb   :  { %1195 = vmatmul.bf16.gmra.mxu0 %v1111_v3  ;;  %v1005_v4 = vadd.f32 %v2986_v23, %v1004_v24 }
 0x2cd   :  { %v1032_v6 = vpack.c.bf16 %v1005_v4, %v1005_v4 }
 0x2cf   :  { %v1100_v10 = vunpack.c.l.b16 %v1032_v6 }
 0x2d2   :  { %v1006_v5 = vpop.f32.mrf.mxu3 }
 0x2d3   :  { %v1007_v7 = vadd.f32 %v2986_v23, %v1006_v5 }
 0x2d5   :  { %v1033_v8 = vpack.c.bf16 %v1007_v7, %v1007_v7  ;;  %v2272_v9 = vpack.c.bf16 %v1007_v7, %v1005_v4  ;;  %v2117_v7 = vld [vmem:[#allocation14 + $0x20] sm:$0xff] }
 0x2d6   :  { %1457 = vmatpush.bf16.msrb.mxu2 %v2117_v7 }
 0x2d7   :  { %2353 = vst [vmem:[#allocation23 + $0x20] sm:$0xff] %v2272_v9   ;;  %v1101_v11 = vunpack.c.l.b16 %v1033_v8 }
 0x2d9   :  { %v1112_v13 = vpack.c.b16 %v1101_v11, %v1100_v10 }
 0x2da   :  { %v1009_v14 = vpop.f32.mrf.mxu3 }
 0x2db   :  { %1200 = vmatmul.bf16.gmra.mxu0 %v1112_v13  ;;  %v1010_v15 = vadd.f32 %v2986_v23, %v1009_v14 }
 0x2dd   :  { %v1034_v17 = vpack.c.bf16 %v1010_v15, %v1010_v15 }
 0x2df   :  { %v1102_v21 = vunpack.c.l.b16 %v1034_v17 }
 0x2e2   :  { %v1011_v16 = vpop.f32.mrf.mxu3 }
 0x2e3   :  { %v1012_v18 = vadd.f32 %v2986_v23, %v1011_v16 }
 0x2e5   :  { %v1035_v19 = vpack.c.bf16 %v1012_v18, %v1012_v18  ;;  %v2277_v20 = vpack.c.bf16 %v1012_v18, %v1010_v15  ;;  %v2116_v15 = vld [vmem:[#allocation14 + $0x18] sm:$0xff] }
 0x2e6   :  { %1458 = vmatpush.bf16.msrb.mxu2 %v2116_v15 }
 0x2e7   :  { %2354 = vst [vmem:[#allocation23 + $0x28] sm:$0xff] %v2277_v20   ;;  %v1103_v22 = vunpack.c.l.b16 %v1035_v19 }
 0x2e9   :  { %v1113_v25 = vpack.c.b16 %v1103_v22, %v1102_v21 }
 0x2ea   :  { %v1014_v26 = vpop.f32.mrf.mxu3  ;;  %1459 = vmatpush.bf16.msrb.mxu2 %v2115_v2 }
 0x2eb   :  { %1205 = vmatmul.bf16.gmra.mxu0 %v1113_v25  ;;  %v1015_v28 = vadd.f32 %v2986_v23, %v1014_v26 }
 0x2ed   :  { %v1036_v30 = vpack.c.bf16 %v1015_v28, %v1015_v28 }
 0x2ef   :  { %v1104_v34 = vunpack.c.l.b16 %v1036_v30 }
 0x2f2   :  { %v1016_v29 = vpop.f32.mrf.mxu3 }
 0x2f3   :  { %v1017_v31 = vadd.f32 %v2986_v23, %v1016_v29 }
 0x2f5   :  { %v1037_v32 = vpack.c.bf16 %v1017_v31, %v1017_v31  ;;  %v2282_v33 = vpack.c.bf16 %v1017_v31, %v1015_v28 }
 0x2f7   :  { %2355 = vst [vmem:[#allocation23 + $0x30] sm:$0xff] %v2282_v33   ;;  %v1105_v35 = vunpack.c.l.b16 %v1037_v32  ;;  %v2114_v32 = vld [vmem:[#allocation14 + $0x8] sm:$0xff]  ;;  %v2113_v33 = vld [vmem:[#allocation14] sm:$0xff] }
 0x2f8   :  { %1460 = vmatpush.bf16.msrb.mxu2 %v2114_v32 }
 0x2f9   :  { %v1114_v36 = vpack.c.b16 %v1105_v35, %v1104_v34 }
 0x2fa   :  { %v1019_v37 = vpop.f32.mrf.mxu3 }
 0x2fb   :  { %1210 = vmatmul.bf16.gmra.mxu0 %v1114_v36  ;;  %v1020_v38 = vadd.f32 %v2986_v23, %v1019_v37 }
 0x2fc   :  { %1461 = vmatpush.bf16.msrb.mxu2 %v2113_v33  ;;  %v2122_v33 = vld [vmem:[#allocation16 + $0x8] sm:$0xff] }
 0x2fd   :  { %v1038_v40 = vpack.c.bf16 %v1020_v38, %v1020_v38 }
 0x2ff   :  { %v1106_v44 = vunpack.c.l.b16 %v1038_v40 }
 0x302   :  { %v1021_v39 = vpop.f32.mrf.mxu3 }
 0x303   :  { %v1022_v41 = vadd.f32 %v2986_v23, %v1021_v39 }
 0x305   :  { %v1039_v42 = vpack.c.bf16 %v1022_v41, %v1022_v41  ;;  %v2287_v43 = vpack.c.bf16 %v1022_v41, %v1020_v38 }
 0x307   :  { %2356 = vst [vmem:[#allocation23 + $0x38] sm:$0xff] %v2287_v43   ;;  %v1107_v45 = vunpack.c.l.b16 %v1039_v42 }
 0x308   :  { %1740 = dma.vmem_to_hbm [thread:$0]  %s1733_s10, 1024, %s1735_s8, [#allocation22], %s2741_s5, %s2741_s5, %s2742_s22  }
 0x309   :  { %v1115_v46 = vpack.c.b16 %v1107_v45, %v1106_v44 }
 0x30b   :  { %1215 = vmatmul.bf16.gmra.mxu0 %v1115_v46 }
 0x318   :  { %v1181_v48 = vpop.f32.mrf.mxu0 }
 0x319   :  { %v1182_v50 = vadd.f32 %v3007_v49, %v1181_v48 }
 0x31b   :  { %v1221_v52 = vmax.f32 %v1182_v50, 0.0  ;;  %v3028_v50 = vld [vmem:[%s3094_s12] ss:$0 sm:$0xff]  ;;  %s1682_s12 = sshll.u32 %s3099_s17, 4  ;;  %s1683_s12 = int_to_ptr.hbm [resolvable:$true] %s1682_s12 }
 0x320   :  { %v1183_v51 = vpop.f32.mrf.mxu0 }
 0x321   :  { %v1184_v23 = vadd.f32 %v3007_v49, %v1183_v51  ;;  %v2128_v51 = vld [vmem:[#allocation16 + $0x38] sm:$0xff] }
 0x322   :  { %1595 = vmatpush.bf16.msrb.mxu3 %v2128_v51 }
 0x323   :  { %v1222_v53 = vmax.f32 %v1184_v23, 0.0 }
 0x325   :  { %v1237_v55 = vpack.c.bf16 %v1222_v53, %v1221_v52 }
 0x327   :  { %1321 = vmatmul.bf16.vlgmr.msrb.gmra.mxu1 %v1237_v55 }
 0x328   :  { %v1186_v56 = vpop.f32.mrf.mxu0 }
 0x329   :  { %v1187_v57 = vadd.f32 %v3007_v49, %v1186_v56 }
 0x32b   :  { %v1223_v60 = vmax.f32 %v1187_v57, 0.0  ;;  %v2127_v57 = vld [vmem:[#allocation16 + $0x30] sm:$0xff] }
 0x32c   :  { %1596 = vmatpush.bf16.msrb.mxu3 %v2127_v57 }
 0x330   :  { %v1188_v58 = vpop.f32.mrf.mxu0 }
 0x331   :  { %v1189_v59 = vadd.f32 %v3007_v49, %v1188_v58 }
 0x333   :  { %v1224_v61 = vmax.f32 %v1189_v59, 0.0 }
 0x335   :  { %v1238_v63 = vpack.c.bf16 %v1224_v61, %v1223_v60 }
 0x337   :  { %1326 = vmatmul.bf16.gmra.mxu1 %v1238_v63 }
 0x338   :  { %v1191_v0 = vpop.f32.mrf.mxu0 }
 0x339   :  { %v1192_v1 = vadd.f32 %v3007_v49, %v1191_v0 }
 0x33b   :  { %v1225_v4 = vmax.f32 %v1192_v1, 0.0  ;;  %v2126_v1 = vld [vmem:[#allocation16 + $0x28] sm:$0xff] }
 0x33c   :  { %1597 = vmatpush.bf16.msrb.mxu3 %v2126_v1 }
 0x340   :  { %v1193_v3 = vpop.f32.mrf.mxu0 }
 0x341   :  { %v1194_v24 = vadd.f32 %v3007_v49, %v1193_v3 }
 0x343   :  { %v1226_v5 = vmax.f32 %v1194_v24, 0.0 }
 0x345   :  { %v1239_v6 = vpack.c.bf16 %v1226_v5, %v1225_v4 }
 0x347   :  { %1331 = vmatmul.bf16.gmra.mxu1 %v1239_v6 }
 0x348   :  { %v1196_v8 = vpop.f32.mrf.mxu0 }
 0x349   :  { %v1197_v9 = vadd.f32 %v3007_v49, %v1196_v8 }
 0x34b   :  { %v1227_v12 = vmax.f32 %v1197_v9, 0.0  ;;  %v2125_v9 = vld [vmem:[#allocation16 + $0x20] sm:$0xff] }
 0x34c   :  { %1598 = vmatpush.bf16.msrb.mxu3 %v2125_v9 }
 0x350   :  { %v1198_v10 = vpop.f32.mrf.mxu0 }
 0x351   :  { %v1199_v11 = vadd.f32 %v3007_v49, %v1198_v10 }
 0x353   :  { %v1228_v13 = vmax.f32 %v1199_v11, 0.0 }
 0x355   :  { %v1240_v14 = vpack.c.bf16 %v1228_v13, %v1227_v12 }
 0x357   :  { %1336 = vmatmul.bf16.gmra.mxu1 %v1240_v14 }
 0x358   :  { %v1201_v16 = vpop.f32.mrf.mxu0 }
 0x359   :  { %v1202_v17 = vadd.f32 %v3007_v49, %v1201_v16 }
 0x35b   :  { %v1229_v20 = vmax.f32 %v1202_v17, 0.0  ;;  %v2124_v17 = vld [vmem:[#allocation16 + $0x18] sm:$0xff] }
 0x35c   :  { %1599 = vmatpush.bf16.msrb.mxu3 %v2124_v17 }
 0x360   :  { %v1203_v18 = vpop.f32.mrf.mxu0 }
 0x361   :  { %v1204_v19 = vadd.f32 %v3007_v49, %v1203_v18 }
 0x363   :  { %v1230_v21 = vmax.f32 %v1204_v19, 0.0 }
 0x365   :  { %v1241_v22 = vpack.c.bf16 %v1230_v21, %v1229_v20 }
 0x367   :  { %1341 = vmatmul.bf16.gmra.mxu1 %v1241_v22 }
 0x368   :  { %v1206_v25 = vpop.f32.mrf.mxu0 }
 0x369   :  { %v1207_v26 = vadd.f32 %v3007_v49, %v1206_v25 }
 0x36b   :  { %v1231_v29 = vmax.f32 %v1207_v26, 0.0  ;;  %v2123_v26 = vld [vmem:[#allocation16 + $0x10] sm:$0xff] }
 0x36c   :  { %1600 = vmatpush.bf16.msrb.mxu3 %v2123_v26 }
 0x370   :  { %v1208_v27 = vpop.f32.mrf.mxu0  ;;  %1601 = vmatpush.bf16.msrb.mxu3 %v2122_v33 }
 0x371   :  { %v1209_v28 = vadd.f32 %v3007_v49, %v1208_v27 }
 0x373   :  { %v1232_v30 = vmax.f32 %v1209_v28, 0.0 }
 0x375   :  { %v1242_v31 = vpack.c.bf16 %v1232_v30, %v1231_v29 }
 0x377   :  { %1346 = vmatmul.bf16.gmra.mxu1 %v1242_v31 }
 0x378   :  { %v1211_v34 = vpop.f32.mrf.mxu0 }
 0x379   :  { %v1212_v35 = vadd.f32 %v3007_v49, %v1211_v34 }
 0x37b   :  { %v1233_v38 = vmax.f32 %v1212_v35, 0.0  ;;  %v2121_v35 = vld [vmem:[#allocation16] sm:$0xff] }
 0x37c   :  { %1602 = vmatpush.bf16.msrb.mxu3 %v2121_v35 }
 0x380   :  { %v1213_v36 = vpop.f32.mrf.mxu0 }
 0x381   :  { %v1214_v37 = vadd.f32 %v3007_v49, %v1213_v36 }
 0x383   :  { %v1234_v39 = vmax.f32 %v1214_v37, 0.0 }
 0x385   :  { %v1243_v40 = vpack.c.bf16 %v1234_v39, %v1233_v38 }
 0x387   :  { %1351 = vmatmul.bf16.gmra.mxu1 %v1243_v40 }
 0x388   :  { %v1216_v41 = vpop.f32.mrf.mxu0 }
 0x389   :  { %v1217_v42 = vadd.f32 %v3007_v49, %v1216_v41 }
 0x38b   :  { %v1235_v45 = vmax.f32 %v1217_v42, 0.0 }
 0x390   :  { %v1218_v43 = vpop.f32.mrf.mxu0 }
 0x391   :  { %v1219_v44 = vadd.f32 %v3007_v49, %v1218_v43 }
 0x393   :  { %v1236_v46 = vmax.f32 %v1219_v44, 0.0 }
 0x395   :  { %v1244_v47 = vpack.c.bf16 %v1236_v46, %v1235_v45 }
 0x397   :  { %1356 = vmatmul.bf16.gmra.mxu1 %v1244_v47 }
 0x3a4   :  { %v1322_v48 = vpop.f32.mrf.mxu1 }
 0x3a5   :  { %v1323_v23 = vadd.f32 %v3028_v50, %v1322_v48 }
 0x3a7   :  { %v1362_v54 = vmax.f32 %v1323_v23, 0.0  ;;  %v2386_v23 = vld [vmem:[%s3096_s14] ss:$0 sm:$0xff]  ;;  %s2751_s14 = smov [#allocation18]  }
 0x3a8   :  { %s1693_s7 = sshll.u32 %s2751_s14, 4  ;;  %s1694_s7 = int_to_ptr.vmem [resolvable:$true] %s1693_s7 }
 0x3a9   :  { %1701 = dma.vmem_to_hbm [thread:$0]  %s1694_s7, 1024, %s1696_s0, [#allocation19], %s2741_s5, %s2741_s5, %s2742_s22  }
 0x3aa   :  { %1714 = dma.vmem_to_hbm [thread:$0]  %s1707_s27, 1024, %s1709_s29, [#allocation19], %s2741_s5, %s2741_s5, %s2742_s22  }
 0x3ac   :  { %v1324_v52 = vpop.f32.mrf.mxu1 }
 0x3ad   :  { %v1325_v53 = vadd.f32 %v3028_v50, %v1324_v52 }
 0x3af   :  { %v1363_v55 = vmax.f32 %v1325_v53, 0.0 }
 0x3b1   :  { %v1378_v49 = vpack.c.bf16 %v1363_v55, %v1362_v54 }
 0x3b3   :  { %1462 = vmatmul.bf16.vlgmr.msrb.gmra.mxu2 %v1378_v49 }
 0x3b4   :  { %v1327_v56 = vpop.f32.mrf.mxu1 }
 0x3b5   :  { %v1328_v58 = vadd.f32 %v3028_v50, %v1327_v56 }
 0x3b7   :  { %v1364_v61 = vmax.f32 %v1328_v58, 0.0 }
 0x3bc   :  { %v1329_v59 = vpop.f32.mrf.mxu1 }
 0x3bd   :  { %v1330_v60 = vadd.f32 %v3028_v50, %v1329_v59 }
 0x3bf   :  { %v1365_v62 = vmax.f32 %v1330_v60, 0.0 }
 0x3c1   :  { %v1379_v63 = vpack.c.bf16 %v1365_v62, %v1364_v61 }
 0x3c3   :  { %1467 = vmatmul.bf16.gmra.mxu2 %v1379_v63 }
 0x3c4   :  { %v1332_v0 = vpop.f32.mrf.mxu1 }
 0x3c5   :  { %v1333_v3 = vadd.f32 %v3028_v50, %v1332_v0 }
 0x3c7   :  { %v1366_v5 = vmax.f32 %v1333_v3, 0.0 }
 0x3cc   :  { %v1334_v24 = vpop.f32.mrf.mxu1 }
 0x3cd   :  { %v1335_v4 = vadd.f32 %v3028_v50, %v1334_v24 }
 0x3cf   :  { %v1367_v6 = vmax.f32 %v1335_v4, 0.0 }
 0x3d1   :  { %v1380_v7 = vpack.c.bf16 %v1367_v6, %v1366_v5 }
 0x3d3   :  { %1472 = vmatmul.bf16.gmra.mxu2 %v1380_v7 }
 0x3d4   :  { %v1337_v8 = vpop.f32.mrf.mxu1 }
 0x3d5   :  { %v1338_v10 = vadd.f32 %v3028_v50, %v1337_v8 }
 0x3d7   :  { %v1368_v13 = vmax.f32 %v1338_v10, 0.0 }
 0x3dc   :  { %v1339_v11 = vpop.f32.mrf.mxu1 }
 0x3dd   :  { %v1340_v12 = vadd.f32 %v3028_v50, %v1339_v11 }
 0x3df   :  { %v1369_v14 = vmax.f32 %v1340_v12, 0.0 }
 0x3e1   :  { %v1381_v15 = vpack.c.bf16 %v1369_v14, %v1368_v13 }
 0x3e3   :  { %1477 = vmatmul.bf16.gmra.mxu2 %v1381_v15 }
 0x3e4   :  { %v1342_v16 = vpop.f32.mrf.mxu1 }
 0x3e5   :  { %v1343_v18 = vadd.f32 %v3028_v50, %v1342_v16 }
 0x3e7   :  { %v1370_v21 = vmax.f32 %v1343_v18, 0.0 }
 0x3ec   :  { %v1344_v19 = vpop.f32.mrf.mxu1 }
 0x3ed   :  { %v1345_v20 = vadd.f32 %v3028_v50, %v1344_v19 }
 0x3ef   :  { %v1371_v22 = vmax.f32 %v1345_v20, 0.0 }
 0x3f1   :  { %v1382_v2 = vpack.c.bf16 %v1371_v22, %v1370_v21 }
 0x3f3   :  { %1482 = vmatmul.bf16.gmra.mxu2 %v1382_v2 }
 0x3f4   :  { %v1347_v25 = vpop.f32.mrf.mxu1 }
 0x3f5   :  { %v1348_v27 = vadd.f32 %v3028_v50, %v1347_v25 }
 0x3f7   :  { %v1372_v30 = vmax.f32 %v1348_v27, 0.0 }
 0x3fc   :  { %v1349_v28 = vpop.f32.mrf.mxu1 }
 0x3fd   :  { %v1350_v29 = vadd.f32 %v3028_v50, %v1349_v28 }
 0x3ff   :  { %v1373_v31 = vmax.f32 %v1350_v29, 0.0 }
 0x401   :  { %v1383_v32 = vpack.c.bf16 %v1373_v31, %v1372_v30 }
 0x403   :  { %1487 = vmatmul.bf16.gmra.mxu2 %v1383_v32 }
 0x404   :  { %v1352_v34 = vpop.f32.mrf.mxu1 }
 0x405   :  { %v1353_v36 = vadd.f32 %v3028_v50, %v1352_v34 }
 0x407   :  { %v1374_v39 = vmax.f32 %v1353_v36, 0.0 }
 0x40c   :  { %v1354_v37 = vpop.f32.mrf.mxu1 }
 0x40d   :  { %v1355_v38 = vadd.f32 %v3028_v50, %v1354_v37 }
 0x40f   :  { %v1375_v40 = vmax.f32 %v1355_v38, 0.0 }
 0x411   :  { %v1384_v41 = vpack.c.bf16 %v1375_v40, %v1374_v39 }
 0x413   :  { %1492 = vmatmul.bf16.gmra.mxu2 %v1384_v41 }
 0x414   :  { %v1357_v42 = vpop.f32.mrf.mxu1 }
 0x415   :  { %v1358_v43 = vadd.f32 %v3028_v50, %v1357_v42 }
 0x417   :  { %v1376_v46 = vmax.f32 %v1358_v43, 0.0  ;;  %v2387_v43 = vld [vmem:[%s3098_s16] ss:$0 sm:$0xff]  ;;  %s2755_s16 = smov [#allocation17]  }
 0x418   :  { %s1680_s19 = sshll.u32 %s2755_s16, 4  ;;  %s1681_s19 = int_to_ptr.vmem [resolvable:$true] %s1680_s19 }
 0x41c   :  { %v1359_v44 = vpop.f32.mrf.mxu1 }
 0x41d   :  { %v1360_v45 = vadd.f32 %v3028_v50, %v1359_v44 }
 0x41f   :  { %v1377_v47 = vmax.f32 %v1360_v45, 0.0 }
 0x421   :  { %v1385_v48 = vpack.c.bf16 %v1377_v47, %v1376_v46 }
 0x423   :  { %1497 = vmatmul.bf16.gmra.mxu2 %v1385_v48 }
 0x436   :  { %v1463_v51 = vpop.f32.mrf.mxu2 }
 0x437   :  { %v1464_v52 = vadd.f32 %v2386_v23, %v1463_v51 }
 0x439   :  { %v1503_v55 = vmax.f32 %v1464_v52, 0.0 }
 0x43e   :  { %v1465_v53 = vpop.f32.mrf.mxu2 }
 0x43f   :  { %v1466_v54 = vadd.f32 %v2386_v23, %v1465_v53 }
 0x441   :  { %v1504_v49 = vmax.f32 %v1466_v54, 0.0 }
 0x443   :  { %v1519_v56 = vpack.c.bf16 %v1504_v49, %v1503_v55 }
 0x445   :  { %1603 = vmatmul.bf16.vlgmr.msrb.gmra.mxu3 %v1519_v56 }
 0x446   :  { %v1468_v57 = vpop.f32.mrf.mxu2 }
 0x447   :  { %v1469_v58 = vadd.f32 %v2386_v23, %v1468_v57 }
 0x449   :  { %v1505_v60 = vmax.f32 %v1469_v58, 0.0 }
 0x44e   :  { %v1470_v59 = vpop.f32.mrf.mxu2 }
 0x44f   :  { %v1471_v50 = vadd.f32 %v2386_v23, %v1470_v59 }
 0x451   :  { %v1506_v61 = vmax.f32 %v1471_v50, 0.0 }
 0x453   :  { %v1520_v62 = vpack.c.bf16 %v1506_v61, %v1505_v60 }
 0x455   :  { %1608 = vmatmul.bf16.gmra.mxu3 %v1520_v62 }
 0x456   :  { %v1473_v63 = vpop.f32.mrf.mxu2 }
 0x457   :  { %v1474_v0 = vadd.f32 %v2386_v23, %v1473_v63 }
 0x459   :  { %v1507_v24 = vmax.f32 %v1474_v0, 0.0 }
 0x45e   :  { %v1475_v1 = vpop.f32.mrf.mxu2 }
 0x45f   :  { %v1476_v3 = vadd.f32 %v2386_v23, %v1475_v1 }
 0x461   :  { %v1508_v4 = vmax.f32 %v1476_v3, 0.0 }
 0x463   :  { %v1521_v5 = vpack.c.bf16 %v1508_v4, %v1507_v24 }
 0x465   :  { %1613 = vmatmul.bf16.gmra.mxu3 %v1521_v5 }
 0x466   :  { %v1478_v6 = vpop.f32.mrf.mxu2 }
 0x467   :  { %v1479_v7 = vadd.f32 %v2386_v23, %v1478_v6 }
 0x469   :  { %v1509_v10 = vmax.f32 %v1479_v7, 0.0 }
 0x46e   :  { %v1480_v8 = vpop.f32.mrf.mxu2 }
 0x46f   :  { %v1481_v9 = vadd.f32 %v2386_v23, %v1480_v8 }
 0x471   :  { %v1510_v11 = vmax.f32 %v1481_v9, 0.0 }
 0x473   :  { %v1522_v12 = vpack.c.bf16 %v1510_v11, %v1509_v10 }
 0x475   :  { %1618 = vmatmul.bf16.gmra.mxu3 %v1522_v12 }
 0x476   :  { %v1483_v13 = vpop.f32.mrf.mxu2 }
 0x477   :  { %v1484_v14 = vadd.f32 %v2386_v23, %v1483_v13 }
 0x479   :  { %v1511_v17 = vmax.f32 %v1484_v14, 0.0 }
 0x47e   :  { %v1485_v15 = vpop.f32.mrf.mxu2 }
 0x47f   :  { %v1486_v16 = vadd.f32 %v2386_v23, %v1485_v15 }
 0x481   :  { %v1512_v18 = vmax.f32 %v1486_v16, 0.0 }
 0x483   :  { %v1523_v19 = vpack.c.bf16 %v1512_v18, %v1511_v17 }
 0x485   :  { %1623 = vmatmul.bf16.gmra.mxu3 %v1523_v19 }
 0x486   :  { %v1488_v20 = vpop.f32.mrf.mxu2 }
 0x487   :  { %v1489_v21 = vadd.f32 %v2386_v23, %v1488_v20 }
 0x489   :  { %v1513_v25 = vmax.f32 %v1489_v21, 0.0 }
 0x48e   :  { %v1490_v22 = vpop.f32.mrf.mxu2 }
 0x48f   :  { %v1491_v2 = vadd.f32 %v2386_v23, %v1490_v22 }
 0x491   :  { %v1514_v26 = vmax.f32 %v1491_v2, 0.0 }
 0x493   :  { %v1524_v27 = vpack.c.bf16 %v1514_v26, %v1513_v25 }
 0x495   :  { %1628 = vmatmul.bf16.gmra.mxu3 %v1524_v27 }
 0x496   :  { %v1493_v28 = vpop.f32.mrf.mxu2 }
 0x497   :  { %v1494_v29 = vadd.f32 %v2386_v23, %v1493_v28 }
 0x499   :  { %v1515_v32 = vmax.f32 %v1494_v29, 0.0 }
 0x49e   :  { %v1495_v30 = vpop.f32.mrf.mxu2 }
 0x49f   :  { %v1496_v31 = vadd.f32 %v2386_v23, %v1495_v30 }
 0x4a1   :  { %v1516_v33 = vmax.f32 %v1496_v31, 0.0 }
 0x4a3   :  { %v1525_v34 = vpack.c.bf16 %v1516_v33, %v1515_v32 }
 0x4a5   :  { %1633 = vmatmul.bf16.gmra.mxu3 %v1525_v34 }
 0x4a6   :  { %v1498_v35 = vpop.f32.mrf.mxu2 }
 0x4a7   :  { %v1499_v36 = vadd.f32 %v2386_v23, %v1498_v35 }
 0x4a9   :  { %v1517_v39 = vmax.f32 %v1499_v36, 0.0 }
 0x4ae   :  { %v1500_v37 = vpop.f32.mrf.mxu2 }
 0x4af   :  { %v1501_v38 = vadd.f32 %v2386_v23, %v1500_v37 }
 0x4b1   :  { %v1518_v40 = vmax.f32 %v1501_v38, 0.0 }
 0x4b3   :  { %v1526_v41 = vpack.c.bf16 %v1518_v40, %v1517_v39 }
 0x4b5   :  { %1638 = vmatmul.bf16.gmra.mxu3 %v1526_v41 }
 0x4c8   :  { %v1604_v42 = vpop.f32.mrf.mxu3 }
 0x4c9   :  { %v1605_v45 = vadd.f32 %v2387_v43, %v1604_v42 }
 0x4d0   :  { %v1606_v44 = vpop.f32.mrf.mxu3 }
 0x4d1   :  { %v1607_v46 = vadd.f32 %v2387_v43, %v1606_v44 }
 0x4d3   :  { %v2292_v47 = vpack.c.bf16 %v1607_v46, %v1605_v45 }
 0x4d5   :  { %2293 = vst [vmem:[#allocation17] sm:$0xff] %v2292_v47  }
 0x4d8   :  { %v1609_v48 = vpop.f32.mrf.mxu3 }
 0x4d9   :  { %v1610_v23 = vadd.f32 %v2387_v43, %v1609_v48 }
 0x4e0   :  { %v1611_v51 = vpop.f32.mrf.mxu3 }
 0x4e1   :  { %v1612_v52 = vadd.f32 %v2387_v43, %v1611_v51 }
 0x4e3   :  { %v2297_v53 = vpack.c.bf16 %v1612_v52, %v1610_v23 }
 0x4e5   :  { %2357 = vst [vmem:[#allocation17 + $0x8] sm:$0xff] %v2297_v53  }
 0x4e8   :  { %v1614_v54 = vpop.f32.mrf.mxu3 }
 0x4e9   :  { %v1615_v49 = vadd.f32 %v2387_v43, %v1614_v54 }
 0x4f0   :  { %v1616_v55 = vpop.f32.mrf.mxu3 }
 0x4f1   :  { %v1617_v56 = vadd.f32 %v2387_v43, %v1616_v55 }
 0x4f3   :  { %v2302_v57 = vpack.c.bf16 %v1617_v56, %v1615_v49 }
 0x4f5   :  { %2358 = vst [vmem:[#allocation17 + $0x10] sm:$0xff] %v2302_v57  }
 0x4f8   :  { %v1619_v58 = vpop.f32.mrf.mxu3 }
 0x4f9   :  { %v1620_v50 = vadd.f32 %v2387_v43, %v1619_v58 }
 0x500   :  { %v1621_v59 = vpop.f32.mrf.mxu3 }
 0x501   :  { %v1622_v60 = vadd.f32 %v2387_v43, %v1621_v59 }
 0x503   :  { %v2307_v61 = vpack.c.bf16 %v1622_v60, %v1620_v50 }
 0x505   :  { %2359 = vst [vmem:[#allocation17 + $0x18] sm:$0xff] %v2307_v61  }
 0x508   :  { %v1624_v62 = vpop.f32.mrf.mxu3 }
 0x509   :  { %v1625_v0 = vadd.f32 %v2387_v43, %v1624_v62 }
 0x510   :  { %v1626_v63 = vpop.f32.mrf.mxu3 }
 0x511   :  { %v1627_v1 = vadd.f32 %v2387_v43, %v1626_v63 }
 0x513   :  { %v2312_v3 = vpack.c.bf16 %v1627_v1, %v1625_v0 }
 0x515   :  { %2360 = vst [vmem:[#allocation17 + $0x20] sm:$0xff] %v2312_v3  }
 0x518   :  { %v1629_v24 = vpop.f32.mrf.mxu3 }
 0x519   :  { %v1630_v5 = vadd.f32 %v2387_v43, %v1629_v24 }
 0x520   :  { %v1631_v4 = vpop.f32.mrf.mxu3 }
 0x521   :  { %v1632_v6 = vadd.f32 %v2387_v43, %v1631_v4 }
 0x523   :  { %v2317_v7 = vpack.c.bf16 %v1632_v6, %v1630_v5 }
 0x525   :  { %2361 = vst [vmem:[#allocation17 + $0x28] sm:$0xff] %v2317_v7  }
 0x528   :  { %v1634_v8 = vpop.f32.mrf.mxu3 }
 0x529   :  { %v1635_v10 = vadd.f32 %v2387_v43, %v1634_v8 }
 0x530   :  { %v1636_v9 = vpop.f32.mrf.mxu3 }
 0x531   :  { %v1637_v11 = vadd.f32 %v2387_v43, %v1636_v9 }
 0x533   :  { %v2322_v12 = vpack.c.bf16 %v1637_v11, %v1635_v10 }
 0x535   :  { %2362 = vst [vmem:[#allocation17 + $0x30] sm:$0xff] %v2322_v12  }
 0x538   :  { %v1639_v13 = vpop.f32.mrf.mxu3 }
 0x539   :  { %v1640_v15 = vadd.f32 %v2387_v43, %v1639_v13 }
 0x540   :  { %v1641_v14 = vpop.f32.mrf.mxu3 }
 0x541   :  { %v1642_v16 = vadd.f32 %v2387_v43, %v1641_v14 }
 0x543   :  { %v2327_v17 = vpack.c.bf16 %v1642_v16, %v1640_v15 }
 0x545   :  { %2363 = vst [vmem:[#allocation17 + $0x38] sm:$0xff] %v2327_v17  }
 0x546   :  { %1688 = dma.vmem_to_hbm [thread:$0]  %s1681_s19, 1024, %s1683_s12, [#allocation4], %s2741_s5, %s2741_s5, %s2742_s22  }
 0x547   :  { %2734 = dma.done.wait [#allocation4], 1024  }
 0x548   :  { %2735 = vsyncadd [#allocation4], 4294966272 }
 0x549   :  { %2736 = dma.done.wait [#allocation19], 2048  }
 0x54a   :  { %2737 = vsyncadd [#allocation19], 4294965248 }
 0x54b   :  { %2738 = dma.done.wait [#allocation22], 2048  }
 0x54c   :  { %2739 = vsyncadd [#allocation22], 4294965248 }
 0x54d   :  { %1761 = vsyncpa [#allocation3], 1 }
 0x54e   :  { %1762 = vsyncpa [#allocation6], 1 }
 0x54f   :  { %1763 = vsyncpa [#allocation9], 1 }
 0x550   :  { %1764 = vsyncpa [#allocation12], 1 }
 0x551   :  { %1765 = vsyncpa [#allocation15], 1 }
 0x552   :  { %1766 = vsyncpa [#allocation4], 1 }
 0x553   :  { %1767 = vsyncpa [#allocation19], 1 }
 0x554   :  { %1768 = vsyncpa [#allocation22], 1 }

</bundles_post_ra>
